<compile_context>
chip_gen: v5e
topology: v5e:2x2
jax: 0.10.0
libtpu: 0.0.40
codegen_flags: <defaults>
</compile_context>

<pallas_src>
import jax
import jax.numpy as jnp
from jax.experimental import pallas as pl
from jax.experimental.pallas import tpu as pltpu

# ----------------------------- configuration --------------------------------
N_LATENTS = 8          # sequence length of the latent array (small test size)
CHANNELS = 4           # in/out channels of the latent array
N_HEADS = 2
D_HEAD = 16
INNER = N_HEADS * D_HEAD             # transformer width (32)
DEPTH = 2
CONTEXT_DIM = 32
T_CHANNELS = 32                      # timestep (noise) embedding channels
FF_MULT = 4
FF = INNER * FF_MULT                 # GEGLU hidden width (128)
SIGMA_DATA = 1.0
N_CATEGORIES = 55
LN_EPS = 1e-5

MXU_DTYPE = jnp.bfloat16             # matmul operand dtype (f32 accumulation)
TARGET_ROWS = 128                    # fused rows per grid step (~MXU M on v5e; 256 on v6e/v7x)
NEG_INF = -1e30                      # additive mask for cross-batch attention entries


# --------------------------- in-kernel helpers -------------------------------
def _mm(a, w):
    """MXU matmul: bf16 operands, f32 accumulate."""
    return jnp.dot(a.astype(MXU_DTYPE), w.astype(MXU_DTYPE),
                   preferred_element_type=jnp.float32)


def _ln(x):
    """LayerNorm(affine=False) along the last axis, f32 statistics."""
    mu = jnp.mean(x, axis=-1, keepdims=True)
    var = jnp.mean((x - mu) ** 2, axis=-1, keepdims=True)
    return (x - mu) * jax.lax.rsqrt(var + LN_EPS)


def _silu(x):
    return x * jax.nn.sigmoid(x)


def _mha(q, k, v, out_w, bias, head_mask):
    """Multi-head attention with per-head lane masks (no 16-lane activation slices).

    q: (R, INNER)  k, v: (Tk, INNER) f32;  out_w: (INNER, INNER) bf16
    bias: (R, Tk) additive f32 (0 / -1e30 block-diagonal batch mask)
    head_mask: (N_HEADS, 1, INNER) f32; ones on the head's D_HEAD lanes.

    score_h = (q*mask_h) @ k^T   == per-head QK^T (cross-head lanes zeroed by mask)
    o_h     = softmax_h @ (v*mask_h)  lands in the head's own lanes, so summing over
    heads is exactly the head concat; the output projection is one full matmul.
    """
    scale = D_HEAD ** -0.5
    o = None
    for h in range(N_HEADS):
        mh = head_mask[h]                                          # (1, INNER)
        s = jax.lax.dot_general((q * mh).astype(MXU_DTYPE), k.astype(MXU_DTYPE),
                                (((1,), (1,)), ((), ())),
                                preferred_element_type=jnp.float32)
        s = s * scale + bias
        m = jnp.max(s, axis=-1, keepdims=True)
        p = jnp.exp(s - m)
        l = jnp.sum(p, axis=-1, keepdims=True)
        oh = jnp.dot(p.astype(MXU_DTYPE), (v * mh).astype(MXU_DTYPE),
                     preferred_element_type=jnp.float32)
        oh = oh * pl.reciprocal(l, approx=True)                    # EUP slot
        o = oh if o is None else o + oh
    return _mm(o, out_w)                                           # fused out projection


# ------------------------------ fused kernel ---------------------------------
def _edm_forward_kernel(
    # per-grid-step blocked inputs (VMEM); rows = BT * S, batch-major row order
    coef_ref,                        # (rows, 4)  [c_in, c_skip, c_out, 0] per row
    x_ref,                           # (rows, C)  raw noisy latents
    tfeat_ref,                       # (rows, T_CHANNELS) positional embedding of c_noise
    cond_ref,                        # (BT, T, CONTEXT_DIM) condition
    self_bias_ref,                   # (rows, rows)  block-diagonal batch mask (additive)
    cross_bias_ref,                  # (rows, BT*T)  block-diagonal batch mask (additive)
    # weights (full arrays, resident across the whole grid)
    map0_w_ref, map0_b_ref, map1_w_ref, map1_b_ref,
    proj_in_w_ref,                   # (C, INNER) bf16
    adaln_w_ref, adaln_b_ref,        # (INNER, DEPTH*6*INNER) / (1, DEPTH*6*INNER)
    a1_qkv_w_ref, a1_out_w_ref, a1_out_b_ref,
    a2_q_w_ref, a2_kv_w_ref,         # a2_kv_w: (CONTEXT_DIM, DEPTH*2*INNER) packed over depth
    a2_out_w_ref, a2_out_b_ref,
    ff_glu_w_ref, ff_glu_b_ref, ff_out_w_ref, ff_out_b_ref,
    norm_g_ref, norm_b_ref,
    proj_out_w_ref,                  # (INNER, C) bf16
    head_mask_ref,                   # (N_HEADS, 1, INNER) f32
    # output
    out_ref,                         # (rows, C) f32
):
    n_rows, n_ch = x_ref.shape
    bt, t_len, c_dim = cond_ref.shape

    # ---- EDM preconditioner coefficients (precomputed per batch, expanded per row) ----
    coef = coef_ref[...]
    c_in, c_skip, c_out = coef[:, 0:1], coef[:, 1:2], coef[:, 2:3]

    x = x_ref[...]                                   # (rows, C)
    x_in = x * c_in

    # ---- timestep embedding MLP: SiLU(L1(SiLU(L0(pos_emb)))) ----
    t_feat = tfeat_ref[...]                          # (rows, T_CHANNELS)
    t0 = _silu(_mm(t_feat, map0_w_ref[...]) + map0_b_ref[...])
    t_emb = _silu(_mm(t0, map1_w_ref[...]) + map1_b_ref[...])      # (rows, INNER)
    # AdaLayerNorm applies its own SiLU to the timestep embedding (matches reference,
    # i.e. this is intentionally applied on top of the MLP's SiLU output).
    t_ada = _silu(t_emb)

    # ---- ALL AdaLN (scale, shift) pairs for every depth in ONE packed matmul ----
    adaln_all = _mm(t_ada, adaln_w_ref[...]) + adaln_b_ref[...]    # (rows, DEPTH*6*INNER)

    # ---- cross-attention K/V for every depth in ONE packed matmul (cond loop-invariant) ----
    cond = cond_ref[...].reshape(bt * t_len, c_dim)                # (BT*T, CONTEXT_DIM)
    kv_all = _mm(cond, a2_kv_w_ref[...])                           # (BT*T, DEPTH*2*INNER)

    head_mask = head_mask_ref[...]
    self_bias = self_bias_ref[...]
    cross_bias = cross_bias_ref[...]

    # ---- proj_in ----
    h = _mm(x_in, proj_in_w_ref[...])                              # (rows, INNER)

    # ---- DEPTH x (AdaLN + self-attn, AdaLN + cross-attn, AdaLN + GEGLU FF) ----
    for d in range(DEPTH):
        base = d * 6 * INNER

        def ada_norm(hh, k, _base=base):
            sc = adaln_all[:, _base + 2 * k * INNER:_base + (2 * k + 1) * INNER]
            sh = adaln_all[:, _base + (2 * k + 1) * INNER:_base + (2 * k + 2) * INNER]
            return _ln(hh) * (1.0 + sc) + sh

        # -- self attention (packed q/k/v matmul, block-diagonal batch mask) --
        hn = ada_norm(h, 0)
        qkv = _mm(hn, a1_qkv_w_ref[d])                             # (rows, 3*INNER)
        attn = _mha(qkv[:, :INNER], qkv[:, INNER:2 * INNER], qkv[:, 2 * INNER:],
                    a1_out_w_ref[d], self_bias, head_mask)
        h = h + attn + a1_out_b_ref[d]

        # -- cross attention over the condition (K/V hoisted out of the loop) --
        hn = ada_norm(h, 1)
        q = _mm(hn, a2_q_w_ref[d])                                 # (rows, INNER)
        koff = d * 2 * INNER
        attn = _mha(q, kv_all[:, koff:koff + INNER], kv_all[:, koff + INNER:koff + 2 * INNER],
                    a2_out_w_ref[d], cross_bias, head_mask)
        h = h + attn + a2_out_b_ref[d]

        # -- GEGLU feed-forward --
        hn = ada_norm(h, 2)
        glu = _mm(hn, ff_glu_w_ref[d]) + ff_glu_b_ref[d]           # (rows, 2*FF)
        # TODO(synk): PyTorch F.gelu default is exact (erf); tanh approximation used here.
        ff = glu[:, :FF] * jax.nn.gelu(glu[:, FF:], approximate=True)
        h = h + _mm(ff, ff_out_w_ref[d]) + ff_out_b_ref[d]

    # ---- final LayerNorm (affine) + proj_out + EDM skip/out combination ----
    hn = _ln(h) * norm_g_ref[...] + norm_b_ref[...]
    f_x = _mm(hn, proj_out_w_ref[...])                             # (rows, C)
    out_ref[...] = c_skip * x + c_out * f_x


# ------------------------------ host-side wrapper -----------------------------
_WEIGHT_ORDER = (
    "map0_w", "map0_b", "map1_w", "map1_b", "proj_in_w",
    "adaln_w", "adaln_b",
    "a1_qkv_w", "a1_out_w", "a1_out_b",
    "a2_q_w", "a2_kv_w", "a2_out_w", "a2_out_b",
    "ff_glu_w", "ff_glu_b", "ff_out_w", "ff_out_b",
    "norm_g", "norm_b", "proj_out_w", "head_mask",
)


def _full_spec(arr):
    nd = arr.ndim
    return pl.BlockSpec(arr.shape, lambda i, _nd=nd: (0,) * _nd)


def _pick_block_batch(B, S):
    """Batches fused per grid step: aim for ~TARGET_ROWS rows, keep grid >= 2 (v7x 2 TCs)."""
    bt = max(1, min(B, max(1, TARGET_ROWS // S)))
    if B >= 2:
        bt = min(bt, max(1, B // 2))
    while B % bt:                                   # make the grid tile B exactly
        bt -= 1
    return bt


@jax.jit
def forward_condition(packed, x, sigma, cond):
    """EDM preconditioned forward. x: (B,S,C), sigma: (B,), cond: (B,T,CONTEXT_DIM)."""
    B, S, C = x.shape
    T = cond.shape[1]
    bt = _pick_block_batch(B, S)
    rows = bt * S
    num_steps = B // bt

    x_flat = x.astype(jnp.float32).reshape(B * S, C)     # batch-major row slab (bitcast)
    sigma32 = sigma.astype(jnp.float32).reshape(-1)
    cond32 = cond.astype(jnp.float32)

    # EDM preconditioner coefficients on the host scalar path, expanded per row.
    denom = sigma32 ** 2 + SIGMA_DATA ** 2
    coef = jnp.stack([jax.lax.rsqrt(denom),                        # c_in
                      (SIGMA_DATA ** 2) / denom,                   # c_skip
                      sigma32 * SIGMA_DATA * jax.lax.rsqrt(denom), # c_out
                      jnp.zeros_like(denom)], axis=-1)             # (B, 4)
    coef_rows = jnp.repeat(coef, S, axis=0)                        # (B*S, 4)

    # EDM positional embedding of c_noise = log(sigma)/4 (tiny; one XLA fusion).
    # TODO(synk): sin/cos of the noise level stays outside Pallas (no in-kernel sin/cos).
    half = T_CHANNELS // 2
    freqs = (1.0 / 10000.0) ** (jnp.arange(half, dtype=jnp.float32) / half)
    ang = (jnp.log(sigma32) / 4.0)[:, None] * freqs[None, :]
    t_feat = jnp.concatenate([jnp.cos(ang), jnp.sin(ang)], axis=1)  # (B, T_CHANNELS)
    t_feat_rows = jnp.repeat(t_feat, S, axis=0)                     # (B*S, T_CHANNELS)

    # Block-diagonal additive masks keeping the fused batches independent in attention.
    rid = jnp.arange(rows, dtype=jnp.int32) // S                    # batch id of each row
    cid = jnp.arange(bt * T, dtype=jnp.int32) // T                  # batch id of each key
    self_bias = jnp.where(rid[:, None] == rid[None, :], 0.0, NEG_INF).astype(jnp.float32)
    cross_bias = jnp.where(rid[:, None] == cid[None, :], 0.0, NEG_INF).astype(jnp.float32)

    weights = [packed[k] for k in _WEIGHT_ORDER]

    in_specs = [
        pl.BlockSpec((rows, 4), lambda i: (i, 0)),                  # coef (per row)
        pl.BlockSpec((rows, C), lambda i: (i, 0)),                  # x (flat rows)
        pl.BlockSpec((rows, T_CHANNELS), lambda i: (i, 0)),         # timestep features
        pl.BlockSpec((bt, T, CONTEXT_DIM), lambda i: (i, 0, 0)),    # condition
        _full_spec(self_bias),
        _full_spec(cross_bias),
    ] + [_full_spec(w) for w in weights]
    # NOTE: weights (~100 KB) are grid-invariant; at this size double-buffering them is
    # harmless on all generations.  Before scaling DEPTH/INNER up, single-buffer them /
    # raise vmem_limit_bytes (v7x has only 64 MiB VMEM).

    out_flat = pl.pallas_call(
        _edm_forward_kernel,
        out_shape=jax.ShapeDtypeStruct((B * S, C), jnp.float32),
        grid=(num_steps,),
        in_specs=in_specs,
        out_specs=pl.BlockSpec((rows, C), lambda i: (i, 0)),
        compiler_params=pltpu.CompilerParams(
            dimension_semantics=("parallel",),       # shard grid steps across TensorCores
            vmem_limit_bytes=32 * 1024 * 1024,
        ),
    )(coef_rows, x_flat, t_feat_rows, cond32, self_bias, cross_bias, *weights)

    return {"D_x": out_flat.reshape(B, S, C)}


def edm_precond_forward(packed, data_dict):
    x = data_dict["noise"]
    sigma = data_dict["sigma"]
    condition = data_dict["condition"]
    if jnp.issubdtype(condition.dtype, jnp.floating):
        # condition + 0.0 * emb_category(zeros) is a numerical no-op.
        cond = condition.astype(jnp.float32)
    else:
        # TODO(synk): embedding gather stays in XLA (jnp.take); not a Pallas kernel.
        cond = jnp.take(packed["category_emb"], condition, axis=0)[:, None, :]
    return forward_condition(packed, x, sigma, cond)


# --------------------------------- parameters --------------------------------
def init_params(key):
    keys = iter(jax.random.split(key, 512))

    def dense(shape, scale=0.02):
        return scale * jax.random.normal(next(keys), shape, jnp.float32)

    def zeros(shape):
        return jnp.zeros(shape, jnp.float32)

    params = {
        "category_emb": dense((N_CATEGORIES, CONTEXT_DIM), 1.0),
        "map0_w": dense((T_CHANNELS, INNER)), "map0_b": zeros((INNER,)),
        "map1_w": dense((INNER, INNER)), "map1_b": zeros((INNER,)),
        "proj_in_w": dense((CHANNELS, INNER)),
        "norm_g": jnp.ones((INNER,), jnp.float32), "norm_b": zeros((INNER,)),
        # NOTE: original proj_out is zero-initialized; random here to exercise kernels.
        "proj_out_w": dense((INNER, CHANNELS)),
        "blocks": [],
    }
    for _ in range(DEPTH):
        blk = {
            "norm1_w": dense((INNER, 2 * INNER)), "norm1_b": zeros((2 * INNER,)),
            "attn1": {"to_q_w": dense((INNER, INNER)),
                      "to_k_w": dense((INNER, INNER)),
                      "to_v_w": dense((INNER, INNER)),
                      "to_out_w": dense((INNER, INNER)),
                      "to_out_b": zeros((INNER,))},
            "norm2_w": dense((INNER, 2 * INNER)), "norm2_b": zeros((2 * INNER,)),
            "attn2": {"to_q_w": dense((INNER, INNER)),
                      "to_k_w": dense((CONTEXT_DIM, INNER)),
                      "to_v_w": dense((CONTEXT_DIM, INNER)),
                      "to_out_w": dense((INNER, INNER)),
                      "to_out_b": zeros((INNER,))},
            "norm3_w": dense((INNER, 2 * INNER)), "norm3_b": zeros((2 * INNER,)),
            "ff": {"geglu_w": dense((INNER, 2 * FF)), "geglu_b": zeros((2 * FF,)),
                   "out_w": dense((FF, INNER)), "out_b": zeros((INNER,))},
        }
        params["blocks"].append(blk)
    return params


def pack_params(p):
    """Pack q/k/v per block, pack the AdaLN linears and the cross-attn K/V projections
    across ALL depths (so they can be hoisted out of the depth loop), stack the remaining
    per-block weights along a DEPTH axis, cast matmul weights to bf16, and build the
    per-head lane masks used to avoid 16-lane activation slices in attention."""
    bf = lambda a: a.astype(MXU_DTYPE)
    f32 = lambda a: a.astype(jnp.float32)

    def stack(fn):
        return jnp.stack([fn(blk) for blk in p["blocks"]], axis=0)

    adaln_w = jnp.concatenate(
        [jnp.concatenate([blk["norm1_w"], blk["norm2_w"], blk["norm3_w"]], axis=1)
         for blk in p["blocks"]], axis=1)                           # (INNER, DEPTH*6*INNER)
    adaln_b = jnp.concatenate(
        [jnp.concatenate([blk["norm1_b"], blk["norm2_b"], blk["norm3_b"]])
         for blk in p["blocks"]]).reshape(1, DEPTH * 6 * INNER)
    a2_kv_w = jnp.concatenate(
        [jnp.concatenate([blk["attn2"]["to_k_w"], blk["attn2"]["to_v_w"]], axis=1)
         for blk in p["blocks"]], axis=1)                           # (CONTEXT_DIM, DEPTH*2*INNER)

    head_mask = jnp.zeros((N_HEADS, 1, INNER), jnp.float32)
    for h in range(N_HEADS):
        head_mask = head_mask.at[h, 0, h * D_HEAD:(h + 1) * D_HEAD].set(1.0)

    return {
        "category_emb": f32(p["category_emb"]),
        "map0_w": bf(p["map0_w"]), "map0_b": f32(p["map0_b"]).reshape(1, INNER),
        "map1_w": bf(p["map1_w"]), "map1_b": f32(p["map1_b"]).reshape(1, INNER),
        "proj_in_w": bf(p["proj_in_w"]),
        "adaln_w": bf(adaln_w), "adaln_b": f32(adaln_b),
        "a1_qkv_w": stack(lambda blk: bf(jnp.concatenate(
            [blk["attn1"]["to_q_w"], blk["attn1"]["to_k_w"],
             blk["attn1"]["to_v_w"]], axis=1))),
        "a1_out_w": stack(lambda blk: bf(blk["attn1"]["to_out_w"])),
        "a1_out_b": stack(lambda blk: f32(blk["attn1"]["to_out_b"]).reshape(1, INNER)),
        "a2_q_w": stack(lambda blk: bf(blk["attn2"]["to_q_w"])),
        "a2_kv_w": bf(a2_kv_w),
        "a2_out_w": stack(lambda blk: bf(blk["attn2"]["to_out_w"])),
        "a2_out_b": stack(lambda blk: f32(blk["attn2"]["to_out_b"]).reshape(1, INNER)),
        "ff_glu_w": stack(lambda blk: bf(blk["ff"]["geglu_w"])),
        "ff_glu_b": stack(lambda blk: f32(blk["ff"]["geglu_b"]).reshape(1, 2 * FF)),
        "ff_out_w": stack(lambda blk: bf(blk["ff"]["out_w"])),
        "ff_out_b": stack(lambda blk: f32(blk["ff"]["out_b"]).reshape(1, INNER)),
        "norm_g": f32(p["norm_g"]).reshape(1, INNER),
        "norm_b": f32(p["norm_b"]).reshape(1, INNER),
        "proj_out_w": bf(p["proj_out_w"]),
        "head_mask": head_mask,
    }


# ------------------------------------ main ------------------------------------
if __name__ == "__main__":
    key = jax.random.PRNGKey(0)
    pk, xk, sk, ck = jax.random.split(key, 4)
    params = init_params(pk)
    packed = pack_params(params)

    # B=4 exercises batch fusion (2 batches fused per grid step) while keeping the grid
    # length at 2 so both v7x TensorCores get work.
    B = 4
    noise = jax.random.normal(xk, (B, N_LATENTS, CHANNELS), jnp.float32)
    sigma = jnp.exp(jax.random.normal(sk, (B,), jnp.float32))        # positive sigmas
    condition = jax.random.randint(ck, (B,), 0, N_CATEGORIES)        # class labels

    data_dict = {"noise": noise, "sigma": sigma, "condition": condition}
    out = edm_precond_forward(packed, data_dict)
    d_x = jax.block_until_ready(out["D_x"])

    assert d_x.shape == (B, N_LATENTS, CHANNELS)
    assert d_x.dtype == jnp.float32
    assert bool(jnp.all(jnp.isfinite(d_x)))
    print("KERNEL_OK")
</pallas_src>

<mosaic_0001>
module attributes {stable_mosaic.version = 11 : i64} {
  func.func @_edm_forward_kernel(%arg0: i32, %arg1: memref<16x4xf32, #tpu.memory_space<vmem>>, %arg2: memref<16x4xf32, #tpu.memory_space<vmem>>, %arg3: memref<16x32xf32, #tpu.memory_space<vmem>>, %arg4: memref<2x1x32xf32, #tpu.memory_space<vmem>>, %arg5: memref<16x16xf32, #tpu.memory_space<vmem>>, %arg6: memref<16x2xf32, #tpu.memory_space<vmem>>, %arg7: memref<32x32xbf16, #tpu.memory_space<vmem>>, %arg8: memref<1x32xf32, #tpu.memory_space<vmem>>, %arg9: memref<32x32xbf16, #tpu.memory_space<vmem>>, %arg10: memref<1x32xf32, #tpu.memory_space<vmem>>, %arg11: memref<4x32xbf16, #tpu.memory_space<vmem>>, %arg12: memref<32x384xbf16, #tpu.memory_space<vmem>>, %arg13: memref<1x384xf32, #tpu.memory_space<vmem>>, %arg14: memref<2x32x96xbf16, #tpu.memory_space<vmem>>, %arg15: memref<2x32x32xbf16, #tpu.memory_space<vmem>>, %arg16: memref<2x1x32xf32, #tpu.memory_space<vmem>>, %arg17: memref<2x32x32xbf16, #tpu.memory_space<vmem>>, %arg18: memref<32x128xbf16, #tpu.memory_space<vmem>>, %arg19: memref<2x32x32xbf16, #tpu.memory_space<vmem>>, %arg20: memref<2x1x32xf32, #tpu.memory_space<vmem>>, %arg21: memref<2x32x256xbf16, #tpu.memory_space<vmem>>, %arg22: memref<2x1x256xf32, #tpu.memory_space<vmem>>, %arg23: memref<2x128x32xbf16, #tpu.memory_space<vmem>>, %arg24: memref<2x1x32xf32, #tpu.memory_space<vmem>>, %arg25: memref<1x32xf32, #tpu.memory_space<vmem>>, %arg26: memref<1x32xf32, #tpu.memory_space<vmem>>, %arg27: memref<32x4xbf16, #tpu.memory_space<vmem>>, %arg28: memref<2x1x32xf32, #tpu.memory_space<vmem>>, %arg29: memref<16x4xf32, #tpu.memory_space<vmem>>) attributes {dimension_semantics = [#tpu.dimension_semantics<parallel>], iteration_bounds = array<i64: 2>, scalar_prefetch = 0 : i64, scratch_operands = 0 : i64, tpu.core_type = #tpu.core_type<tc>, window_params = [{transform_indices = @transform_0, window_bounds = array<i64: 16, 4>}, {transform_indices = @transform_1, window_bounds = array<i64: 16, 4>}, {transform_indices = @transform_2, window_bounds = array<i64: 16, 32>}, {transform_indices = @transform_3, window_bounds = array<i64: 2, 1, 32>}, {pipeline_mode = #tpu.pipeline_mode<synchronous>, transform_indices = @transform_4, window_bounds = array<i64: 16, 16>}, {pipeline_mode = #tpu.pipeline_mode<synchronous>, transform_indices = @transform_5, window_bounds = array<i64: 16, 2>}, {pipeline_mode = #tpu.pipeline_mode<synchronous>, transform_indices = @transform_6, window_bounds = array<i64: 32, 32>}, {pipeline_mode = #tpu.pipeline_mode<synchronous>, transform_indices = @transform_7, window_bounds = array<i64: 1, 32>}, {pipeline_mode = #tpu.pipeline_mode<synchronous>, transform_indices = @transform_8, window_bounds = array<i64: 32, 32>}, {pipeline_mode = #tpu.pipeline_mode<synchronous>, transform_indices = @transform_9, window_bounds = array<i64: 1, 32>}, {pipeline_mode = #tpu.pipeline_mode<synchronous>, transform_indices = @transform_10, window_bounds = array<i64: 4, 32>}, {pipeline_mode = #tpu.pipeline_mode<synchronous>, transform_indices = @transform_11, window_bounds = array<i64: 32, 384>}, {pipeline_mode = #tpu.pipeline_mode<synchronous>, transform_indices = @transform_12, window_bounds = array<i64: 1, 384>}, {pipeline_mode = #tpu.pipeline_mode<synchronous>, transform_indices = @transform_13, window_bounds = array<i64: 2, 32, 96>}, {pipeline_mode = #tpu.pipeline_mode<synchronous>, transform_indices = @transform_14, window_bounds = array<i64: 2, 32, 32>}, {pipeline_mode = #tpu.pipeline_mode<synchronous>, transform_indices = @transform_15, window_bounds = array<i64: 2, 1, 32>}, {pipeline_mode = #tpu.pipeline_mode<synchronous>, transform_indices = @transform_16, window_bounds = array<i64: 2, 32, 32>}, {pipeline_mode = #tpu.pipeline_mode<synchronous>, transform_indices = @transform_17, window_bounds = array<i64: 32, 128>}, {pipeline_mode = #tpu.pipeline_mode<synchronous>, transform_indices = @transform_18, window_bounds = array<i64: 2, 32, 32>}, {pipeline_mode = #tpu.pipeline_mode<synchronous>, transform_indices = @transform_19, window_bounds = array<i64: 2, 1, 32>}, {pipeline_mode = #tpu.pipeline_mode<synchronous>, transform_indices = @transform_20, window_bounds = array<i64: 2, 32, 256>}, {pipeline_mode = #tpu.pipeline_mode<synchronous>, transform_indices = @transform_21, window_bounds = array<i64: 2, 1, 256>}, {pipeline_mode = #tpu.pipeline_mode<synchronous>, transform_indices = @transform_22, window_bounds = array<i64: 2, 128, 32>}, {pipeline_mode = #tpu.pipeline_mode<synchronous>, transform_indices = @transform_23, window_bounds = array<i64: 2, 1, 32>}, {pipeline_mode = #tpu.pipeline_mode<synchronous>, transform_indices = @transform_24, window_bounds = array<i64: 1, 32>}, {pipeline_mode = #tpu.pipeline_mode<synchronous>, transform_indices = @transform_25, window_bounds = array<i64: 1, 32>}, {pipeline_mode = #tpu.pipeline_mode<synchronous>, transform_indices = @transform_26, window_bounds = array<i64: 32, 4>}, {pipeline_mode = #tpu.pipeline_mode<synchronous>, transform_indices = @transform_27, window_bounds = array<i64: 2, 1, 32>}, {transform_indices = @transform_28, window_bounds = array<i64: 16, 4>}]} {
    %c0 = arith.constant 0 : index
    %c0_0 = arith.constant 0 : index
    %0 = vector.load %arg1[%c0, %c0_0] : memref<16x4xf32, #tpu.memory_space<vmem>>, vector<16x4xf32>
    %1 = vector.extract_strided_slice %0 {offsets = [0, 0], sizes = [16, 1], strides = [1, 1]} : vector<16x4xf32> to vector<16x1xf32>
    %2 = vector.extract_strided_slice %0 {offsets = [0, 1], sizes = [16, 1], strides = [1, 1]} : vector<16x4xf32> to vector<16x1xf32>
    %3 = vector.extract_strided_slice %0 {offsets = [0, 2], sizes = [16, 1], strides = [1, 1]} : vector<16x4xf32> to vector<16x1xf32>
    %c0_1 = arith.constant 0 : index
    %c0_2 = arith.constant 0 : index
    %4 = vector.load %arg2[%c0_1, %c0_2] : memref<16x4xf32, #tpu.memory_space<vmem>>, vector<16x4xf32>
    %5 = vector.broadcast %1 : vector<16x1xf32> to vector<16x4xf32>
    %6 = arith.mulf %4, %5 : vector<16x4xf32>
    %c0_3 = arith.constant 0 : index
    %c0_4 = arith.constant 0 : index
    %7 = vector.load %arg3[%c0_3, %c0_4] : memref<16x32xf32, #tpu.memory_space<vmem>>, vector<16x32xf32>
    %c0_5 = arith.constant 0 : index
    %c0_6 = arith.constant 0 : index
    %8 = vector.load %arg7[%c0_5, %c0_6] : memref<32x32xbf16, #tpu.memory_space<vmem>>, vector<32x32xbf16>
    %9 = arith.truncf %7 : vector<16x32xf32> to vector<16x32xbf16>
    %cst = arith.constant dense<0.000000e+00> : vector<16x32xf32>
    %10 = tpu.matmul %9, %8, %cst {dimension_numbers = #tpu.dot_dimension_numbers<[1], [0], [0], [1], [0, 0, 1, 1], [], []>} : vector<16x32xbf16>, vector<32x32xbf16>, vector<16x32xf32> -> vector<16x32xf32>
    %c0_7 = arith.constant 0 : index
    %c0_8 = arith.constant 0 : index
    %11 = vector.load %arg8[%c0_7, %c0_8] : memref<1x32xf32, #tpu.memory_space<vmem>>, vector<1x32xf32>
    %12 = vector.broadcast %11 : vector<1x32xf32> to vector<16x32xf32>
    %13 = arith.addf %10, %12 : vector<16x32xf32>
    %14 = arith.negf %13 : vector<16x32xf32>
    %15 = math.exp %14 : vector<16x32xf32>
    %cst_9 = arith.constant 1.000000e+00 : f32
    %16 = vector.broadcast %cst_9 : f32 to vector<16x32xf32>
    %17 = arith.addf %16, %15 : vector<16x32xf32>
    %18 = arith.divf %16, %17 : vector<16x32xf32>
    %19 = arith.mulf %13, %18 : vector<16x32xf32>
    %c0_10 = arith.constant 0 : index
    %c0_11 = arith.constant 0 : index
    %20 = vector.load %arg9[%c0_10, %c0_11] : memref<32x32xbf16, #tpu.memory_space<vmem>>, vector<32x32xbf16>
    %21 = arith.truncf %19 : vector<16x32xf32> to vector<16x32xbf16>
    %cst_12 = arith.constant dense<0.000000e+00> : vector<16x32xf32>
    %22 = tpu.matmul %21, %20, %cst_12 {dimension_numbers = #tpu.dot_dimension_numbers<[1], [0], [0], [1], [0, 0, 1, 1], [], []>} : vector<16x32xbf16>, vector<32x32xbf16>, vector<16x32xf32> -> vector<16x32xf32>
    %c0_13 = arith.constant 0 : index
    %c0_14 = arith.constant 0 : index
    %23 = vector.load %arg10[%c0_13, %c0_14] : memref<1x32xf32, #tpu.memory_space<vmem>>, vector<1x32xf32>
    %24 = vector.broadcast %23 : vector<1x32xf32> to vector<16x32xf32>
    %25 = arith.addf %22, %24 : vector<16x32xf32>
    %26 = arith.negf %25 : vector<16x32xf32>
    %27 = math.exp %26 : vector<16x32xf32>
    %cst_15 = arith.constant 1.000000e+00 : f32
    %28 = vector.broadcast %cst_15 : f32 to vector<16x32xf32>
    %29 = arith.addf %28, %27 : vector<16x32xf32>
    %30 = arith.divf %28, %29 : vector<16x32xf32>
    %31 = arith.mulf %25, %30 : vector<16x32xf32>
    %32 = arith.negf %31 : vector<16x32xf32>
    %33 = math.exp %32 : vector<16x32xf32>
    %cst_16 = arith.constant 1.000000e+00 : f32
    %34 = vector.broadcast %cst_16 : f32 to vector<16x32xf32>
    %35 = arith.addf %34, %33 : vector<16x32xf32>
    %36 = arith.divf %34, %35 : vector<16x32xf32>
    %37 = arith.mulf %31, %36 : vector<16x32xf32>
    %c0_17 = arith.constant 0 : index
    %c0_18 = arith.constant 0 : index
    %38 = vector.load %arg12[%c0_17, %c0_18] : memref<32x384xbf16, #tpu.memory_space<vmem>>, vector<32x384xbf16>
    %39 = arith.truncf %37 : vector<16x32xf32> to vector<16x32xbf16>
    %cst_19 = arith.constant dense<0.000000e+00> : vector<16x384xf32>
    %40 = tpu.matmul %39, %38, %cst_19 {dimension_numbers = #tpu.dot_dimension_numbers<[1], [0], [0], [1], [0, 0, 1, 1], [], []>} : vector<16x32xbf16>, vector<32x384xbf16>, vector<16x384xf32> -> vector<16x384xf32>
    %c0_20 = arith.constant 0 : index
    %c0_21 = arith.constant 0 : index
    %41 = vector.load %arg13[%c0_20, %c0_21] : memref<1x384xf32, #tpu.memory_space<vmem>>, vector<1x384xf32>
    %42 = vector.broadcast %41 : vector<1x384xf32> to vector<16x384xf32>
    %43 = arith.addf %40, %42 : vector<16x384xf32>
    %c0_22 = arith.constant 0 : index
    %c0_23 = arith.constant 0 : index
    %c0_24 = arith.constant 0 : index
    %44 = vector.load %arg4[%c0_22, %c0_23, %c0_24] : memref<2x1x32xf32, #tpu.memory_space<vmem>>, vector<2x1x32xf32>
    %45 = vector.shape_cast %44 : vector<2x1x32xf32> to vector<2x32xf32>
    %c0_25 = arith.constant 0 : index
    %c0_26 = arith.constant 0 : index
    %46 = vector.load %arg18[%c0_25, %c0_26] : memref<32x128xbf16, #tpu.memory_space<vmem>>, vector<32x128xbf16>
    %47 = arith.truncf %45 : vector<2x32xf32> to vector<2x32xbf16>
    %cst_27 = arith.constant dense<0.000000e+00> : vector<2x128xf32>
    %48 = tpu.matmul %47, %46, %cst_27 {dimension_numbers = #tpu.dot_dimension_numbers<[1], [0], [0], [1], [0, 0, 1, 1], [], []>} : vector<2x32xbf16>, vector<32x128xbf16>, vector<2x128xf32> -> vector<2x128xf32>
    %c0_28 = arith.constant 0 : index
    %c0_29 = arith.constant 0 : index
    %c0_30 = arith.constant 0 : index
    %49 = vector.load %arg28[%c0_28, %c0_29, %c0_30] : memref<2x1x32xf32, #tpu.memory_space<vmem>>, vector<2x1x32xf32>
    %c0_31 = arith.constant 0 : index
    %c0_32 = arith.constant 0 : index
    %50 = vector.load %arg5[%c0_31, %c0_32] : memref<16x16xf32, #tpu.memory_space<vmem>>, vector<16x16xf32>
    %c0_33 = arith.constant 0 : index
    %c0_34 = arith.constant 0 : index
    %51 = vector.load %arg6[%c0_33, %c0_34] : memref<16x2xf32, #tpu.memory_space<vmem>>, vector<16x2xf32>
    %c0_35 = arith.constant 0 : index
    %c0_36 = arith.constant 0 : index
    %52 = vector.load %arg11[%c0_35, %c0_36] : memref<4x32xbf16, #tpu.memory_space<vmem>>, vector<4x32xbf16>
    %53 = arith.truncf %6 : vector<16x4xf32> to vector<16x4xbf16>
    %cst_37 = arith.constant dense<0.000000e+00> : vector<16x32xf32>
    %54 = tpu.matmul %53, %52, %cst_37 {dimension_numbers = #tpu.dot_dimension_numbers<[1], [0], [0], [1], [0, 0, 1, 1], [], []>} : vector<16x4xbf16>, vector<4x32xbf16>, vector<16x32xf32> -> vector<16x32xf32>
    %55 = vector.extract_strided_slice %43 {offsets = [0, 0], sizes = [16, 32], strides = [1, 1]} : vector<16x384xf32> to vector<16x32xf32>
    %56 = vector.extract_strided_slice %43 {offsets = [0, 32], sizes = [16, 32], strides = [1, 1]} : vector<16x384xf32> to vector<16x32xf32>
    %cst_38 = arith.constant dense<0.000000e+00> : vector<16xf32>
    %57 = vector.multi_reduction <add>, %54, %cst_38 [1] : vector<16x32xf32> to vector<16xf32>
    %58 = vector.shape_cast %57 : vector<16xf32> to vector<16x1xf32>
    %cst_39 = arith.constant 3.200000e+01 : f32
    %59 = vector.broadcast %cst_39 : f32 to vector<16x1xf32>
    %60 = arith.divf %58, %59 : vector<16x1xf32>
    %61 = vector.broadcast %60 : vector<16x1xf32> to vector<16x32xf32>
    %62 = arith.subf %54, %61 : vector<16x32xf32>
    %63 = arith.mulf %62, %62 : vector<16x32xf32>
    %cst_40 = arith.constant dense<0.000000e+00> : vector<16xf32>
    %64 = vector.multi_reduction <add>, %63, %cst_40 [1] : vector<16x32xf32> to vector<16xf32>
    %65 = vector.shape_cast %64 : vector<16xf32> to vector<16x1xf32>
    %cst_41 = arith.constant 3.200000e+01 : f32
    %66 = vector.broadcast %cst_41 : f32 to vector<16x1xf32>
    %67 = arith.divf %65, %66 : vector<16x1xf32>
    %68 = vector.broadcast %60 : vector<16x1xf32> to vector<16x32xf32>
    %69 = arith.subf %54, %68 : vector<16x32xf32>
    %cst_42 = arith.constant 9.99999974E-6 : f32
    %70 = vector.broadcast %cst_42 : f32 to vector<16x1xf32>
    %71 = arith.addf %67, %70 : vector<16x1xf32>
    %72 = math.rsqrt %71 : vector<16x1xf32>
    %73 = vector.broadcast %72 : vector<16x1xf32> to vector<16x32xf32>
    %74 = arith.mulf %69, %73 : vector<16x32xf32>
    %cst_43 = arith.constant 1.000000e+00 : f32
    %75 = vector.broadcast %cst_43 : f32 to vector<16x32xf32>
    %76 = arith.addf %75, %55 : vector<16x32xf32>
    %77 = arith.mulf %74, %76 : vector<16x32xf32>
    %78 = arith.addf %77, %56 : vector<16x32xf32>
    %c0_44 = arith.constant 0 : index
    %c0_45 = arith.constant 0 : index
    %c0_46 = arith.constant 0 : index
    %79 = vector.load %arg14[%c0_44, %c0_45, %c0_46] : memref<2x32x96xbf16, #tpu.memory_space<vmem>>, vector<1x32x96xbf16>
    %80 = vector.shape_cast %79 : vector<1x32x96xbf16> to vector<32x96xbf16>
    %81 = arith.truncf %78 : vector<16x32xf32> to vector<16x32xbf16>
    %cst_47 = arith.constant dense<0.000000e+00> : vector<16x96xf32>
    %82 = tpu.matmul %81, %80, %cst_47 {dimension_numbers = #tpu.dot_dimension_numbers<[1], [0], [0], [1], [0, 0, 1, 1], [], []>} : vector<16x32xbf16>, vector<32x96xbf16>, vector<16x96xf32> -> vector<16x96xf32>
    %83 = vector.extract_strided_slice %82 {offsets = [0, 0], sizes = [16, 32], strides = [1, 1]} : vector<16x96xf32> to vector<16x32xf32>
    %84 = vector.extract_strided_slice %82 {offsets = [0, 32], sizes = [16, 32], strides = [1, 1]} : vector<16x96xf32> to vector<16x32xf32>
    %85 = vector.extract_strided_slice %82 {offsets = [0, 64], sizes = [16, 32], strides = [1, 1]} : vector<16x96xf32> to vector<16x32xf32>
    %c0_48 = arith.constant 0 : index
    %c0_49 = arith.constant 0 : index
    %c0_50 = arith.constant 0 : index
    %86 = vector.load %arg15[%c0_48, %c0_49, %c0_50] : memref<2x32x32xbf16, #tpu.memory_space<vmem>>, vector<1x32x32xbf16>
    %87 = vector.shape_cast %86 : vector<1x32x32xbf16> to vector<32x32xbf16>
    %88 = vector.extract_strided_slice %49 {offsets = [0, 0, 0], sizes = [1, 1, 32], strides = [1, 1, 1]} : vector<2x1x32xf32> to vector<1x1x32xf32>
    %89 = vector.shape_cast %88 : vector<1x1x32xf32> to vector<1x32xf32>
    %90 = vector.broadcast %89 : vector<1x32xf32> to vector<16x32xf32>
    %91 = arith.mulf %83, %90 : vector<16x32xf32>
    %92 = arith.truncf %91 : vector<16x32xf32> to vector<16x32xbf16>
    %93 = arith.truncf %84 : vector<16x32xf32> to vector<16x32xbf16>
    %cst_51 = arith.constant dense<0.000000e+00> : vector<16x16xf32>
    %94 = tpu.matmul %92, %93, %cst_51 {dimension_numbers = #tpu.dot_dimension_numbers<[1], [1], [0], [0], [0, 0, 1, 0], [], []>} : vector<16x32xbf16>, vector<16x32xbf16>, vector<16x16xf32> -> vector<16x16xf32>
    %cst_52 = arith.constant 2.500000e-01 : f32
    %95 = vector.broadcast %cst_52 : f32 to vector<16x16xf32>
    %96 = arith.mulf %94, %95 : vector<16x16xf32>
    %97 = arith.addf %96, %50 : vector<16x16xf32>
    %cst_53 = arith.constant dense<0xFF800000> : vector<16xf32>
    %98 = vector.multi_reduction <maximumf>, %97, %cst_53 [1] : vector<16x16xf32> to vector<16xf32>
    %99 = vector.shape_cast %98 : vector<16xf32> to vector<16x1xf32>
    %100 = vector.broadcast %99 : vector<16x1xf32> to vector<16x16xf32>
    %101 = arith.subf %97, %100 : vector<16x16xf32>
    %102 = math.exp %101 : vector<16x16xf32>
    %cst_54 = arith.constant dense<0.000000e+00> : vector<16xf32>
    %103 = vector.multi_reduction <add>, %102, %cst_54 [1] : vector<16x16xf32> to vector<16xf32>
    %104 = vector.shape_cast %103 : vector<16xf32> to vector<16x1xf32>
    %105 = arith.truncf %102 : vector<16x16xf32> to vector<16x16xbf16>
    %106 = vector.broadcast %89 : vector<1x32xf32> to vector<16x32xf32>
    %107 = arith.mulf %85, %106 : vector<16x32xf32>
    %108 = arith.truncf %107 : vector<16x32xf32> to vector<16x32xbf16>
    %cst_55 = arith.constant dense<0.000000e+00> : vector<16x32xf32>
    %109 = tpu.matmul %105, %108, %cst_55 {dimension_numbers = #tpu.dot_dimension_numbers<[1], [0], [0], [1], [0, 0, 1, 1], [], []>} : vector<16x16xbf16>, vector<16x32xbf16>, vector<16x32xf32> -> vector<16x32xf32>
    %110 = tpu.reciprocal %104 {approx = true} : vector<16x1xf32> -> vector<16x1xf32>
    %111 = vector.broadcast %110 : vector<16x1xf32> to vector<16x32xf32>
    %112 = arith.mulf %109, %111 : vector<16x32xf32>
    %113 = vector.extract_strided_slice %49 {offsets = [1, 0, 0], sizes = [1, 1, 32], strides = [1, 1, 1]} : vector<2x1x32xf32> to vector<1x1x32xf32>
    %114 = vector.shape_cast %113 : vector<1x1x32xf32> to vector<1x32xf32>
    %115 = vector.broadcast %114 : vector<1x32xf32> to vector<16x32xf32>
    %116 = arith.mulf %83, %115 : vector<16x32xf32>
    %117 = arith.truncf %116 : vector<16x32xf32> to vector<16x32xbf16>
    %118 = arith.truncf %84 : vector<16x32xf32> to vector<16x32xbf16>
    %cst_56 = arith.constant dense<0.000000e+00> : vector<16x16xf32>
    %119 = tpu.matmul %117, %118, %cst_56 {dimension_numbers = #tpu.dot_dimension_numbers<[1], [1], [0], [0], [0, 0, 1, 0], [], []>} : vector<16x32xbf16>, vector<16x32xbf16>, vector<16x16xf32> -> vector<16x16xf32>
    %cst_57 = arith.constant 2.500000e-01 : f32
    %120 = vector.broadcast %cst_57 : f32 to vector<16x16xf32>
    %121 = arith.mulf %119, %120 : vector<16x16xf32>
    %122 = arith.addf %121, %50 : vector<16x16xf32>
    %cst_58 = arith.constant dense<0xFF800000> : vector<16xf32>
    %123 = vector.multi_reduction <maximumf>, %122, %cst_58 [1] : vector<16x16xf32> to vector<16xf32>
    %124 = vector.shape_cast %123 : vector<16xf32> to vector<16x1xf32>
    %125 = vector.broadcast %124 : vector<16x1xf32> to vector<16x16xf32>
    %126 = arith.subf %122, %125 : vector<16x16xf32>
    %127 = math.exp %126 : vector<16x16xf32>
    %cst_59 = arith.constant dense<0.000000e+00> : vector<16xf32>
    %128 = vector.multi_reduction <add>, %127, %cst_59 [1] : vector<16x16xf32> to vector<16xf32>
    %129 = vector.shape_cast %128 : vector<16xf32> to vector<16x1xf32>
    %130 = arith.truncf %127 : vector<16x16xf32> to vector<16x16xbf16>
    %131 = vector.broadcast %114 : vector<1x32xf32> to vector<16x32xf32>
    %132 = arith.mulf %85, %131 : vector<16x32xf32>
    %133 = arith.truncf %132 : vector<16x32xf32> to vector<16x32xbf16>
    %cst_60 = arith.constant dense<0.000000e+00> : vector<16x32xf32>
    %134 = tpu.matmul %130, %133, %cst_60 {dimension_numbers = #tpu.dot_dimension_numbers<[1], [0], [0], [1], [0, 0, 1, 1], [], []>} : vector<16x16xbf16>, vector<16x32xbf16>, vector<16x32xf32> -> vector<16x32xf32>
    %135 = tpu.reciprocal %129 {approx = true} : vector<16x1xf32> -> vector<16x1xf32>
    %136 = vector.broadcast %135 : vector<16x1xf32> to vector<16x32xf32>
    %137 = arith.mulf %134, %136 : vector<16x32xf32>
    %138 = arith.addf %112, %137 : vector<16x32xf32>
    %139 = arith.truncf %138 : vector<16x32xf32> to vector<16x32xbf16>
    %cst_61 = arith.constant dense<0.000000e+00> : vector<16x32xf32>
    %140 = tpu.matmul %139, %87, %cst_61 {dimension_numbers = #tpu.dot_dimension_numbers<[1], [0], [0], [1], [0, 0, 1, 1], [], []>} : vector<16x32xbf16>, vector<32x32xbf16>, vector<16x32xf32> -> vector<16x32xf32>
    %141 = arith.addf %54, %140 : vector<16x32xf32>
    %c0_62 = arith.constant 0 : index
    %c0_63 = arith.constant 0 : index
    %c0_64 = arith.constant 0 : index
    %142 = vector.load %arg16[%c0_62, %c0_63, %c0_64] : memref<2x1x32xf32, #tpu.memory_space<vmem>>, vector<1x1x32xf32>
    %143 = vector.shape_cast %142 : vector<1x1x32xf32> to vector<1x32xf32>
    %144 = vector.broadcast %143 : vector<1x32xf32> to vector<16x32xf32>
    %145 = arith.addf %141, %144 : vector<16x32xf32>
    %146 = vector.extract_strided_slice %43 {offsets = [0, 64], sizes = [16, 32], strides = [1, 1]} : vector<16x384xf32> to vector<16x32xf32>
    %147 = vector.extract_strided_slice %43 {offsets = [0, 96], sizes = [16, 32], strides = [1, 1]} : vector<16x384xf32> to vector<16x32xf32>
    %cst_65 = arith.constant dense<0.000000e+00> : vector<16xf32>
    %148 = vector.multi_reduction <add>, %145, %cst_65 [1] : vector<16x32xf32> to vector<16xf32>
    %149 = vector.shape_cast %148 : vector<16xf32> to vector<16x1xf32>
    %cst_66 = arith.constant 3.200000e+01 : f32
    %150 = vector.broadcast %cst_66 : f32 to vector<16x1xf32>
    %151 = arith.divf %149, %150 : vector<16x1xf32>
    %152 = vector.broadcast %151 : vector<16x1xf32> to vector<16x32xf32>
    %153 = arith.subf %145, %152 : vector<16x32xf32>
    %154 = arith.mulf %153, %153 : vector<16x32xf32>
    %cst_67 = arith.constant dense<0.000000e+00> : vector<16xf32>
    %155 = vector.multi_reduction <add>, %154, %cst_67 [1] : vector<16x32xf32> to vector<16xf32>
    %156 = vector.shape_cast %155 : vector<16xf32> to vector<16x1xf32>
    %cst_68 = arith.constant 3.200000e+01 : f32
    %157 = vector.broadcast %cst_68 : f32 to vector<16x1xf32>
    %158 = arith.divf %156, %157 : vector<16x1xf32>
    %159 = vector.broadcast %151 : vector<16x1xf32> to vector<16x32xf32>
    %160 = arith.subf %145, %159 : vector<16x32xf32>
    %cst_69 = arith.constant 9.99999974E-6 : f32
    %161 = vector.broadcast %cst_69 : f32 to vector<16x1xf32>
    %162 = arith.addf %158, %161 : vector<16x1xf32>
    %163 = math.rsqrt %162 : vector<16x1xf32>
    %164 = vector.broadcast %163 : vector<16x1xf32> to vector<16x32xf32>
    %165 = arith.mulf %160, %164 : vector<16x32xf32>
    %cst_70 = arith.constant 1.000000e+00 : f32
    %166 = vector.broadcast %cst_70 : f32 to vector<16x32xf32>
    %167 = arith.addf %166, %146 : vector<16x32xf32>
    %168 = arith.mulf %165, %167 : vector<16x32xf32>
    %169 = arith.addf %168, %147 : vector<16x32xf32>
    %c0_71 = arith.constant 0 : index
    %c0_72 = arith.constant 0 : index
    %c0_73 = arith.constant 0 : index
    %170 = vector.load %arg17[%c0_71, %c0_72, %c0_73] : memref<2x32x32xbf16, #tpu.memory_space<vmem>>, vector<1x32x32xbf16>
    %171 = vector.shape_cast %170 : vector<1x32x32xbf16> to vector<32x32xbf16>
    %172 = arith.truncf %169 : vector<16x32xf32> to vector<16x32xbf16>
    %cst_74 = arith.constant dense<0.000000e+00> : vector<16x32xf32>
    %173 = tpu.matmul %172, %171, %cst_74 {dimension_numbers = #tpu.dot_dimension_numbers<[1], [0], [0], [1], [0, 0, 1, 1], [], []>} : vector<16x32xbf16>, vector<32x32xbf16>, vector<16x32xf32> -> vector<16x32xf32>
    %174 = vector.extract_strided_slice %48 {offsets = [0, 0], sizes = [2, 32], strides = [1, 1]} : vector<2x128xf32> to vector<2x32xf32>
    %175 = vector.extract_strided_slice %48 {offsets = [0, 32], sizes = [2, 32], strides = [1, 1]} : vector<2x128xf32> to vector<2x32xf32>
    %c0_75 = arith.constant 0 : index
    %c0_76 = arith.constant 0 : index
    %c0_77 = arith.constant 0 : index
    %176 = vector.load %arg19[%c0_75, %c0_76, %c0_77] : memref<2x32x32xbf16, #tpu.memory_space<vmem>>, vector<1x32x32xbf16>
    %177 = vector.shape_cast %176 : vector<1x32x32xbf16> to vector<32x32xbf16>
    %178 = vector.extract_strided_slice %49 {offsets = [0, 0, 0], sizes = [1, 1, 32], strides = [1, 1, 1]} : vector<2x1x32xf32> to vector<1x1x32xf32>
    %179 = vector.shape_cast %178 : vector<1x1x32xf32> to vector<1x32xf32>
    %180 = vector.broadcast %179 : vector<1x32xf32> to vector<16x32xf32>
    %181 = arith.mulf %173, %180 : vector<16x32xf32>
    %182 = arith.truncf %181 : vector<16x32xf32> to vector<16x32xbf16>
    %183 = arith.truncf %174 : vector<2x32xf32> to vector<2x32xbf16>
    %cst_78 = arith.constant dense<0.000000e+00> : vector<16x2xf32>
    %184 = tpu.matmul %182, %183, %cst_78 {dimension_numbers = #tpu.dot_dimension_numbers<[1], [1], [0], [0], [0, 0, 1, 0], [], []>} : vector<16x32xbf16>, vector<2x32xbf16>, vector<16x2xf32> -> vector<16x2xf32>
    %cst_79 = arith.constant 2.500000e-01 : f32
    %185 = vector.broadcast %cst_79 : f32 to vector<16x2xf32>
    %186 = arith.mulf %184, %185 : vector<16x2xf32>
    %187 = arith.addf %186, %51 : vector<16x2xf32>
    %cst_80 = arith.constant dense<0xFF800000> : vector<16xf32>
    %188 = vector.multi_reduction <maximumf>, %187, %cst_80 [1] : vector<16x2xf32> to vector<16xf32>
    %189 = vector.shape_cast %188 : vector<16xf32> to vector<16x1xf32>
    %190 = vector.broadcast %189 : vector<16x1xf32> to vector<16x2xf32>
    %191 = arith.subf %187, %190 : vector<16x2xf32>
    %192 = math.exp %191 : vector<16x2xf32>
    %cst_81 = arith.constant dense<0.000000e+00> : vector<16xf32>
    %193 = vector.multi_reduction <add>, %192, %cst_81 [1] : vector<16x2xf32> to vector<16xf32>
    %194 = vector.shape_cast %193 : vector<16xf32> to vector<16x1xf32>
    %195 = arith.truncf %192 : vector<16x2xf32> to vector<16x2xbf16>
    %196 = vector.broadcast %179 : vector<1x32xf32> to vector<2x32xf32>
    %197 = arith.mulf %175, %196 : vector<2x32xf32>
    %198 = arith.truncf %197 : vector<2x32xf32> to vector<2x32xbf16>
    %cst_82 = arith.constant dense<0.000000e+00> : vector<16x32xf32>
    %199 = tpu.matmul %195, %198, %cst_82 {dimension_numbers = #tpu.dot_dimension_numbers<[1], [0], [0], [1], [0, 0, 1, 1], [], []>} : vector<16x2xbf16>, vector<2x32xbf16>, vector<16x32xf32> -> vector<16x32xf32>
    %200 = tpu.reciprocal %194 {approx = true} : vector<16x1xf32> -> vector<16x1xf32>
    %201 = vector.broadcast %200 : vector<16x1xf32> to vector<16x32xf32>
    %202 = arith.mulf %199, %201 : vector<16x32xf32>
    %203 = vector.extract_strided_slice %49 {offsets = [1, 0, 0], sizes = [1, 1, 32], strides = [1, 1, 1]} : vector<2x1x32xf32> to vector<1x1x32xf32>
    %204 = vector.shape_cast %203 : vector<1x1x32xf32> to vector<1x32xf32>
    %205 = vector.broadcast %204 : vector<1x32xf32> to vector<16x32xf32>
    %206 = arith.mulf %173, %205 : vector<16x32xf32>
    %207 = arith.truncf %206 : vector<16x32xf32> to vector<16x32xbf16>
    %208 = arith.truncf %174 : vector<2x32xf32> to vector<2x32xbf16>
    %cst_83 = arith.constant dense<0.000000e+00> : vector<16x2xf32>
    %209 = tpu.matmul %207, %208, %cst_83 {dimension_numbers = #tpu.dot_dimension_numbers<[1], [1], [0], [0], [0, 0, 1, 0], [], []>} : vector<16x32xbf16>, vector<2x32xbf16>, vector<16x2xf32> -> vector<16x2xf32>
    %cst_84 = arith.constant 2.500000e-01 : f32
    %210 = vector.broadcast %cst_84 : f32 to vector<16x2xf32>
    %211 = arith.mulf %209, %210 : vector<16x2xf32>
    %212 = arith.addf %211, %51 : vector<16x2xf32>
    %cst_85 = arith.constant dense<0xFF800000> : vector<16xf32>
    %213 = vector.multi_reduction <maximumf>, %212, %cst_85 [1] : vector<16x2xf32> to vector<16xf32>
    %214 = vector.shape_cast %213 : vector<16xf32> to vector<16x1xf32>
    %215 = vector.broadcast %214 : vector<16x1xf32> to vector<16x2xf32>
    %216 = arith.subf %212, %215 : vector<16x2xf32>
    %217 = math.exp %216 : vector<16x2xf32>
    %cst_86 = arith.constant dense<0.000000e+00> : vector<16xf32>
    %218 = vector.multi_reduction <add>, %217, %cst_86 [1] : vector<16x2xf32> to vector<16xf32>
    %219 = vector.shape_cast %218 : vector<16xf32> to vector<16x1xf32>
    %220 = arith.truncf %217 : vector<16x2xf32> to vector<16x2xbf16>
    %221 = vector.broadcast %204 : vector<1x32xf32> to vector<2x32xf32>
    %222 = arith.mulf %175, %221 : vector<2x32xf32>
    %223 = arith.truncf %222 : vector<2x32xf32> to vector<2x32xbf16>
    %cst_87 = arith.constant dense<0.000000e+00> : vector<16x32xf32>
    %224 = tpu.matmul %220, %223, %cst_87 {dimension_numbers = #tpu.dot_dimension_numbers<[1], [0], [0], [1], [0, 0, 1, 1], [], []>} : vector<16x2xbf16>, vector<2x32xbf16>, vector<16x32xf32> -> vector<16x32xf32>
    %225 = tpu.reciprocal %219 {approx = true} : vector<16x1xf32> -> vector<16x1xf32>
    %226 = vector.broadcast %225 : vector<16x1xf32> to vector<16x32xf32>
    %227 = arith.mulf %224, %226 : vector<16x32xf32>
    %228 = arith.addf %202, %227 : vector<16x32xf32>
    %229 = arith.truncf %228 : vector<16x32xf32> to vector<16x32xbf16>
    %cst_88 = arith.constant dense<0.000000e+00> : vector<16x32xf32>
    %230 = tpu.matmul %229, %177, %cst_88 {dimension_numbers = #tpu.dot_dimension_numbers<[1], [0], [0], [1], [0, 0, 1, 1], [], []>} : vector<16x32xbf16>, vector<32x32xbf16>, vector<16x32xf32> -> vector<16x32xf32>
    %231 = arith.addf %145, %230 : vector<16x32xf32>
    %c0_89 = arith.constant 0 : index
    %c0_90 = arith.constant 0 : index
    %c0_91 = arith.constant 0 : index
    %232 = vector.load %arg20[%c0_89, %c0_90, %c0_91] : memref<2x1x32xf32, #tpu.memory_space<vmem>>, vector<1x1x32xf32>
    %233 = vector.shape_cast %232 : vector<1x1x32xf32> to vector<1x32xf32>
    %234 = vector.broadcast %233 : vector<1x32xf32> to vector<16x32xf32>
    %235 = arith.addf %231, %234 : vector<16x32xf32>
    %236 = vector.extract_strided_slice %43 {offsets = [0, 128], sizes = [16, 32], strides = [1, 1]} : vector<16x384xf32> to vector<16x32xf32>
    %237 = vector.extract_strided_slice %43 {offsets = [0, 160], sizes = [16, 32], strides = [1, 1]} : vector<16x384xf32> to vector<16x32xf32>
    %cst_92 = arith.constant dense<0.000000e+00> : vector<16xf32>
    %238 = vector.multi_reduction <add>, %235, %cst_92 [1] : vector<16x32xf32> to vector<16xf32>
    %239 = vector.shape_cast %238 : vector<16xf32> to vector<16x1xf32>
    %cst_93 = arith.constant 3.200000e+01 : f32
    %240 = vector.broadcast %cst_93 : f32 to vector<16x1xf32>
    %241 = arith.divf %239, %240 : vector<16x1xf32>
    %242 = vector.broadcast %241 : vector<16x1xf32> to vector<16x32xf32>
    %243 = arith.subf %235, %242 : vector<16x32xf32>
    %244 = arith.mulf %243, %243 : vector<16x32xf32>
    %cst_94 = arith.constant dense<0.000000e+00> : vector<16xf32>
    %245 = vector.multi_reduction <add>, %244, %cst_94 [1] : vector<16x32xf32> to vector<16xf32>
    %246 = vector.shape_cast %245 : vector<16xf32> to vector<16x1xf32>
    %cst_95 = arith.constant 3.200000e+01 : f32
    %247 = vector.broadcast %cst_95 : f32 to vector<16x1xf32>
    %248 = arith.divf %246, %247 : vector<16x1xf32>
    %249 = vector.broadcast %241 : vector<16x1xf32> to vector<16x32xf32>
    %250 = arith.subf %235, %249 : vector<16x32xf32>
    %cst_96 = arith.constant 9.99999974E-6 : f32
    %251 = vector.broadcast %cst_96 : f32 to vector<16x1xf32>
    %252 = arith.addf %248, %251 : vector<16x1xf32>
    %253 = math.rsqrt %252 : vector<16x1xf32>
    %254 = vector.broadcast %253 : vector<16x1xf32> to vector<16x32xf32>
    %255 = arith.mulf %250, %254 : vector<16x32xf32>
    %cst_97 = arith.constant 1.000000e+00 : f32
    %256 = vector.broadcast %cst_97 : f32 to vector<16x32xf32>
    %257 = arith.addf %256, %236 : vector<16x32xf32>
    %258 = arith.mulf %255, %257 : vector<16x32xf32>
    %259 = arith.addf %258, %237 : vector<16x32xf32>
    %c0_98 = arith.constant 0 : index
    %c0_99 = arith.constant 0 : index
    %c0_100 = arith.constant 0 : index
    %260 = vector.load %arg21[%c0_98, %c0_99, %c0_100] : memref<2x32x256xbf16, #tpu.memory_space<vmem>>, vector<1x32x256xbf16>
    %261 = vector.shape_cast %260 : vector<1x32x256xbf16> to vector<32x256xbf16>
    %262 = arith.truncf %259 : vector<16x32xf32> to vector<16x32xbf16>
    %cst_101 = arith.constant dense<0.000000e+00> : vector<16x256xf32>
    %263 = tpu.matmul %262, %261, %cst_101 {dimension_numbers = #tpu.dot_dimension_numbers<[1], [0], [0], [1], [0, 0, 1, 1], [], []>} : vector<16x32xbf16>, vector<32x256xbf16>, vector<16x256xf32> -> vector<16x256xf32>
    %c0_102 = arith.constant 0 : index
    %c0_103 = arith.constant 0 : index
    %c0_104 = arith.constant 0 : index
    %264 = vector.load %arg22[%c0_102, %c0_103, %c0_104] : memref<2x1x256xf32, #tpu.memory_space<vmem>>, vector<1x1x256xf32>
    %265 = vector.shape_cast %264 : vector<1x1x256xf32> to vector<1x256xf32>
    %266 = vector.broadcast %265 : vector<1x256xf32> to vector<16x256xf32>
    %267 = arith.addf %263, %266 : vector<16x256xf32>
    %268 = vector.extract_strided_slice %267 {offsets = [0, 0], sizes = [16, 128], strides = [1, 1]} : vector<16x256xf32> to vector<16x128xf32>
    %269 = vector.extract_strided_slice %267 {offsets = [0, 128], sizes = [16, 128], strides = [1, 1]} : vector<16x256xf32> to vector<16x128xf32>
    %270 = arith.mulf %269, %269 : vector<16x128xf32>
    %271 = arith.mulf %269, %270 : vector<16x128xf32>
    %cst_105 = arith.constant 4.471500e-02 : f32
    %272 = vector.broadcast %cst_105 : f32 to vector<16x128xf32>
    %273 = arith.mulf %272, %271 : vector<16x128xf32>
    %274 = arith.addf %269, %273 : vector<16x128xf32>
    %cst_106 = arith.constant 0.797884583 : f32
    %275 = vector.broadcast %cst_106 : f32 to vector<16x128xf32>
    %276 = arith.mulf %275, %274 : vector<16x128xf32>
    %277 = math.tanh %276 : vector<16x128xf32>
    %cst_107 = arith.constant 1.000000e+00 : f32
    %278 = vector.broadcast %cst_107 : f32 to vector<16x128xf32>
    %279 = arith.addf %278, %277 : vector<16x128xf32>
    %cst_108 = arith.constant 5.000000e-01 : f32
    %280 = vector.broadcast %cst_108 : f32 to vector<16x128xf32>
    %281 = arith.mulf %280, %279 : vector<16x128xf32>
    %282 = arith.mulf %269, %281 : vector<16x128xf32>
    %283 = arith.mulf %268, %282 : vector<16x128xf32>
    %c0_109 = arith.constant 0 : index
    %c0_110 = arith.constant 0 : index
    %c0_111 = arith.constant 0 : index
    %284 = vector.load %arg23[%c0_109, %c0_110, %c0_111] : memref<2x128x32xbf16, #tpu.memory_space<vmem>>, vector<1x128x32xbf16>
    %285 = vector.shape_cast %284 : vector<1x128x32xbf16> to vector<128x32xbf16>
    %286 = arith.truncf %283 : vector<16x128xf32> to vector<16x128xbf16>
    %cst_112 = arith.constant dense<0.000000e+00> : vector<16x32xf32>
    %287 = tpu.matmul %286, %285, %cst_112 {dimension_numbers = #tpu.dot_dimension_numbers<[1], [0], [0], [1], [0, 0, 1, 1], [], []>} : vector<16x128xbf16>, vector<128x32xbf16>, vector<16x32xf32> -> vector<16x32xf32>
    %288 = arith.addf %235, %287 : vector<16x32xf32>
    %c0_113 = arith.constant 0 : index
    %c0_114 = arith.constant 0 : index
    %c0_115 = arith.constant 0 : index
    %289 = vector.load %arg24[%c0_113, %c0_114, %c0_115] : memref<2x1x32xf32, #tpu.memory_space<vmem>>, vector<1x1x32xf32>
    %290 = vector.shape_cast %289 : vector<1x1x32xf32> to vector<1x32xf32>
    %291 = vector.broadcast %290 : vector<1x32xf32> to vector<16x32xf32>
    %292 = arith.addf %288, %291 : vector<16x32xf32>
    %293 = vector.extract_strided_slice %43 {offsets = [0, 192], sizes = [16, 32], strides = [1, 1]} : vector<16x384xf32> to vector<16x32xf32>
    %294 = vector.extract_strided_slice %43 {offsets = [0, 224], sizes = [16, 32], strides = [1, 1]} : vector<16x384xf32> to vector<16x32xf32>
    %cst_116 = arith.constant dense<0.000000e+00> : vector<16xf32>
    %295 = vector.multi_reduction <add>, %292, %cst_116 [1] : vector<16x32xf32> to vector<16xf32>
    %296 = vector.shape_cast %295 : vector<16xf32> to vector<16x1xf32>
    %cst_117 = arith.constant 3.200000e+01 : f32
    %297 = vector.broadcast %cst_117 : f32 to vector<16x1xf32>
    %298 = arith.divf %296, %297 : vector<16x1xf32>
    %299 = vector.broadcast %298 : vector<16x1xf32> to vector<16x32xf32>
    %300 = arith.subf %292, %299 : vector<16x32xf32>
    %301 = arith.mulf %300, %300 : vector<16x32xf32>
    %cst_118 = arith.constant dense<0.000000e+00> : vector<16xf32>
    %302 = vector.multi_reduction <add>, %301, %cst_118 [1] : vector<16x32xf32> to vector<16xf32>
    %303 = vector.shape_cast %302 : vector<16xf32> to vector<16x1xf32>
    %cst_119 = arith.constant 3.200000e+01 : f32
    %304 = vector.broadcast %cst_119 : f32 to vector<16x1xf32>
    %305 = arith.divf %303, %304 : vector<16x1xf32>
    %306 = vector.broadcast %298 : vector<16x1xf32> to vector<16x32xf32>
    %307 = arith.subf %292, %306 : vector<16x32xf32>
    %cst_120 = arith.constant 9.99999974E-6 : f32
    %308 = vector.broadcast %cst_120 : f32 to vector<16x1xf32>
    %309 = arith.addf %305, %308 : vector<16x1xf32>
    %310 = math.rsqrt %309 : vector<16x1xf32>
    %311 = vector.broadcast %310 : vector<16x1xf32> to vector<16x32xf32>
    %312 = arith.mulf %307, %311 : vector<16x32xf32>
    %cst_121 = arith.constant 1.000000e+00 : f32
    %313 = vector.broadcast %cst_121 : f32 to vector<16x32xf32>
    %314 = arith.addf %313, %293 : vector<16x32xf32>
    %315 = arith.mulf %312, %314 : vector<16x32xf32>
    %316 = arith.addf %315, %294 : vector<16x32xf32>
    %c1 = arith.constant 1 : index
    %c0_122 = arith.constant 0 : index
    %c0_123 = arith.constant 0 : index
    %317 = vector.load %arg14[%c1, %c0_122, %c0_123] : memref<2x32x96xbf16, #tpu.memory_space<vmem>>, vector<1x32x96xbf16>
    %318 = vector.shape_cast %317 : vector<1x32x96xbf16> to vector<32x96xbf16>
    %319 = arith.truncf %316 : vector<16x32xf32> to vector<16x32xbf16>
    %cst_124 = arith.constant dense<0.000000e+00> : vector<16x96xf32>
    %320 = tpu.matmul %319, %318, %cst_124 {dimension_numbers = #tpu.dot_dimension_numbers<[1], [0], [0], [1], [0, 0, 1, 1], [], []>} : vector<16x32xbf16>, vector<32x96xbf16>, vector<16x96xf32> -> vector<16x96xf32>
    %321 = vector.extract_strided_slice %320 {offsets = [0, 0], sizes = [16, 32], strides = [1, 1]} : vector<16x96xf32> to vector<16x32xf32>
    %322 = vector.extract_strided_slice %320 {offsets = [0, 32], sizes = [16, 32], strides = [1, 1]} : vector<16x96xf32> to vector<16x32xf32>
    %323 = vector.extract_strided_slice %320 {offsets = [0, 64], sizes = [16, 32], strides = [1, 1]} : vector<16x96xf32> to vector<16x32xf32>
    %c1_125 = arith.constant 1 : index
    %c0_126 = arith.constant 0 : index
    %c0_127 = arith.constant 0 : index
    %324 = vector.load %arg15[%c1_125, %c0_126, %c0_127] : memref<2x32x32xbf16, #tpu.memory_space<vmem>>, vector<1x32x32xbf16>
    %325 = vector.shape_cast %324 : vector<1x32x32xbf16> to vector<32x32xbf16>
    %326 = vector.extract_strided_slice %49 {offsets = [0, 0, 0], sizes = [1, 1, 32], strides = [1, 1, 1]} : vector<2x1x32xf32> to vector<1x1x32xf32>
    %327 = vector.shape_cast %326 : vector<1x1x32xf32> to vector<1x32xf32>
    %328 = vector.broadcast %327 : vector<1x32xf32> to vector<16x32xf32>
    %329 = arith.mulf %321, %328 : vector<16x32xf32>
    %330 = arith.truncf %329 : vector<16x32xf32> to vector<16x32xbf16>
    %331 = arith.truncf %322 : vector<16x32xf32> to vector<16x32xbf16>
    %cst_128 = arith.constant dense<0.000000e+00> : vector<16x16xf32>
    %332 = tpu.matmul %330, %331, %cst_128 {dimension_numbers = #tpu.dot_dimension_numbers<[1], [1], [0], [0], [0, 0, 1, 0], [], []>} : vector<16x32xbf16>, vector<16x32xbf16>, vector<16x16xf32> -> vector<16x16xf32>
    %cst_129 = arith.constant 2.500000e-01 : f32
    %333 = vector.broadcast %cst_129 : f32 to vector<16x16xf32>
    %334 = arith.mulf %332, %333 : vector<16x16xf32>
    %335 = arith.addf %334, %50 : vector<16x16xf32>
    %cst_130 = arith.constant dense<0xFF800000> : vector<16xf32>
    %336 = vector.multi_reduction <maximumf>, %335, %cst_130 [1] : vector<16x16xf32> to vector<16xf32>
    %337 = vector.shape_cast %336 : vector<16xf32> to vector<16x1xf32>
    %338 = vector.broadcast %337 : vector<16x1xf32> to vector<16x16xf32>
    %339 = arith.subf %335, %338 : vector<16x16xf32>
    %340 = math.exp %339 : vector<16x16xf32>
    %cst_131 = arith.constant dense<0.000000e+00> : vector<16xf32>
    %341 = vector.multi_reduction <add>, %340, %cst_131 [1] : vector<16x16xf32> to vector<16xf32>
    %342 = vector.shape_cast %341 : vector<16xf32> to vector<16x1xf32>
    %343 = arith.truncf %340 : vector<16x16xf32> to vector<16x16xbf16>
    %344 = vector.broadcast %327 : vector<1x32xf32> to vector<16x32xf32>
    %345 = arith.mulf %323, %344 : vector<16x32xf32>
    %346 = arith.truncf %345 : vector<16x32xf32> to vector<16x32xbf16>
    %cst_132 = arith.constant dense<0.000000e+00> : vector<16x32xf32>
    %347 = tpu.matmul %343, %346, %cst_132 {dimension_numbers = #tpu.dot_dimension_numbers<[1], [0], [0], [1], [0, 0, 1, 1], [], []>} : vector<16x16xbf16>, vector<16x32xbf16>, vector<16x32xf32> -> vector<16x32xf32>
    %348 = tpu.reciprocal %342 {approx = true} : vector<16x1xf32> -> vector<16x1xf32>
    %349 = vector.broadcast %348 : vector<16x1xf32> to vector<16x32xf32>
    %350 = arith.mulf %347, %349 : vector<16x32xf32>
    %351 = vector.extract_strided_slice %49 {offsets = [1, 0, 0], sizes = [1, 1, 32], strides = [1, 1, 1]} : vector<2x1x32xf32> to vector<1x1x32xf32>
    %352 = vector.shape_cast %351 : vector<1x1x32xf32> to vector<1x32xf32>
    %353 = vector.broadcast %352 : vector<1x32xf32> to vector<16x32xf32>
    %354 = arith.mulf %321, %353 : vector<16x32xf32>
    %355 = arith.truncf %354 : vector<16x32xf32> to vector<16x32xbf16>
    %356 = arith.truncf %322 : vector<16x32xf32> to vector<16x32xbf16>
    %cst_133 = arith.constant dense<0.000000e+00> : vector<16x16xf32>
    %357 = tpu.matmul %355, %356, %cst_133 {dimension_numbers = #tpu.dot_dimension_numbers<[1], [1], [0], [0], [0, 0, 1, 0], [], []>} : vector<16x32xbf16>, vector<16x32xbf16>, vector<16x16xf32> -> vector<16x16xf32>
    %cst_134 = arith.constant 2.500000e-01 : f32
    %358 = vector.broadcast %cst_134 : f32 to vector<16x16xf32>
    %359 = arith.mulf %357, %358 : vector<16x16xf32>
    %360 = arith.addf %359, %50 : vector<16x16xf32>
    %cst_135 = arith.constant dense<0xFF800000> : vector<16xf32>
    %361 = vector.multi_reduction <maximumf>, %360, %cst_135 [1] : vector<16x16xf32> to vector<16xf32>
    %362 = vector.shape_cast %361 : vector<16xf32> to vector<16x1xf32>
    %363 = vector.broadcast %362 : vector<16x1xf32> to vector<16x16xf32>
    %364 = arith.subf %360, %363 : vector<16x16xf32>
    %365 = math.exp %364 : vector<16x16xf32>
    %cst_136 = arith.constant dense<0.000000e+00> : vector<16xf32>
    %366 = vector.multi_reduction <add>, %365, %cst_136 [1] : vector<16x16xf32> to vector<16xf32>
    %367 = vector.shape_cast %366 : vector<16xf32> to vector<16x1xf32>
    %368 = arith.truncf %365 : vector<16x16xf32> to vector<16x16xbf16>
    %369 = vector.broadcast %352 : vector<1x32xf32> to vector<16x32xf32>
    %370 = arith.mulf %323, %369 : vector<16x32xf32>
    %371 = arith.truncf %370 : vector<16x32xf32> to vector<16x32xbf16>
    %cst_137 = arith.constant dense<0.000000e+00> : vector<16x32xf32>
    %372 = tpu.matmul %368, %371, %cst_137 {dimension_numbers = #tpu.dot_dimension_numbers<[1], [0], [0], [1], [0, 0, 1, 1], [], []>} : vector<16x16xbf16>, vector<16x32xbf16>, vector<16x32xf32> -> vector<16x32xf32>
    %373 = tpu.reciprocal %367 {approx = true} : vector<16x1xf32> -> vector<16x1xf32>
    %374 = vector.broadcast %373 : vector<16x1xf32> to vector<16x32xf32>
    %375 = arith.mulf %372, %374 : vector<16x32xf32>
    %376 = arith.addf %350, %375 : vector<16x32xf32>
    %377 = arith.truncf %376 : vector<16x32xf32> to vector<16x32xbf16>
    %cst_138 = arith.constant dense<0.000000e+00> : vector<16x32xf32>
    %378 = tpu.matmul %377, %325, %cst_138 {dimension_numbers = #tpu.dot_dimension_numbers<[1], [0], [0], [1], [0, 0, 1, 1], [], []>} : vector<16x32xbf16>, vector<32x32xbf16>, vector<16x32xf32> -> vector<16x32xf32>
    %379 = arith.addf %292, %378 : vector<16x32xf32>
    %c1_139 = arith.constant 1 : index
    %c0_140 = arith.constant 0 : index
    %c0_141 = arith.constant 0 : index
    %380 = vector.load %arg16[%c1_139, %c0_140, %c0_141] : memref<2x1x32xf32, #tpu.memory_space<vmem>>, vector<1x1x32xf32>
    %381 = vector.shape_cast %380 : vector<1x1x32xf32> to vector<1x32xf32>
    %382 = vector.broadcast %381 : vector<1x32xf32> to vector<16x32xf32>
    %383 = arith.addf %379, %382 : vector<16x32xf32>
    %384 = vector.extract_strided_slice %43 {offsets = [0, 256], sizes = [16, 32], strides = [1, 1]} : vector<16x384xf32> to vector<16x32xf32>
    %385 = vector.extract_strided_slice %43 {offsets = [0, 288], sizes = [16, 32], strides = [1, 1]} : vector<16x384xf32> to vector<16x32xf32>
    %cst_142 = arith.constant dense<0.000000e+00> : vector<16xf32>
    %386 = vector.multi_reduction <add>, %383, %cst_142 [1] : vector<16x32xf32> to vector<16xf32>
    %387 = vector.shape_cast %386 : vector<16xf32> to vector<16x1xf32>
    %cst_143 = arith.constant 3.200000e+01 : f32
    %388 = vector.broadcast %cst_143 : f32 to vector<16x1xf32>
    %389 = arith.divf %387, %388 : vector<16x1xf32>
    %390 = vector.broadcast %389 : vector<16x1xf32> to vector<16x32xf32>
    %391 = arith.subf %383, %390 : vector<16x32xf32>
    %392 = arith.mulf %391, %391 : vector<16x32xf32>
    %cst_144 = arith.constant dense<0.000000e+00> : vector<16xf32>
    %393 = vector.multi_reduction <add>, %392, %cst_144 [1] : vector<16x32xf32> to vector<16xf32>
    %394 = vector.shape_cast %393 : vector<16xf32> to vector<16x1xf32>
    %cst_145 = arith.constant 3.200000e+01 : f32
    %395 = vector.broadcast %cst_145 : f32 to vector<16x1xf32>
    %396 = arith.divf %394, %395 : vector<16x1xf32>
    %397 = vector.broadcast %389 : vector<16x1xf32> to vector<16x32xf32>
    %398 = arith.subf %383, %397 : vector<16x32xf32>
    %cst_146 = arith.constant 9.99999974E-6 : f32
    %399 = vector.broadcast %cst_146 : f32 to vector<16x1xf32>
    %400 = arith.addf %396, %399 : vector<16x1xf32>
    %401 = math.rsqrt %400 : vector<16x1xf32>
    %402 = vector.broadcast %401 : vector<16x1xf32> to vector<16x32xf32>
    %403 = arith.mulf %398, %402 : vector<16x32xf32>
    %cst_147 = arith.constant 1.000000e+00 : f32
    %404 = vector.broadcast %cst_147 : f32 to vector<16x32xf32>
    %405 = arith.addf %404, %384 : vector<16x32xf32>
    %406 = arith.mulf %403, %405 : vector<16x32xf32>
    %407 = arith.addf %406, %385 : vector<16x32xf32>
    %c1_148 = arith.constant 1 : index
    %c0_149 = arith.constant 0 : index
    %c0_150 = arith.constant 0 : index
    %408 = vector.load %arg17[%c1_148, %c0_149, %c0_150] : memref<2x32x32xbf16, #tpu.memory_space<vmem>>, vector<1x32x32xbf16>
    %409 = vector.shape_cast %408 : vector<1x32x32xbf16> to vector<32x32xbf16>
    %410 = arith.truncf %407 : vector<16x32xf32> to vector<16x32xbf16>
    %cst_151 = arith.constant dense<0.000000e+00> : vector<16x32xf32>
    %411 = tpu.matmul %410, %409, %cst_151 {dimension_numbers = #tpu.dot_dimension_numbers<[1], [0], [0], [1], [0, 0, 1, 1], [], []>} : vector<16x32xbf16>, vector<32x32xbf16>, vector<16x32xf32> -> vector<16x32xf32>
    %412 = vector.extract_strided_slice %48 {offsets = [0, 64], sizes = [2, 32], strides = [1, 1]} : vector<2x128xf32> to vector<2x32xf32>
    %413 = vector.extract_strided_slice %48 {offsets = [0, 96], sizes = [2, 32], strides = [1, 1]} : vector<2x128xf32> to vector<2x32xf32>
    %c1_152 = arith.constant 1 : index
    %c0_153 = arith.constant 0 : index
    %c0_154 = arith.constant 0 : index
    %414 = vector.load %arg19[%c1_152, %c0_153, %c0_154] : memref<2x32x32xbf16, #tpu.memory_space<vmem>>, vector<1x32x32xbf16>
    %415 = vector.shape_cast %414 : vector<1x32x32xbf16> to vector<32x32xbf16>
    %416 = vector.extract_strided_slice %49 {offsets = [0, 0, 0], sizes = [1, 1, 32], strides = [1, 1, 1]} : vector<2x1x32xf32> to vector<1x1x32xf32>
    %417 = vector.shape_cast %416 : vector<1x1x32xf32> to vector<1x32xf32>
    %418 = vector.broadcast %417 : vector<1x32xf32> to vector<16x32xf32>
    %419 = arith.mulf %411, %418 : vector<16x32xf32>
    %420 = arith.truncf %419 : vector<16x32xf32> to vector<16x32xbf16>
    %421 = arith.truncf %412 : vector<2x32xf32> to vector<2x32xbf16>
    %cst_155 = arith.constant dense<0.000000e+00> : vector<16x2xf32>
    %422 = tpu.matmul %420, %421, %cst_155 {dimension_numbers = #tpu.dot_dimension_numbers<[1], [1], [0], [0], [0, 0, 1, 0], [], []>} : vector<16x32xbf16>, vector<2x32xbf16>, vector<16x2xf32> -> vector<16x2xf32>
    %cst_156 = arith.constant 2.500000e-01 : f32
    %423 = vector.broadcast %cst_156 : f32 to vector<16x2xf32>
    %424 = arith.mulf %422, %423 : vector<16x2xf32>
    %425 = arith.addf %424, %51 : vector<16x2xf32>
    %cst_157 = arith.constant dense<0xFF800000> : vector<16xf32>
    %426 = vector.multi_reduction <maximumf>, %425, %cst_157 [1] : vector<16x2xf32> to vector<16xf32>
    %427 = vector.shape_cast %426 : vector<16xf32> to vector<16x1xf32>
    %428 = vector.broadcast %427 : vector<16x1xf32> to vector<16x2xf32>
    %429 = arith.subf %425, %428 : vector<16x2xf32>
    %430 = math.exp %429 : vector<16x2xf32>
    %cst_158 = arith.constant dense<0.000000e+00> : vector<16xf32>
    %431 = vector.multi_reduction <add>, %430, %cst_158 [1] : vector<16x2xf32> to vector<16xf32>
    %432 = vector.shape_cast %431 : vector<16xf32> to vector<16x1xf32>
    %433 = arith.truncf %430 : vector<16x2xf32> to vector<16x2xbf16>
    %434 = vector.broadcast %417 : vector<1x32xf32> to vector<2x32xf32>
    %435 = arith.mulf %413, %434 : vector<2x32xf32>
    %436 = arith.truncf %435 : vector<2x32xf32> to vector<2x32xbf16>
    %cst_159 = arith.constant dense<0.000000e+00> : vector<16x32xf32>
    %437 = tpu.matmul %433, %436, %cst_159 {dimension_numbers = #tpu.dot_dimension_numbers<[1], [0], [0], [1], [0, 0, 1, 1], [], []>} : vector<16x2xbf16>, vector<2x32xbf16>, vector<16x32xf32> -> vector<16x32xf32>
    %438 = tpu.reciprocal %432 {approx = true} : vector<16x1xf32> -> vector<16x1xf32>
    %439 = vector.broadcast %438 : vector<16x1xf32> to vector<16x32xf32>
    %440 = arith.mulf %437, %439 : vector<16x32xf32>
    %441 = vector.extract_strided_slice %49 {offsets = [1, 0, 0], sizes = [1, 1, 32], strides = [1, 1, 1]} : vector<2x1x32xf32> to vector<1x1x32xf32>
    %442 = vector.shape_cast %441 : vector<1x1x32xf32> to vector<1x32xf32>
    %443 = vector.broadcast %442 : vector<1x32xf32> to vector<16x32xf32>
    %444 = arith.mulf %411, %443 : vector<16x32xf32>
    %445 = arith.truncf %444 : vector<16x32xf32> to vector<16x32xbf16>
    %446 = arith.truncf %412 : vector<2x32xf32> to vector<2x32xbf16>
    %cst_160 = arith.constant dense<0.000000e+00> : vector<16x2xf32>
    %447 = tpu.matmul %445, %446, %cst_160 {dimension_numbers = #tpu.dot_dimension_numbers<[1], [1], [0], [0], [0, 0, 1, 0], [], []>} : vector<16x32xbf16>, vector<2x32xbf16>, vector<16x2xf32> -> vector<16x2xf32>
    %cst_161 = arith.constant 2.500000e-01 : f32
    %448 = vector.broadcast %cst_161 : f32 to vector<16x2xf32>
    %449 = arith.mulf %447, %448 : vector<16x2xf32>
    %450 = arith.addf %449, %51 : vector<16x2xf32>
    %cst_162 = arith.constant dense<0xFF800000> : vector<16xf32>
    %451 = vector.multi_reduction <maximumf>, %450, %cst_162 [1] : vector<16x2xf32> to vector<16xf32>
    %452 = vector.shape_cast %451 : vector<16xf32> to vector<16x1xf32>
    %453 = vector.broadcast %452 : vector<16x1xf32> to vector<16x2xf32>
    %454 = arith.subf %450, %453 : vector<16x2xf32>
    %455 = math.exp %454 : vector<16x2xf32>
    %cst_163 = arith.constant dense<0.000000e+00> : vector<16xf32>
    %456 = vector.multi_reduction <add>, %455, %cst_163 [1] : vector<16x2xf32> to vector<16xf32>
    %457 = vector.shape_cast %456 : vector<16xf32> to vector<16x1xf32>
    %458 = arith.truncf %455 : vector<16x2xf32> to vector<16x2xbf16>
    %459 = vector.broadcast %442 : vector<1x32xf32> to vector<2x32xf32>
    %460 = arith.mulf %413, %459 : vector<2x32xf32>
    %461 = arith.truncf %460 : vector<2x32xf32> to vector<2x32xbf16>
    %cst_164 = arith.constant dense<0.000000e+00> : vector<16x32xf32>
    %462 = tpu.matmul %458, %461, %cst_164 {dimension_numbers = #tpu.dot_dimension_numbers<[1], [0], [0], [1], [0, 0, 1, 1], [], []>} : vector<16x2xbf16>, vector<2x32xbf16>, vector<16x32xf32> -> vector<16x32xf32>
    %463 = tpu.reciprocal %457 {approx = true} : vector<16x1xf32> -> vector<16x1xf32>
    %464 = vector.broadcast %463 : vector<16x1xf32> to vector<16x32xf32>
    %465 = arith.mulf %462, %464 : vector<16x32xf32>
    %466 = arith.addf %440, %465 : vector<16x32xf32>
    %467 = arith.truncf %466 : vector<16x32xf32> to vector<16x32xbf16>
    %cst_165 = arith.constant dense<0.000000e+00> : vector<16x32xf32>
    %468 = tpu.matmul %467, %415, %cst_165 {dimension_numbers = #tpu.dot_dimension_numbers<[1], [0], [0], [1], [0, 0, 1, 1], [], []>} : vector<16x32xbf16>, vector<32x32xbf16>, vector<16x32xf32> -> vector<16x32xf32>
    %469 = arith.addf %383, %468 : vector<16x32xf32>
    %c1_166 = arith.constant 1 : index
    %c0_167 = arith.constant 0 : index
    %c0_168 = arith.constant 0 : index
    %470 = vector.load %arg20[%c1_166, %c0_167, %c0_168] : memref<2x1x32xf32, #tpu.memory_space<vmem>>, vector<1x1x32xf32>
    %471 = vector.shape_cast %470 : vector<1x1x32xf32> to vector<1x32xf32>
    %472 = vector.broadcast %471 : vector<1x32xf32> to vector<16x32xf32>
    %473 = arith.addf %469, %472 : vector<16x32xf32>
    %474 = vector.extract_strided_slice %43 {offsets = [0, 320], sizes = [16, 32], strides = [1, 1]} : vector<16x384xf32> to vector<16x32xf32>
    %475 = vector.extract_strided_slice %43 {offsets = [0, 352], sizes = [16, 32], strides = [1, 1]} : vector<16x384xf32> to vector<16x32xf32>
    %cst_169 = arith.constant dense<0.000000e+00> : vector<16xf32>
    %476 = vector.multi_reduction <add>, %473, %cst_169 [1] : vector<16x32xf32> to vector<16xf32>
    %477 = vector.shape_cast %476 : vector<16xf32> to vector<16x1xf32>
    %cst_170 = arith.constant 3.200000e+01 : f32
    %478 = vector.broadcast %cst_170 : f32 to vector<16x1xf32>
    %479 = arith.divf %477, %478 : vector<16x1xf32>
    %480 = vector.broadcast %479 : vector<16x1xf32> to vector<16x32xf32>
    %481 = arith.subf %473, %480 : vector<16x32xf32>
    %482 = arith.mulf %481, %481 : vector<16x32xf32>
    %cst_171 = arith.constant dense<0.000000e+00> : vector<16xf32>
    %483 = vector.multi_reduction <add>, %482, %cst_171 [1] : vector<16x32xf32> to vector<16xf32>
    %484 = vector.shape_cast %483 : vector<16xf32> to vector<16x1xf32>
    %cst_172 = arith.constant 3.200000e+01 : f32
    %485 = vector.broadcast %cst_172 : f32 to vector<16x1xf32>
    %486 = arith.divf %484, %485 : vector<16x1xf32>
    %487 = vector.broadcast %479 : vector<16x1xf32> to vector<16x32xf32>
    %488 = arith.subf %473, %487 : vector<16x32xf32>
    %cst_173 = arith.constant 9.99999974E-6 : f32
    %489 = vector.broadcast %cst_173 : f32 to vector<16x1xf32>
    %490 = arith.addf %486, %489 : vector<16x1xf32>
    %491 = math.rsqrt %490 : vector<16x1xf32>
    %492 = vector.broadcast %491 : vector<16x1xf32> to vector<16x32xf32>
    %493 = arith.mulf %488, %492 : vector<16x32xf32>
    %cst_174 = arith.constant 1.000000e+00 : f32
    %494 = vector.broadcast %cst_174 : f32 to vector<16x32xf32>
    %495 = arith.addf %494, %474 : vector<16x32xf32>
    %496 = arith.mulf %493, %495 : vector<16x32xf32>
    %497 = arith.addf %496, %475 : vector<16x32xf32>
    %c1_175 = arith.constant 1 : index
    %c0_176 = arith.constant 0 : index
    %c0_177 = arith.constant 0 : index
    %498 = vector.load %arg21[%c1_175, %c0_176, %c0_177] : memref<2x32x256xbf16, #tpu.memory_space<vmem>>, vector<1x32x256xbf16>
    %499 = vector.shape_cast %498 : vector<1x32x256xbf16> to vector<32x256xbf16>
    %500 = arith.truncf %497 : vector<16x32xf32> to vector<16x32xbf16>
    %cst_178 = arith.constant dense<0.000000e+00> : vector<16x256xf32>
    %501 = tpu.matmul %500, %499, %cst_178 {dimension_numbers = #tpu.dot_dimension_numbers<[1], [0], [0], [1], [0, 0, 1, 1], [], []>} : vector<16x32xbf16>, vector<32x256xbf16>, vector<16x256xf32> -> vector<16x256xf32>
    %c1_179 = arith.constant 1 : index
    %c0_180 = arith.constant 0 : index
    %c0_181 = arith.constant 0 : index
    %502 = vector.load %arg22[%c1_179, %c0_180, %c0_181] : memref<2x1x256xf32, #tpu.memory_space<vmem>>, vector<1x1x256xf32>
    %503 = vector.shape_cast %502 : vector<1x1x256xf32> to vector<1x256xf32>
    %504 = vector.broadcast %503 : vector<1x256xf32> to vector<16x256xf32>
    %505 = arith.addf %501, %504 : vector<16x256xf32>
    %506 = vector.extract_strided_slice %505 {offsets = [0, 0], sizes = [16, 128], strides = [1, 1]} : vector<16x256xf32> to vector<16x128xf32>
    %507 = vector.extract_strided_slice %505 {offsets = [0, 128], sizes = [16, 128], strides = [1, 1]} : vector<16x256xf32> to vector<16x128xf32>
    %508 = arith.mulf %507, %507 : vector<16x128xf32>
    %509 = arith.mulf %507, %508 : vector<16x128xf32>
    %cst_182 = arith.constant 4.471500e-02 : f32
    %510 = vector.broadcast %cst_182 : f32 to vector<16x128xf32>
    %511 = arith.mulf %510, %509 : vector<16x128xf32>
    %512 = arith.addf %507, %511 : vector<16x128xf32>
    %cst_183 = arith.constant 0.797884583 : f32
    %513 = vector.broadcast %cst_183 : f32 to vector<16x128xf32>
    %514 = arith.mulf %513, %512 : vector<16x128xf32>
    %515 = math.tanh %514 : vector<16x128xf32>
    %cst_184 = arith.constant 1.000000e+00 : f32
    %516 = vector.broadcast %cst_184 : f32 to vector<16x128xf32>
    %517 = arith.addf %516, %515 : vector<16x128xf32>
    %cst_185 = arith.constant 5.000000e-01 : f32
    %518 = vector.broadcast %cst_185 : f32 to vector<16x128xf32>
    %519 = arith.mulf %518, %517 : vector<16x128xf32>
    %520 = arith.mulf %507, %519 : vector<16x128xf32>
    %521 = arith.mulf %506, %520 : vector<16x128xf32>
    %c1_186 = arith.constant 1 : index
    %c0_187 = arith.constant 0 : index
    %c0_188 = arith.constant 0 : index
    %522 = vector.load %arg23[%c1_186, %c0_187, %c0_188] : memref<2x128x32xbf16, #tpu.memory_space<vmem>>, vector<1x128x32xbf16>
    %523 = vector.shape_cast %522 : vector<1x128x32xbf16> to vector<128x32xbf16>
    %524 = arith.truncf %521 : vector<16x128xf32> to vector<16x128xbf16>
    %cst_189 = arith.constant dense<0.000000e+00> : vector<16x32xf32>
    %525 = tpu.matmul %524, %523, %cst_189 {dimension_numbers = #tpu.dot_dimension_numbers<[1], [0], [0], [1], [0, 0, 1, 1], [], []>} : vector<16x128xbf16>, vector<128x32xbf16>, vector<16x32xf32> -> vector<16x32xf32>
    %526 = arith.addf %473, %525 : vector<16x32xf32>
    %c1_190 = arith.constant 1 : index
    %c0_191 = arith.constant 0 : index
    %c0_192 = arith.constant 0 : index
    %527 = vector.load %arg24[%c1_190, %c0_191, %c0_192] : memref<2x1x32xf32, #tpu.memory_space<vmem>>, vector<1x1x32xf32>
    %528 = vector.shape_cast %527 : vector<1x1x32xf32> to vector<1x32xf32>
    %529 = vector.broadcast %528 : vector<1x32xf32> to vector<16x32xf32>
    %530 = arith.addf %526, %529 : vector<16x32xf32>
    %cst_193 = arith.constant dense<0.000000e+00> : vector<16xf32>
    %531 = vector.multi_reduction <add>, %530, %cst_193 [1] : vector<16x32xf32> to vector<16xf32>
    %532 = vector.shape_cast %531 : vector<16xf32> to vector<16x1xf32>
    %cst_194 = arith.constant 3.200000e+01 : f32
    %533 = vector.broadcast %cst_194 : f32 to vector<16x1xf32>
    %534 = arith.divf %532, %533 : vector<16x1xf32>
    %535 = vector.broadcast %534 : vector<16x1xf32> to vector<16x32xf32>
    %536 = arith.subf %530, %535 : vector<16x32xf32>
    %537 = arith.mulf %536, %536 : vector<16x32xf32>
    %cst_195 = arith.constant dense<0.000000e+00> : vector<16xf32>
    %538 = vector.multi_reduction <add>, %537, %cst_195 [1] : vector<16x32xf32> to vector<16xf32>
    %539 = vector.shape_cast %538 : vector<16xf32> to vector<16x1xf32>
    %cst_196 = arith.constant 3.200000e+01 : f32
    %540 = vector.broadcast %cst_196 : f32 to vector<16x1xf32>
    %541 = arith.divf %539, %540 : vector<16x1xf32>
    %542 = vector.broadcast %534 : vector<16x1xf32> to vector<16x32xf32>
    %543 = arith.subf %530, %542 : vector<16x32xf32>
    %cst_197 = arith.constant 9.99999974E-6 : f32
    %544 = vector.broadcast %cst_197 : f32 to vector<16x1xf32>
    %545 = arith.addf %541, %544 : vector<16x1xf32>
    %546 = math.rsqrt %545 : vector<16x1xf32>
    %547 = vector.broadcast %546 : vector<16x1xf32> to vector<16x32xf32>
    %548 = arith.mulf %543, %547 : vector<16x32xf32>
    %c0_198 = arith.constant 0 : index
    %c0_199 = arith.constant 0 : index
    %549 = vector.load %arg25[%c0_198, %c0_199] : memref<1x32xf32, #tpu.memory_space<vmem>>, vector<1x32xf32>
    %550 = vector.broadcast %549 : vector<1x32xf32> to vector<16x32xf32>
    %551 = arith.mulf %548, %550 : vector<16x32xf32>
    %c0_200 = arith.constant 0 : index
    %c0_201 = arith.constant 0 : index
    %552 = vector.load %arg26[%c0_200, %c0_201] : memref<1x32xf32, #tpu.memory_space<vmem>>, vector<1x32xf32>
    %553 = vector.broadcast %552 : vector<1x32xf32> to vector<16x32xf32>
    %554 = arith.addf %551, %553 : vector<16x32xf32>
    %c0_202 = arith.constant 0 : index
    %c0_203 = arith.constant 0 : index
    %555 = vector.load %arg27[%c0_202, %c0_203] : memref<32x4xbf16, #tpu.memory_space<vmem>>, vector<32x4xbf16>
    %556 = arith.truncf %554 : vector<16x32xf32> to vector<16x32xbf16>
    %cst_204 = arith.constant dense<0.000000e+00> : vector<16x4xf32>
    %557 = tpu.matmul %556, %555, %cst_204 {dimension_numbers = #tpu.dot_dimension_numbers<[1], [0], [0], [1], [0, 0, 1, 1], [], []>} : vector<16x32xbf16>, vector<32x4xbf16>, vector<16x4xf32> -> vector<16x4xf32>
    %558 = vector.broadcast %2 : vector<16x1xf32> to vector<16x4xf32>
    %559 = arith.mulf %558, %4 : vector<16x4xf32>
    %560 = vector.broadcast %3 : vector<16x1xf32> to vector<16x4xf32>
    %561 = arith.mulf %560, %557 : vector<16x4xf32>
    %562 = arith.addf %559, %561 : vector<16x4xf32>
    %c0_205 = arith.constant 0 : index
    %c0_206 = arith.constant 0 : index
    %563 = vector.load %arg29[%c0_205, %c0_206] : memref<16x4xf32, #tpu.memory_space<vmem>>, vector<16x4xf32>
    tpu.vector_store %arg29[%c0_205, %c0_206], %562 {strides = array<i32>} : memref<16x4xf32, #tpu.memory_space<vmem>>, vector<16x4xf32>,
    return
  }
  func.func @transform_0(%arg0: i32) -> (i32, i32) {
    %c0_i32 = arith.constant 0 : i32
    %c0_i32_0 = arith.constant 0 : i32
    return %arg0, %c0_i32 : i32, i32
  }
  func.func @transform_1(%arg0: i32) -> (i32, i32) {
    %c0_i32 = arith.constant 0 : i32
    %c0_i32_0 = arith.constant 0 : i32
    return %arg0, %c0_i32 : i32, i32
  }
  func.func @transform_2(%arg0: i32) -> (i32, i32) {
    %c0_i32 = arith.constant 0 : i32
    %c0_i32_0 = arith.constant 0 : i32
    return %arg0, %c0_i32 : i32, i32
  }
  func.func @transform_3(%arg0: i32) -> (i32, i32, i32) {
    %c0_i32 = arith.constant 0 : i32
    %c0_i32_0 = arith.constant 0 : i32
    %c0_i32_1 = arith.constant 0 : i32
    return %arg0, %c0_i32, %c0_i32_0 : i32, i32, i32
  }
  func.func @transform_4(%arg0: i32) -> (i32, i32) {
    %c0_i32 = arith.constant 0 : i32
    %c0_i32_0 = arith.constant 0 : i32
    %c0_i32_1 = arith.constant 0 : i32
    return %c0_i32, %c0_i32_0 : i32, i32
  }
  func.func @transform_5(%arg0: i32) -> (i32, i32) {
    %c0_i32 = arith.constant 0 : i32
    %c0_i32_0 = arith.constant 0 : i32
    %c0_i32_1 = arith.constant 0 : i32
    return %c0_i32, %c0_i32_0 : i32, i32
  }
  func.func @transform_6(%arg0: i32) -> (i32, i32) {
    %c0_i32 = arith.constant 0 : i32
    %c0_i32_0 = arith.constant 0 : i32
    %c0_i32_1 = arith.constant 0 : i32
    return %c0_i32, %c0_i32_0 : i32, i32
  }
  func.func @transform_7(%arg0: i32) -> (i32, i32) {
    %c0_i32 = arith.constant 0 : i32
    %c0_i32_0 = arith.constant 0 : i32
    %c0_i32_1 = arith.constant 0 : i32
    return %c0_i32, %c0_i32_0 : i32, i32
  }
  func.func @transform_8(%arg0: i32) -> (i32, i32) {
    %c0_i32 = arith.constant 0 : i32
    %c0_i32_0 = arith.constant 0 : i32
    %c0_i32_1 = arith.constant 0 : i32
    return %c0_i32, %c0_i32_0 : i32, i32
  }
  func.func @transform_9(%arg0: i32) -> (i32, i32) {
    %c0_i32 = arith.constant 0 : i32
    %c0_i32_0 = arith.constant 0 : i32
    %c0_i32_1 = arith.constant 0 : i32
    return %c0_i32, %c0_i32_0 : i32, i32
  }
  func.func @transform_10(%arg0: i32) -> (i32, i32) {
    %c0_i32 = arith.constant 0 : i32
    %c0_i32_0 = arith.constant 0 : i32
    %c0_i32_1 = arith.constant 0 : i32
    return %c0_i32, %c0_i32_0 : i32, i32
  }
  func.func @transform_11(%arg0: i32) -> (i32, i32) {
    %c0_i32 = arith.constant 0 : i32
    %c0_i32_0 = arith.constant 0 : i32
    %c0_i32_1 = arith.constant 0 : i32
    return %c0_i32, %c0_i32_0 : i32, i32
  }
  func.func @transform_12(%arg0: i32) -> (i32, i32) {
    %c0_i32 = arith.constant 0 : i32
    %c0_i32_0 = arith.constant 0 : i32
    %c0_i32_1 = arith.constant 0 : i32
    return %c0_i32, %c0_i32_0 : i32, i32
  }
  func.func @transform_13(%arg0: i32) -> (i32, i32, i32) {
    %c0_i32 = arith.constant 0 : i32
    %c0_i32_0 = arith.constant 0 : i32
    %c0_i32_1 = arith.constant 0 : i32
    %c0_i32_2 = arith.constant 0 : i32
    return %c0_i32, %c0_i32_0, %c0_i32_1 : i32, i32, i32
  }
  func.func @transform_14(%arg0: i32) -> (i32, i32, i32) {
    %c0_i32 = arith.constant 0 : i32
    %c0_i32_0 = arith.constant 0 : i32
    %c0_i32_1 = arith.constant 0 : i32
    %c0_i32_2 = arith.constant 0 : i32
    return %c0_i32, %c0_i32_0, %c0_i32_1 : i32, i32, i32
  }
  func.func @transform_15(%arg0: i32) -> (i32, i32, i32) {
    %c0_i32 = arith.constant 0 : i32
    %c0_i32_0 = arith.constant 0 : i32
    %c0_i32_1 = arith.constant 0 : i32
    %c0_i32_2 = arith.constant 0 : i32
    return %c0_i32, %c0_i32_0, %c0_i32_1 : i32, i32, i32
  }
  func.func @transform_16(%arg0: i32) -> (i32, i32, i32) {
    %c0_i32 = arith.constant 0 : i32
    %c0_i32_0 = arith.constant 0 : i32
    %c0_i32_1 = arith.constant 0 : i32
    %c0_i32_2 = arith.constant 0 : i32
    return %c0_i32, %c0_i32_0, %c0_i32_1 : i32, i32, i32
  }
  func.func @transform_17(%arg0: i32) -> (i32, i32) {
    %c0_i32 = arith.constant 0 : i32
    %c0_i32_0 = arith.constant 0 : i32
    %c0_i32_1 = arith.constant 0 : i32
    return %c0_i32, %c0_i32_0 : i32, i32
  }
  func.func @transform_18(%arg0: i32) -> (i32, i32, i32) {
    %c0_i32 = arith.constant 0 : i32
    %c0_i32_0 = arith.constant 0 : i32
    %c0_i32_1 = arith.constant 0 : i32
    %c0_i32_2 = arith.constant 0 : i32
    return %c0_i32, %c0_i32_0, %c0_i32_1 : i32, i32, i32
  }
  func.func @transform_19(%arg0: i32) -> (i32, i32, i32) {
    %c0_i32 = arith.constant 0 : i32
    %c0_i32_0 = arith.constant 0 : i32
    %c0_i32_1 = arith.constant 0 : i32
    %c0_i32_2 = arith.constant 0 : i32
    return %c0_i32, %c0_i32_0, %c0_i32_1 : i32, i32, i32
  }
  func.func @transform_20(%arg0: i32) -> (i32, i32, i32) {
    %c0_i32 = arith.constant 0 : i32
    %c0_i32_0 = arith.constant 0 : i32
    %c0_i32_1 = arith.constant 0 : i32
    %c0_i32_2 = arith.constant 0 : i32
    return %c0_i32, %c0_i32_0, %c0_i32_1 : i32, i32, i32
  }
  func.func @transform_21(%arg0: i32) -> (i32, i32, i32) {
    %c0_i32 = arith.constant 0 : i32
    %c0_i32_0 = arith.constant 0 : i32
    %c0_i32_1 = arith.constant 0 : i32
    %c0_i32_2 = arith.constant 0 : i32
    return %c0_i32, %c0_i32_0, %c0_i32_1 : i32, i32, i32
  }
  func.func @transform_22(%arg0: i32) -> (i32, i32, i32) {
    %c0_i32 = arith.constant 0 : i32
    %c0_i32_0 = arith.constant 0 : i32
    %c0_i32_1 = arith.constant 0 : i32
    %c0_i32_2 = arith.constant 0 : i32
    return %c0_i32, %c0_i32_0, %c0_i32_1 : i32, i32, i32
  }
  func.func @transform_23(%arg0: i32) -> (i32, i32, i32) {
    %c0_i32 = arith.constant 0 : i32
    %c0_i32_0 = arith.constant 0 : i32
    %c0_i32_1 = arith.constant 0 : i32
    %c0_i32_2 = arith.constant 0 : i32
    return %c0_i32, %c0_i32_0, %c0_i32_1 : i32, i32, i32
  }
  func.func @transform_24(%arg0: i32) -> (i32, i32) {
    %c0_i32 = arith.constant 0 : i32
    %c0_i32_0 = arith.constant 0 : i32
    %c0_i32_1 = arith.constant 0 : i32
    return %c0_i32, %c0_i32_0 : i32, i32
  }
  func.func @transform_25(%arg0: i32) -> (i32, i32) {
    %c0_i32 = arith.constant 0 : i32
    %c0_i32_0 = arith.constant 0 : i32
    %c0_i32_1 = arith.constant 0 : i32
    return %c0_i32, %c0_i32_0 : i32, i32
  }
  func.func @transform_26(%arg0: i32) -> (i32, i32) {
    %c0_i32 = arith.constant 0 : i32
    %c0_i32_0 = arith.constant 0 : i32
    %c0_i32_1 = arith.constant 0 : i32
    return %c0_i32, %c0_i32_0 : i32, i32
  }
  func.func @transform_27(%arg0: i32) -> (i32, i32, i32) {
    %c0_i32 = arith.constant 0 : i32
    %c0_i32_0 = arith.constant 0 : i32
    %c0_i32_1 = arith.constant 0 : i32
    %c0_i32_2 = arith.constant 0 : i32
    return %c0_i32, %c0_i32_0, %c0_i32_1 : i32, i32, i32
  }
  func.func @transform_28(%arg0: i32) -> (i32, i32) {
    %c0_i32 = arith.constant 0 : i32
    %c0_i32_0 = arith.constant 0 : i32
    return %arg0, %c0_i32 : i32, i32
  }
}

</mosaic_0001>

<bundles_post_ra>
// kernel: forward_condition.1
= control target key start
LH: loop header
LB: loop body
LE: loop exit
PB: predicated region body
PF: predicated region fallthrough
CT: control target
= control target key end

     0   :  { %s4544_s0 = inlined_call_operand.vmem [shape: f32[32,4], index: 0, kind: input, shape index: {}]   ;;  %s4545_s1 = inlined_call_operand.vmem [shape: f32[32,4], index: 1, kind: input, shape index: {}]   ;;  %s4546_s2 = inlined_call_operand.vmem [shape: f32[32,32], index: 2, kind: input, shape index: {}]   ;;  %s4547_s3 = inlined_call_operand.vmem [shape: f32[4,1,32], index: 3, kind: input, shape index: {}]   ;;  %s4548_s4 = inlined_call_operand.vmem [shape: f32[16,16], index: 4, kind: input, shape index: {}]   ;;  %s4549_s5 = inlined_call_operand.vmem [shape: f32[16,2], index: 5, kind: input, shape index: {}]   ;;  %s4550_s6 = inlined_call_operand.vmem [shape: bf16[32,32], index: 6, kind: input, shape index: {}]   ;;  %s4551_s7 = inlined_call_operand.vmem [shape: f32[1,32], index: 7, kind: input, shape index: {}]   ;;  %s4552_s8 = inlined_call_operand.vmem [shape: bf16[32,32], index: 8, kind: input, shape index: {}]   ;;  %s4553_s9 = inlined_call_operand.vmem [shape: f32[1,32], index: 9, kind: input, shape index: {}]   ;;  %s4554_s10 = inlined_call_operand.vmem [shape: bf16[4,32], index: 10, kind: input, shape index: {}]   ;;  %s4555_s11 = inlined_call_operand.vmem [shape: bf16[32,384], index: 11, kind: input, shape index: {}]   ;;  %s4556_s12 = inlined_call_operand.vmem [shape: f32[1,384], index: 12, kind: input, shape index: {}]   ;;  %s4557_s13 = inlined_call_operand.vmem [shape: bf16[2,32,96], index: 13, kind: input, shape index: {}]   ;;  %s4558_s14 = inlined_call_operand.vmem [shape: bf16[2,32,32], index: 14, kind: input, shape index: {}]   ;;  %s4559_s15 = inlined_call_operand.vmem [shape: f32[2,1,32], index: 15, kind: input, shape index: {}]   ;;  %s4560_s16 = inlined_call_operand.vmem [shape: bf16[2,32,32], index: 16, kind: input, shape index: {}]   ;;  %s4561_s17 = inlined_call_operand.vmem [shape: bf16[32,128], index: 17, kind: input, shape index: {}]   ;;  %s4562_s18 = inlined_call_operand.vmem [shape: bf16[2,32,32], index: 18, kind: input, shape index: {}]   ;;  %s4563_s19 = inlined_call_operand.vmem [shape: f32[2,1,32], index: 19, kind: input, shape index: {}]   ;;  %s4564_s20 = inlined_call_operand.vmem [shape: bf16[2,32,256], index: 20, kind: input, shape index: {}]   ;;  %s4565_s21 = inlined_call_operand.vmem [shape: f32[2,1,256], index: 21, kind: input, shape index: {}]   ;;  %s4566_s22 = inlined_call_operand.vmem [shape: bf16[2,128,32], index: 22, kind: input, shape index: {}]   ;;  %s4567_s23 = inlined_call_operand.vmem [shape: f32[2,1,32], index: 23, kind: input, shape index: {}]   ;;  %s4568_s24 = inlined_call_operand.vmem [shape: f32[1,32], index: 24, kind: input, shape index: {}]   ;;  %s4569_s25 = inlined_call_operand.vmem [shape: f32[1,32], index: 25, kind: input, shape index: {}]   ;;  %s4570_s26 = inlined_call_operand.vmem [shape: bf16[32,4], index: 26, kind: input, shape index: {}]   ;;  %s4571_s27 = inlined_call_operand.vmem [shape: f32[2,1,32], index: 27, kind: input, shape index: {}]   ;;  %s4572_s28 = inlined_call_operand.vmem [shape: f32[32,4], index: 28, kind: output, shape index: {}]  }
   0x1   :  { %4590 = sst [smem:[#allocation3_spill]] %s4544_s0 }
   0x2   :  { %4591 = sst [smem:[#allocation4_spill]] %s4545_s1 }
   0x3   :  { %4592 = sst [smem:[#allocation5_spill]] %s4546_s2 }
   0x4   :  { %4593 = sst [smem:[#allocation6_spill]] %s4547_s3 }
   0x5   :  { %4594 = sst [smem:[#allocation7_spill]] %s4548_s4 }
   0x6   :  { %4595 = sst [smem:[#allocation8_spill]] %s4549_s5 }
   0x7   :  { %4596 = sst [smem:[#allocation9_spill]] %s4550_s6 }
   0x8   :  { %4597 = sst [smem:[#allocation10_spill]] %s4551_s7 }
   0x9   :  { %4598 = sst [smem:[#allocation11_spill]] %s4552_s8  ;;  %s3845_s8 = smov 0  }
   0xa   :  { %4599 = sst [smem:[#allocation12_spill]] %s4553_s9 }
   0xb   :  { %4600 = sst [smem:[#allocation13_spill]] %s4554_s10 }
   0xc   :  { %4601 = sst [smem:[#allocation14_spill]] %s4555_s11 }
   0xd   :  { %4602 = sst [smem:[#allocation15_spill]] %s4556_s12 }
   0xe   :  { %4603 = sst [smem:[#allocation16_spill]] %s4561_s17 }
   0xf LB: > { %4604 = sst [smem:[#allocation2_spill]] %s3691_s8  ;;  %s3149_s5 = sadd.s32 4294967295, %s3691_s8   ;;  %s3691_s8 = sphi %s3845_s8, %s38_s8  }
  0x10   : > { %p3153_p0 = scmp.ge.s32.totalorder %s3691_s8, 1  ;;  %p795_p1 = scmp.lt.s32.totalorder %s3691_s8, 3 }
  0x12   : > { %p796_p2 = pnand %p3153_p0, %p795_p1 }
  0x13   : > { %s4605_s3 = sld [smem:[#allocation9_spill]] (!%p796_p2)  ;;  %s3154_s6 = sshll.u32 (!%p796_p2), %s3149_s5, 1 }
  0x14   : > { %799 = sbr.rel (%p796_p2) target bundleno = 6284 (0x188c), region = 132  ;;  %p884_p3 = scmp.lt.s32.totalorder (!%p796_p2), %s3154_s6, 3 }
  0x15   : > { %s4606_s7 = sld [smem:[#allocation5_spill]] (!%p796_p2)  ;;  %s4581_s2 = smov (!%p796_p2), 96  }
  0x16   : > { %s4607_s5 = sld [smem:[#allocation10_spill]] (!%p796_p2)  ;;  %s4585_s8 = smov (!%p796_p2), 32  }
  0x17   : > { %s4608_s10 = sld [smem:[#allocation11_spill]] (!%p796_p2) }
  0x18   : > { %s4610_s9 = sld [smem:[#allocation12_spill]] (!%p796_p2) }
  0x19   : > { %v3464_v0 = vld [vmem:[%s4605_s3 + $0x8] sm:$0xff]  ;;  %v3463_v1 = vld [vmem:[%s4605_s3] sm:$0xff]  ;;  %s4626_s6 = smov (!%p884_p3, %s3154_s6), 3  ;;  %vm952_vm0 = vcmask 261120   ;;  %v3693_v17 = vmov 0   ;;  %s4611_s29 = sld [smem:[#allocation14_spill]] }
  0x1a   : > { %962 = vmatpush.bf16.msra.mxu0 %v3464_v0  ;;  %s3862_s11 = sshll.u32 %s4626_s6, 3  ;;  %3532 = vset.pattern.permute.xlu0 %v3693_v17  ;;  %s4587_s3 = smov 64  }
  0x1b   : > { %s899_s12 = scalar_lea.vmem %s4606_s7, %s3862_s11  ;;  %s4619_s17 = sld [smem:[#allocation16_spill]] }
  0x1c   : > { %v929_v2 = vld [vmem:[%s899_s12] sm:$0xff]  ;;  %v930_v3 = vld [vmem:[%s899_s12 + $0x8] sm:$0xff]  ;;  %s4609_s12 = sld [smem:[#allocation3_spill]]  ;;  %s4621_s7 = smov 96  }
  0x1d   : > { %v935_v4 = vpack.c.bf16 %v930_v3, %v929_v2  ;;  %v3538_v5 = vld [vmem:[%s4607_s5] ss:$0 sm:$0xff]  ;;  %v3466_v8 = vld [vmem:[%s4608_s10 + $0x8] sm:$0xff]  ;;  %s4618_s5 = sld [smem:[#allocation6_spill]] }
  0x1e   : > { %963 = vmatpush.bf16.msra.mxu0 %v3463_v1  ;;  %1040 = vmatpush.bf16.msra.mxu3 %v3466_v8  ;;  %v3465_v10 = vld [vmem:[%s4608_s10] sm:$0xff]  ;;  %s4616_s10 = sld [smem:[#allocation15_spill]] }
  0x1f   : > { %v3539_v44 = vld [vmem:[%s4610_s9] ss:$0 sm:$0xff]  ;;  %s4615_s9 = sld [smem:[#allocation4_spill]] }
  0x20   : > { %s4620_s4 = sld [smem:[#allocation8_spill]] }
  0x21   : > { %3171 = vmatmul.msk.bf16.vlgmr.msra.gmra.mxu0 %vm952_vm0, %v935_v4 }
  0x22   : > { %1041 = vmatpush.bf16.msra.mxu3 %v3465_v10  ;;  %s3882_s1 = scalar_lea.vmem %s4609_s12, %s3862_s11  ;;  %v3203_v10 = vld [vmem:[%s4611_s29 + $0x24] sm:$0xf0]  ;;  %s4614_s12 = sld [smem:[#allocation13_spill]] }
  0x23   : > { %v913_v15 = vld [vmem:[%s3882_s1] sm:$0xff]  ;;  %v914_v18 = vld [vmem:[%s3882_s1 + $0x8] sm:$0xff]  ;;  %s904_s0 = scalar_lea.vmem %s4618_s5, %s4626_s6  ;;  %s4622_s6 = smov 64  }
  0x24   : > { %919 = vperm.xlu0 %3532, %v913_v15   ;;  %s910_s5 = scalar_lea.vmem %s4572_s28, %s3862_s11 }
  0x25   : > { %s3946_s30 = scalar_lea.vmem %s4615_s9, %s3862_s11  ;;  %s4617_s9 = sld [smem:[#allocation7_spill]] }
  0x2c   : > { %924 = vperm.xlu0 %3532, %v914_v18  }
  0x9e   : > { %v965_v6 = vpop.f32.mrf.mxu0 }
  0x9f   : > { %v966_v7 = vadd.f32 %v3538_v5, %v965_v6  ;;  %v3201_v6 = vld [vmem:[%s4611_s29 + $0x18] sm:$0xf] }
  0xa1   : > { %v3172_v9 = vmul.f32 -1.442695, %v966_v7 }
  0xa3   : > { %3550 = vpow2.f32 %v3172_v9  ;;  %v3470_v9 = vld [vmem:[%s4611_s29 + $0x1c] sm:$0xf] }
  0xa4   : > { %v3206_v15 = vor.u32 %v3470_v9, %v3203_v10 }
  0xa6   : > { %v967_v11 = vpop.f32.mrf.mxu0  ;;  %1200 = vmatpush.bf16.msrb.mxu3 %v3206_v15 }
  0xa7   : > { %v968_v12 = vadd.f32 %v3538_v5, %v967_v11  ;;  %v3209_v11 = vld [vmem:[%s4611_s29 + $0x20] sm:$0xf] }
  0xa9   : > { %v3551_v13 = vpop.eup %3550  ;;  %v3173_v14 = vmul.f32 -1.442695, %v968_v12 }
  0xaa   : > { %v976_v16 = vadd.f32 1.0, %v3551_v13 }
  0xab   : > { %3552 = vpow2.f32 %v3173_v14 }
  0xac   : > { %3554 = vrcp.f32 %v976_v16  ;;  %v989_v28 = vand.u32 2147483648, %v976_v16  ;;  %vm983_vm2 = vweird.f32 %v976_v16  ;;  %v987_v29 = vand.u32 2147483647, %v976_v16 }
  0xae   : > { %v990_v35 = vor.u32 1.1754944e-38, %v989_v28  ;;  %vm988_vm5 = vcmp.eq.f32.partialorder %v987_v29, 8.507059e+37 }
  0xb1   : > { %v3553_v19 = vpop.eup %3552 }
  0xb2   : > { %v3555_v20 = vpop.eup %3554  ;;  %v977_v21 = vadd.f32 1.0, %v3553_v19 }
  0xb3   : > { %v979_v22 = vmul.f32 %v3555_v20, %v976_v16  ;;  %vm984_vm1 = vweird.f32 %v3555_v20  ;;  %v3472_v16 = vld [vmem:[%s4611_s29 + $0x28] sm:$0xf0] }
  0xb4   : > { %3556 = vrcp.f32 %v977_v21  ;;  %vm985_vm3 = vmor %vm983_vm2, %vm984_vm1  ;;  %v1004_v31 = vand.u32 2147483648, %v977_v21  ;;  %v1002_v34 = vand.u32 2147483647, %v977_v21  ;;  %vm998_vm6 = vweird.f32 %v977_v21 }
  0xb5   : > { %v980_v23 = vsub.f32 1.0, %v979_v22  ;;  %v3210_v19 = vor.u32 %v3472_v16, %v3209_v11  ;;  %v3468_v22 = vld [vmem:[%s4611_s29 + $0x8] sm:$0xf0]  ;;  %vm1278_vm2 = vcmask 1041408   ;;  %v3695_v16 = vmov 32.0  }
  0xb6   : > { %v1005_v38 = vor.u32 1.1754944e-38, %v1004_v31  ;;  %vm1003_vm8 = vcmp.eq.f32.partialorder %v1002_v34, 8.507059e+37 }
  0xb7   : > { %v981_v24 = vmul.f32 %v3555_v20, %v980_v23  ;;  %v3467_v23 = vld [vmem:[%s4611_s29 + $0x4] sm:$0xf]  ;;  %1214 = vmatpush.bf16.msrb.mxu0 %v3210_v19 }
  0xb9   : > { %v982_v26 = vadd.f32 %v3555_v20, %v981_v24 }
  0xba   : > { %v3557_v25 = vpop.eup %3556 }
  0xbb   : > { %v994_v27 = vmul.f32 %v3557_v25, %v977_v21  ;;  %v986_v32 = vsel %vm985_vm3, %v3555_v20, %v982_v26  ;;  %vm999_vm4 = vweird.f32 %v3557_v25  ;;  %v3189_v21 = vld [vmem:[%s4611_s29] sm:$0xf]  ;;  %v3197_v26 = vld [vmem:[%s4611_s29 + $0x8] sm:$0xf] }
  0xbc   : > { %v991_v37 = vsel %vm988_vm5, %v990_v35, %v986_v32  ;;  %vm1000_vm7 = vmor %vm998_vm6, %vm999_vm4  ;;  %v3190_v24 = vor.u32 %v3468_v22, %v3189_v21 }
  0xbd   : > { %v995_v30 = vsub.f32 1.0, %v994_v27  ;;  %v1008_v41 = vmul.f32 %v991_v37, %v966_v7  ;;  %v3471_v7 = vld [vmem:[%s4611_s29 + $0x20] sm:$0xf0]  ;;  %v3469_v27 = vld [vmem:[%s4611_s29 + $0x10] sm:$0xf0] }
  0xbe   : > { %v3202_v8 = vor.u32 %v3471_v7, %v3201_v6  ;;  %v3954_v6 = vld [vmem:[%s4616_s10] sm:$0x7] }
  0xbf   : > { %v996_v33 = vmul.f32 %v3557_v25, %v995_v30  ;;  %v3198_v30 = vor.u32 %v3469_v27, %v3197_v26  ;;  %v1139_v7 = vperm.slane %v3954_v6, 0 }
  0xc0   : > { %1186 = vmatpush.bf16.msra.mxu2 %v3202_v8 }
  0xc1   : > { %v997_v36 = vadd.f32 %v3557_v25, %v996_v33  ;;  %1215 = vmatpush.bf16.msrb.mxu0 %v3198_v30 }
  0xc3   : > { %v1001_v39 = vsel %vm1000_vm7, %v3557_v25, %v997_v36  ;;  %v3191_v25 = vld [vmem:[%s4611_s29 + $0xc] sm:$0xf0]  ;;  %v1272_v36 = vld [vmem:[%s4614_s12] sm:$0x3] }
  0xc4   : > { %v1006_v40 = vsel %vm1003_vm8, %v1005_v38, %v1001_v39  ;;  %v3194_v29 = vor.u32 %v3467_v23, %v3191_v25  ;;  %1187 = vmatpush.bf16.msra.mxu2 %v3190_v24  ;;  %v1280_v37 = vsel %vm1278_vm2, %v1272_v36, 0 }
  0xc5   : > { %v1009_v42 = vmul.f32 %v1006_v40, %v968_v12 }
  0xc6   : > { %1201 = vmatpush.bf16.msrb.mxu3 %v3194_v29 }
  0xc7   : > { %v1014_v43 = vpack.c.bf16 %v1009_v42, %v1008_v41 }
  0xc8   : > { %1289 = vmatpush.bf16.msrb.mxu2 %v1280_v37  ;;  %v3475_v37 = vld [vmem:[%s4557_s13] sm:$0xff] }
  0xc9   : > { %3182 = vmatmul.msk.bf16.vlgmr.msra.gmra.mxu3 %vm952_vm0, %v1014_v43 }
 0x14c   : > { %v1043_v45 = vpop.f32.mrf.mxu3 }
 0x14d   : > { %v1044_v46 = vadd.f32 %v3539_v44, %v1043_v45 }
 0x14f   : > { %v3183_v47 = vmul.f32 -1.442695, %v1044_v46 }
 0x151   : > { %3558 = vpow2.f32 %v3183_v47 }
 0x154   : > { %v1045_v48 = vpop.f32.mrf.mxu3 }
 0x155   : > { %v1046_v49 = vadd.f32 %v3539_v44, %v1045_v48 }
 0x157   : > { %v3559_v50 = vpop.eup %3558  ;;  %v3184_v51 = vmul.f32 -1.442695, %v1046_v49 }
 0x158   : > { %v1054_v52 = vadd.f32 1.0, %v3559_v50 }
 0x159   : > { %3560 = vpow2.f32 %v3184_v51 }
 0x15a   : > { %3562 = vrcp.f32 %v1054_v52  ;;  %v1067_v58 = vand.u32 2147483648, %v1054_v52  ;;  %v1065_v60 = vand.u32 2147483647, %v1054_v52  ;;  %vm1061_vm10 = vweird.f32 %v1054_v52 }
 0x15c   : > { %v1068_v63 = vor.u32 1.1754944e-38, %v1067_v58  ;;  %vm1066_vm12 = vcmp.eq.f32.partialorder %v1065_v60, 8.507059e+37 }
 0x15f   : > { %v3561_v53 = vpop.eup %3560 }
 0x160   : > { %v3563_v54 = vpop.eup %3562  ;;  %v1055_v55 = vadd.f32 1.0, %v3561_v53 }
 0x161   : > { %v1057_v56 = vmul.f32 %v3563_v54, %v1054_v52  ;;  %vm1062_vm9 = vweird.f32 %v3563_v54 }
 0x162   : > { %3564 = vrcp.f32 %v1055_v55  ;;  %vm1063_vm11 = vmor %vm1061_vm10, %vm1062_vm9  ;;  %v1082_v3 = vand.u32 2147483648, %v1055_v55  ;;  %vm1076_vm14 = vweird.f32 %v1055_v55  ;;  %v1080_v14 = vand.u32 2147483647, %v1055_v55 }
 0x163   : > { %v1058_v57 = vsub.f32 1.0, %v1057_v56 }
 0x164   : > { %v1083_v18 = vor.u32 1.1754944e-38, %v1082_v3  ;;  %vm1081_vm1 = vcmp.eq.f32.partialorder %v1080_v14, 8.507059e+37 }
 0x165   : > { %v1059_v59 = vmul.f32 %v3563_v54, %v1058_v57 }
 0x167   : > { %v1060_v61 = vadd.f32 %v3563_v54, %v1059_v59 }
 0x168   : > { %v3565_v62 = vpop.eup %3564 }
 0x169   : > { %v1064_v0 = vsel %vm1063_vm11, %v3563_v54, %v1060_v61  ;;  %v1072_v1 = vmul.f32 %v3565_v62, %v1055_v55  ;;  %vm1077_vm13 = vweird.f32 %v3565_v62  ;;  %vm1274_vm11 = vcmask 31744  }
 0x16a   : > { %v1069_v2 = vsel %vm1066_vm12, %v1068_v63, %v1064_v0  ;;  %vm3911_vm15 = vmor %vm1076_vm14, %vm1077_vm13  ;;  %v915_v0 = vld [vmem:[%s3946_s30] sm:$0xff] }
 0x16b   : > { %v3890_v4 = vmul.f32 %v1069_v2, %v1044_v46  ;;  %v1073_v5 = vsub.f32 1.0, %v1072_v1  ;;  %v916_v1 = vld [vmem:[%s3946_s30 + $0x8] sm:$0xff] }
 0x16d   : > { %v3185_v12 = vmul.f32 -1.442695, %v3890_v4  ;;  %v1074_v13 = vmul.f32 %v3565_v62, %v1073_v5 }
 0x16f   : > { %3566 = vpow2.f32 %v3185_v12  ;;  %v1075_v20 = vadd.f32 %v3565_v62, %v1074_v13 }
 0x171   : > { %v1079_v28 = vsel %vm3911_vm15, %v3565_v62, %v1075_v20  ;;  %v920_v62 = vpop.permute.xlu0 %919 }
 0x172   : > { %v1084_v31 = vsel %vm1081_vm1, %v1083_v18, %v1079_v28  ;;  %v927_v3 = vmul.f32 %v920_v62, %v915_v0 }
 0x173   : > { %v1087_v32 = vmul.f32 %v1084_v31, %v1046_v49 }
 0x175   : > { %v3567_v33 = vpop.eup %3566  ;;  %v3186_v34 = vmul.f32 -1.442695, %v1087_v32 }
 0x176   : > { %v1094_v35 = vadd.f32 1.0, %v3567_v33  ;;  %v3476_v33 = vld [vmem:[%s4557_s13 + $0x8] sm:$0xff] }
 0x177   : > { %3568 = vpow2.f32 %v3186_v34  ;;  %1387 = vmatpush.bf16.msra.mxu3 %v3476_v33 }
 0x178   : > { %3570 = vrcp.f32 %v1094_v35  ;;  %v1107_v47 = vand.u32 2147483648, %v1094_v35  ;;  %vm1101_vm4 = vweird.f32 %v1094_v35  ;;  %v1105_v48 = vand.u32 2147483647, %v1094_v35 }
 0x179   : > { %v925_v2 = vpop.permute.xlu0 %924 }
 0x17a   : > { %v1108_v54 = vor.u32 1.1754944e-38, %v1107_v47  ;;  %vm1106_vm7 = vcmp.eq.f32.partialorder %v1105_v48, 8.507059e+37 }
 0x17b   : > { %1388 = vmatpush.bf16.msra.mxu3 %v3475_v37 }
 0x17d   : > { %v3569_v38 = vpop.eup %3568 }
 0x17e   : > { %v3571_v39 = vpop.eup %3570  ;;  %v1095_v40 = vadd.f32 1.0, %v3569_v38  ;;  %v3991_v38 = vld [vmem:[%s4571_s27 + $0x1] ss:$0 sm:$0xff] }
 0x17f   : > { %v1097_v41 = vmul.f32 %v3571_v39, %v1094_v35  ;;  %vm1102_vm3 = vweird.f32 %v3571_v39 }
 0x180   : > { %3572 = vrcp.f32 %v1095_v40  ;;  %vm1103_vm5 = vmor %vm1101_vm4, %vm1102_vm3  ;;  %v1122_v50 = vand.u32 2147483648, %v1095_v40  ;;  %v1120_v53 = vand.u32 2147483647, %v1095_v40  ;;  %vm1116_vm8 = vweird.f32 %v1095_v40 }
 0x181   : > { %v1098_v42 = vsub.f32 1.0, %v1097_v41  ;;  %3574 = vrcp.f32 %v3695_v16  ;;  %vm1433_vm4 = vcmask 130048  }
 0x182   : > { %v1123_v57 = vor.u32 1.1754944e-38, %v1122_v50  ;;  %vm1121_vm10 = vcmp.eq.f32.partialorder %v1120_v53, 8.507059e+37 }
 0x183   : > { %v1099_v43 = vmul.f32 %v3571_v39, %v1098_v42 }
 0x185   : > { %v1100_v45 = vadd.f32 %v3571_v39, %v1099_v43 }
 0x186   : > { %v3573_v44 = vpop.eup %3572 }
 0x187   : > { %v1112_v46 = vmul.f32 %v3573_v44, %v1095_v40  ;;  %v1104_v51 = vsel %vm1103_vm5, %v3571_v39, %v1100_v45  ;;  %vm1117_vm6 = vweird.f32 %v3573_v44  ;;  %v3575_v17 = vpop.eup %3574  ;;  %vm1235_vm5 = vcmask 1041409  }
 0x188   : > { %v1109_v56 = vsel %vm1106_vm7, %v1108_v54, %v1104_v51  ;;  %vm1118_vm9 = vmor %vm1116_vm8, %vm1117_vm6  ;;  %v1303_v18 = vmul.f32 32.0, %v3575_v17  ;;  %vm1307_vm12 = vweird.f32 %v3575_v17 }
 0x189   : > { %v1113_v49 = vsub.f32 1.0, %v1112_v46  ;;  %v1126_v60 = vmul.f32 %v1109_v56, %v3890_v4  ;;  %v928_v4 = vmul.f32 %v925_v2, %v916_v1 }
 0x18a   : > { %v1304_v19 = vsub.f32 1.0, %v1303_v18 }
 0x18b   : > { %v1114_v52 = vmul.f32 %v3573_v44, %v1113_v49  ;;  %v1273_v5 = vpack.c.bf16 %v928_v4, %v927_v3 }
 0x18c   : > { %v1305_v20 = vmul.f32 %v3575_v17, %v1304_v19 }
 0x18d   : > { %v1115_v55 = vadd.f32 %v3573_v44, %v1114_v52 }
 0x18e   : > { %v1306_v21 = vadd.f32 %v3575_v17, %v1305_v20 }
 0x18f   : > { %v1119_v58 = vsel %vm1118_vm9, %v3573_v44, %v1115_v55  ;;  %v3999_v44 = vld [vmem:[%s4571_s27] ss:$0 sm:$0xff] }
 0x190   : > { %v1124_v59 = vsel %vm1121_vm10, %v1123_v57, %v1119_v58  ;;  %v3973_v22 = vsel %vm1307_vm12, %v3575_v17, %v1306_v21 }
 0x191   : > { %v1127_v61 = vmul.f32 %v1124_v59, %v1087_v32 }
 0x193   : > { %v1136_v63 = vpack.c.bf16 %v1127_v61, %v1126_v60 }
 0x195   : > { %3211 = vmatmul.msk.bf16.vlgmr.msra.gmra.mxu2 %vm952_vm0, %v1136_v63  ;;  %3212 = vmatmul.msk.bf16.vlgmr.msrb.gmra.mxu3 %vm952_vm0, %v1136_v63 }
 0x196   : > { %3213 = vmatmul.msk.bf16.vlgmr.msrb.gmra.mxu0 %vm952_vm0, %v1136_v63 }
 0x1a5   : > { %3223 = vmatmul.msk.bf16.vlgmr.msrb.gmra.mxu2 %vm1274_vm11, %v1273_v5 }
 0x218   : > { %v1189_v8 = vpop.f32.mrf.mxu2  ;;  %v4012_v4 = vpop.f32.mrf.mxu3 }
 0x219   : > { %v3957_v9 = vadd.f32 %v1189_v8, %v1139_v7 }
 0x21b   : > { %1353 = vrot.lane.b32.xlu0 %v3957_v9, %s4581_s2  ;;  %v4004_v57 = vadd.f32 1.0, %v3957_v9 }
 0x220   : > { %v1191_v10 = vpop.f32.mrf.mxu2  ;;  %v4014_v5 = vpop.f32.mrf.mxu3 }
 0x221   : > { %v3969_v15 = vadd.f32 %v1191_v10, %v1139_v7 }
 0x223   : > { %1530 = vrot.lane.b32.xlu0 %v3991_v38, %s4587_s3  ;;  %v4007_v59 = vadd.f32 1.0, %v3969_v15 }
 0x228   : > { %v3961_v11 = vpop.f32.mrf.mxu2 }
 0x229   : > { %v1296_v12 = vsel %vm952_vm0, %v3961_v11, 0.0 }
 0x22a   : > { %1297 = vadd.xlane.f32.xlu1 %v1296_v12 }
 0x22b   : > { %1453 = vrot.lane.b32.xlu0 %v3999_v44, %s4587_s3 }
 0x230   : > { %v3965_v13 = vpop.f32.mrf.mxu2 }
 0x231   : > { %v1299_v14 = vsel %vm952_vm0, %v3965_v13, 0.0 }
 0x232   : > { %1300 = vadd.xlane.f32.xlu1 %v1299_v14 }
 0x24b   : > { %1355 = vrot.lane.b32.xlu1 %v3969_v15, %s4581_s2 }
 0x28d   : > { %v1354_v63 = vpop.permute.xlu0 %1353 }
 0x29d   : > { %v1298_v23 = vpop.xlane.xlu1 %1297 }
 0x29e   : > { %v1309_v24 = vmul.f32 %v3973_v22, %v1298_v23  ;;  %v4024_v23 = vpop.f32.mrf.mxu0 }
 0x2a0   : > { %v1311_v25 = vsub.f32 %v3961_v11, %v1309_v24 }
 0x2a2   : > { %v1313_v26 = vmul.f32 %v1311_v25, %v1311_v25 }
 0x2a4   : > { %v1315_v27 = vsel %vm952_vm0, %v1313_v26, 0.0  ;;  %v1268_v26 = vld [vmem:[%s4617_s9] sm:$0xff] }
 0x2a5   : > { %1316 = vadd.xlane.f32.xlu2 %v1315_v27  ;;  %v1301_v28 = vpop.xlane.xlu1 %1300 }
 0x2a6   : > { %v1310_v29 = vmul.f32 %v3973_v22, %v1301_v28  ;;  %v4026_v24 = vpop.f32.mrf.mxu0 }
 0x2a8   : > { %v1312_v30 = vsub.f32 %v3965_v13, %v1310_v29 }
 0x2aa   : > { %v1314_v31 = vmul.f32 %v1312_v30, %v1312_v30 }
 0x2ac   : > { %v1318_v32 = vsel %vm952_vm0, %v1314_v31, 0.0 }
 0x2ad   : > { %1319 = vadd.xlane.f32.xlu2 %v1318_v32 }
 0x2bd   : > { %v1356_v0 = vpop.permute.xlu1 %1355 }
 0x318   : > { %v1317_v34 = vpop.xlane.xlu2 %1316 }
 0x319   : > { %v1321_v35 = vmul.f32 %v1317_v34, %v3973_v22  ;;  %v4033_v34 = vpop.permute.xlu0 %1530 }
 0x31b   : > { %v1323_v36 = vadd.f32 1e-05, %v1321_v35 }
 0x31d   : > { %3576 = vrsqrt.f32 %v1323_v36  ;;  %vm1331_vm14 = vweird.f32 %v1323_v36 }
 0x320   : > { %v1320_v39 = vpop.xlane.xlu2 %1319 }
 0x321   : > { %v1322_v40 = vmul.f32 %v1320_v39, %v3973_v22  ;;  %v1269_v39 = vld [vmem:[%s4617_s9 + $0x8] sm:$0xff] }
 0x323   : > { %v3577_v41 = vpop.eup %3576  ;;  %v1324_v42 = vadd.f32 1e-05, %v1322_v40 }
 0x324   : > { %v1326_v43 = vmul.f32 %v3577_v41, %v1323_v36  ;;  %vm1332_vm13 = vweird.f32 %v3577_v41 }
 0x325   : > { %3578 = vrsqrt.f32 %v1324_v42  ;;  %vm1333_vm15 = vmor %vm1331_vm14, %vm1332_vm13  ;;  %vm1341_vm2 = vweird.f32 %v1324_v42  ;;  %vm1729_vm13 = vcmask 15360   ;;  %vm1760_vm14 = vcmask 1040384  }
 0x326   : > { %v1327_v45 = vmul.f32 %v3577_v41, %v1326_v43 }
 0x328   : > { %v1328_v46 = vmul.f32 0.5, %v1327_v45  ;;  %v4039_v45 = vpop.permute.xlu0 %1453 }
 0x32a   : > { %v1329_v47 = vsub.f32 1.5, %v1328_v46 }
 0x32b   : > { %v3579_v48 = vpop.eup %3578 }
 0x32c   : > { %v1330_v49 = vmul.f32 %v3577_v41, %v1329_v47  ;;  %v1336_v50 = vmul.f32 %v3579_v48, %v1324_v42  ;;  %vm1342_vm1 = vweird.f32 %v3579_v48 }
 0x32d   : > { %vm1343_vm3 = vmor %vm1341_vm2, %vm1342_vm1 }
 0x32e   : > { %v1337_v51 = vmul.f32 %v3579_v48, %v1336_v50  ;;  %v1334_v52 = vsel %vm1333_vm15, %v3577_v41, %v1330_v49 }
 0x32f   : > { %v1345_v55 = vmul.f32 %v1334_v52, %v1311_v25 }
 0x330   : > { %v1338_v53 = vmul.f32 0.5, %v1337_v51 }
 0x331   : > { %v1349_v60 = vmul.f32 %v4004_v57, %v1345_v55 }
 0x332   : > { %v1339_v54 = vsub.f32 1.5, %v1338_v53  ;;  %v1223_v53 = vld [vmem:[%s904_s0 + $0x1] sm:$0x1] }
 0x333   : > { %v1359_v1 = vadd.f32 %v1354_v63, %v1349_v60  ;;  %v1229_v55 = vpack.c.bf16 %v1223_v53, %v1223_v53 }
 0x334   : > { %v1340_v56 = vmul.f32 %v3579_v48, %v1339_v54  ;;  %v3474_v54 = vld [vmem:[%s4619_s17 + $0x8] sm:$0xff] }
 0x335   : > { %1259 = vmatpush.bf16.msra.mxu1 %v3474_v54  ;;  %v1233_v60 = vunpack.c.l.b16 %v1229_v55 }
 0x336   : > { %v1344_v58 = vsel %vm1343_vm3, %v3579_v48, %v1340_v56  ;;  %v1222_v56 = vld [vmem:[%s904_s0] sm:$0x1] }
 0x337   : > { %v1346_v61 = vmul.f32 %v1344_v58, %v1312_v30  ;;  %v1228_v58 = vpack.c.bf16 %v1222_v56, %v1222_v56  ;;  %v1234_v63 = vrot.slane %v1233_v60, 7 }
 0x339   : > { %v1350_v62 = vmul.f32 %v4007_v59, %v1346_v61  ;;  %v3473_v61 = vld [vmem:[%s4619_s17] sm:$0xff] }
 0x33a   : > { %1260 = vmatpush.bf16.msra.mxu1 %v3473_v61 }
 0x33b   : > { %v1360_v2 = vadd.f32 %v1356_v0, %v1350_v62  ;;  %v1232_v62 = vunpack.c.l.b16 %v1228_v58 }
 0x33d   : > { %v1365_v3 = vpack.c.bf16 %v1360_v2, %v1359_v1  ;;  %v1236_v0 = vsel %vm1235_vm5, %v1234_v63, %v1232_v62 }
 0x33e   : > { %v1237_v1 = vpack.c.b16 %v1236_v0, %v1236_v0 }
 0x33f   : > { %3232 = vmatmul.msk.bf16.vlgmr.msra.gmra.mxu3 %vm952_vm0, %v1365_v3 }
 0x340   : > { %3222 = vmatmul.msk.bf16.vlgmr.msra.gmra.mxu1 %vm952_vm0, %v1237_v1 }
 0x3c2   : > { %v1390_v7 = vpop.f32.mrf.mxu3 }
 0x3c3   : > { %v1402_v18 = vmul.f32 %v3999_v44, %v1390_v7  ;;  %v1487_v19 = vmul.f32 %v3991_v38, %v1390_v7  ;;  %v1456_v48 = vmul.f32 %v4039_v45, %v1390_v7  ;;  %v1533_v50 = vmul.f32 %v4033_v34, %v1390_v7 }
 0x3ca   : > { %v1392_v8 = vpop.f32.mrf.mxu3 }
 0x3cb   : > { %v1405_v10 = vpack.c.bf16 %v1392_v8, %v1390_v7  ;;  %v1403_v16 = vmul.f32 %v3999_v44, %v1392_v8  ;;  %v1488_v17 = vmul.f32 %v3991_v38, %v1392_v8  ;;  %v1457_v46 = vmul.f32 %v4039_v45, %v1392_v8 }
 0x3cc   : > { %v1534_v47 = vmul.f32 %v4033_v34, %v1392_v8 }
 0x3cd   : > { %1407 = vrot.lane.b32.xlu2 %v1405_v10, %s4581_s2  ;;  %v1404_v20 = vpack.c.bf16 %v1403_v16, %v1402_v18  ;;  %v1489_v21 = vpack.c.bf16 %v1488_v17, %v1487_v19  ;;  %v1458_v51 = vpack.c.bf16 %v1457_v46, %v1456_v48 }
 0x3ce   : > { %v1535_v52 = vpack.c.bf16 %v1534_v47, %v1533_v50 }
 0x427   : > { %v1408_v12 = vpop.permute.xlu2 %1407 }
 0x428   : > { %v1413_v14 = vsel %vm952_vm0, %v1408_v12, 0 }
 0x429   : > { %1422 = vmatpush.bf16.xpose.msra.mxu0 %v1413_v14  ;;  %1500 = vmatpush.bf16.xpose.msra.mxu2 %v1413_v14 }
 0x430   : > { %3233 = vmatmul.msk.bf16.vlgmr.msra.gmra.mxu0 %vm952_vm0, %v1404_v20  ;;  %3235 = vmatmul.msk.bf16.vlgmr.msra.gmra.mxu2 %vm952_vm0, %v1489_v21 }
 0x4ad   : > { %v1424_v25 = vpop.f32.mrf.mxu0 }
 0x4ae   : > { %v1429_v27 = vmul.f32 0.25, %v1424_v25 }
 0x4b0   : > { %v1431_v28 = vadd.f32 %v1429_v27, %v1268_v26 }
 0x4b2   : > { %v1434_v29 = vsel %vm1433_vm4, %v1431_v28, -inf }
 0x4b3   : > { %v1502_v30 = vpop.f32.mrf.mxu2  ;;  %1435 = vmax.xlane.f32.xlu1 %v1434_v29 }
 0x4b4   : > { %v1507_v31 = vmul.f32 0.25, %v1502_v30 }
 0x4b5   : > { %v1426_v37 = vpop.f32.mrf.mxu0 }
 0x4b6   : > { %v1509_v32 = vadd.f32 %v1507_v31, %v1268_v26  ;;  %v1430_v41 = vmul.f32 0.25, %v1426_v37  ;;  %v3478_v37 = vld [vmem:[%s4558_s14 + $0x8] sm:$0xff] }
 0x4b7   : > { %1585 = vmatpush.bf16.msrb.mxu0 %v3478_v37 }
 0x4b8   : > { %v1511_v33 = vsel %vm1433_vm4, %v1509_v32, -inf  ;;  %v1432_v43 = vadd.f32 %v1430_v41, %v1269_v39 }
 0x4b9   : > { %1512 = vmax.xlane.f32.xlu0 %v1511_v33 }
 0x4ba   : > { %v1437_v49 = vsel %vm1433_vm4, %v1432_v43, -inf }
 0x4bb   : > { %v1504_v35 = vpop.f32.mrf.mxu2 }
 0x4bc   : > { %v1508_v36 = vmul.f32 0.25, %v1504_v35 }
 0x4be   : > { %v1510_v40 = vadd.f32 %v1508_v36, %v1269_v39  ;;  %v3477_v39 = vld [vmem:[%s4558_s14] sm:$0xff] }
 0x4bf   : > { %1586 = vmatpush.bf16.msrb.mxu0 %v3477_v39 }
 0x4c0   : > { %v1514_v42 = vsel %vm1433_vm4, %v1510_v40, -inf }
 0x4c1   : > { %1515 = vmax.xlane.f32.xlu2 %v1514_v42 }
 0x4c9   : > { %1438 = vmax.xlane.f32.xlu2 %v1437_v49 }
 0x4cc   : > { %1460 = vrot.lane.b32.xlu1 %v1458_v51, %s4587_s3 }
 0x4cd   : > { %1537 = vrot.lane.b32.xlu0 %v1535_v52, %s4587_s3 }
 0x526   : > { %v1436_v2 = vpop.xlane.xlu1 %1435 }
 0x527   : > { %v1440_v3 = vsub.f32 %v1431_v28, %v1436_v2  ;;  %v3542_v2 = vld [vmem:[%s4559_s15] ss:$0 sm:$0xff] }
 0x529   : > { %v1442_v7 = vmul.f32 1.442695, %v1440_v3 }
 0x52b   : > { %3580 = vpow2.f32 %v1442_v7 }
 0x52c   : > { %v1513_v8 = vpop.xlane.xlu0 %1512 }
 0x52d   : > { %v1517_v10 = vsub.f32 %v1509_v32, %v1513_v8 }
 0x52f   : > { %v1519_v12 = vmul.f32 1.442695, %v1517_v10 }
 0x531   : > { %v3581_v14 = vpop.eup %3580  ;;  %3582 = vpow2.f32 %v1519_v12 }
 0x532   : > { %v1446_v16 = vsel %vm1433_vm4, %v3581_v14, 0.0 }
 0x533   : > { %1447 = vadd.xlane.f32.xlu2 %v1446_v16 }
 0x534   : > { %v1516_v17 = vpop.xlane.xlu2 %1515 }
 0x535   : > { %v1518_v18 = vsub.f32 %v1510_v40, %v1516_v17  ;;  %v4075_v40 = vpop.f32.mrf.mxu1 }
 0x537   : > { %v3583_v19 = vpop.eup %3582  ;;  %v1521_v20 = vmul.f32 1.442695, %v1518_v18 }
 0x538   : > { %v1523_v21 = vsel %vm1433_vm4, %v3583_v19, 0.0 }
 0x539   : > { %3584 = vpow2.f32 %v1521_v20  ;;  %1524 = vadd.xlane.f32.xlu0 %v1523_v21 }
 0x53c   : > { %v1439_v25 = vpop.xlane.xlu2 %1438 }
 0x53d   : > { %v1441_v26 = vsub.f32 %v1432_v43, %v1439_v25  ;;  %v1264_v42 = vpop.f32.mrf.mxu1 }
 0x53e   : > { %v1461_v27 = vpop.permute.xlu1 %1460 }
 0x53f   : > { %v3585_v28 = vpop.eup %3584  ;;  %v1444_v29 = vmul.f32 1.442695, %v1441_v26  ;;  %1473 = vmatpush.bf16.msrb.mxu1 %v1461_v27  ;;  %v1538_v30 = vpop.permute.xlu0 %1537 }
 0x540   : > { %v1529_v31 = vpack.c.bf16 %v3585_v28, %v3583_v19  ;;  %1550 = vmatpush.bf16.msrb.mxu3 %v1538_v30  ;;  %v1526_v36 = vsel %vm1433_vm4, %v3585_v28, 0.0  ;;  %v3480_v28 = vld [vmem:[%s4560_s16 + $0x8] sm:$0xff] }
 0x541   : > { %3586 = vpow2.f32 %v1444_v29 }
 0x543   : > { %3236 = vmatmul.msk.bf16.vlgmr.msrb.gmra.mxu3 %vm1433_vm4, %v1529_v31  ;;  %1689 = vmatpush.bf16.msra.mxu1 %v3480_v28 }
 0x547   : > { %v3587_v32 = vpop.eup %3586 }
 0x548   : > { %v1449_v33 = vsel %vm1433_vm4, %v3587_v32, 0.0  ;;  %v1452_v35 = vpack.c.bf16 %v3587_v32, %v3581_v14  ;;  %v3479_v32 = vld [vmem:[%s4560_s16] sm:$0xff] }
 0x549   : > { %1450 = vadd.xlane.f32.xlu2 %v1449_v33  ;;  %1690 = vmatpush.bf16.msra.mxu1 %v3479_v32 }
 0x54a   : > { %3234 = vmatmul.msk.bf16.vlgmr.msrb.gmra.mxu1 %vm1433_vm4, %v1452_v35 }
 0x54d   : > { %1649 = vrot.lane.b32.xlu0 %v4007_v59, %s4587_s3  ;;  %v4079_v59 = vpack.c.bf16 %v4075_v40, %v4075_v40 }
 0x54f   : > { %v1709_v41 = vsel %vm952_vm0, %v4079_v59, 0 }
 0x550   : > { %1718 = vmatpush.bf16.xpose.msrb.mxu2 %v1709_v41  ;;  %1795 = vmatpush.bf16.xpose.msra.mxu0 %v1709_v41 }
 0x551   : > { %1527 = vadd.xlane.f32.xlu2 %v1526_v36 }
 0x555   : > { %1749 = vrot.lane.b32.xlu0 %v3999_v44, %s4585_s8 }
 0x5a6   : > { %v1448_v43 = vpop.xlane.xlu2 %1447 }
 0x5a7   : > { %3588 = vrcp.f32 %v1448_v43 }
 0x5ac   : > { %v1525_v47 = vpop.xlane.xlu0 %1524 }
 0x5ad   : > { %3590 = vrcp.f32 %v1525_v47  ;;  %v3589_v51 = vpop.eup %3588 }
 0x5b3   : > { %v3591_v52 = vpop.eup %3590 }
 0x5bc   : > { %v1451_v46 = vpop.xlane.xlu2 %1450 }
 0x5c4   : > { %v1528_v48 = vpop.xlane.xlu2 %1527 }
 0x5c5   : > { %3592 = vrcp.f32 %v1528_v48 }
 0x5c6   : > { %v1552_v49 = vpop.f32.mrf.mxu3  ;;  %3594 = vrcp.f32 %v1451_v46 }
 0x5c7   : > { %v1475_v50 = vpop.f32.mrf.mxu1  ;;  %v1559_v54 = vmul.f32 %v3591_v52, %v1552_v49 }
 0x5c8   : > { %v1482_v55 = vmul.f32 %v3589_v51, %v1475_v50 }
 0x5ca   : > { %v1561_v63 = vadd.f32 %v1559_v54, %v1482_v55 }
 0x5cb   : > { %v3593_v53 = vpop.eup %3592 }
 0x5cc   : > { %v3595_v58 = vpop.eup %3594 }
 0x5ce   : > { %v1554_v56 = vpop.f32.mrf.mxu3 }
 0x5cf   : > { %v1560_v60 = vmul.f32 %v3593_v53, %v1554_v56  ;;  %v1477_v61 = vpop.f32.mrf.mxu1 }
 0x5d0   : > { %v1483_v62 = vmul.f32 %v3595_v58, %v1477_v61  ;;  %v1650_v58 = vpop.permute.xlu0 %1649 }
 0x5d2   : > { %v1562_v0 = vadd.f32 %v1560_v60, %v1483_v62 }
 0x5d4   : > { %v1563_v1 = vpack.c.bf16 %v1562_v0, %v1561_v63 }
 0x5d6   : > { %3245 = vmatmul.msk.bf16.vlgmr.msrb.gmra.mxu0 %vm952_vm0, %v1563_v1 }
 0x653   : > { %v1588_v3 = vpop.f32.mrf.mxu0 }
 0x654   : > { %v1593_v7 = vadd.f32 %v1588_v3, %v3961_v11 }
 0x656   : > { %v4088_v8 = vadd.f32 %v3542_v2, %v1593_v7 }
 0x658   : > { %v1601_v10 = vsel %vm952_vm0, %v4088_v8, 0.0 }
 0x659   : > { %1602 = vadd.xlane.f32.xlu1 %v1601_v10 }
 0x65b   : > { %v1590_v12 = vpop.f32.mrf.mxu0 }
 0x65c   : > { %v1594_v14 = vadd.f32 %v1590_v12, %v3965_v13 }
 0x65e   : > { %v4093_v16 = vadd.f32 %v3542_v2, %v1594_v14 }
 0x660   : > { %v1604_v17 = vsel %vm952_vm0, %v4093_v16, 0.0 }
 0x661   : > { %1605 = vadd.xlane.f32.xlu2 %v1604_v17 }
 0x672   : > { %1655 = vrot.lane.b32.xlu1 %v3957_v9, %s4585_s8 }
 0x679   : > { %1647 = vrot.lane.b32.xlu2 %v4004_v57, %s4587_s3 }
 0x6cc   : > { %v1603_v11 = vpop.xlane.xlu1 %1602 }
 0x6cd   : > { %v1607_v18 = vmul.f32 %v1603_v11, %v3973_v22 }
 0x6cf   : > { %v1609_v19 = vsub.f32 %v4088_v8, %v1607_v18 }
 0x6d1   : > { %v1611_v20 = vmul.f32 %v1609_v19, %v1609_v19 }
 0x6d3   : > { %v1613_v13 = vsel %vm952_vm0, %v1611_v20, 0.0 }
 0x6d4   : > { %1614 = vadd.xlane.f32.xlu2 %v1613_v13  ;;  %v1606_v21 = vpop.xlane.xlu2 %1605 }
 0x6d5   : > { %v1608_v25 = vmul.f32 %v1606_v21, %v3973_v22 }
 0x6d7   : > { %v1610_v26 = vsub.f32 %v4093_v16, %v1608_v25 }
 0x6d9   : > { %v1612_v27 = vmul.f32 %v1610_v26, %v1610_v26 }
 0x6db   : > { %v1616_v9 = vsel %vm952_vm0, %v1612_v27, 0.0 }
 0x6dc   : > { %1617 = vadd.xlane.f32.xlu2 %v1616_v9  ;;  %v1648_v57 = vpop.permute.xlu2 %1647 }
 0x6e4   : > { %v1656_v61 = vpop.permute.xlu1 %1655 }
 0x6f4   : > { %1657 = vrot.lane.b32.xlu2 %v3969_v15, %s4585_s8 }
 0x6fc   : > { %1825 = vrot.lane.b32.xlu2 %v3991_v38, %s4585_s8 }
 0x747   : > { %v1615_v29 = vpop.xlane.xlu2 %1614 }
 0x748   : > { %v1619_v30 = vmul.f32 %v1615_v29, %v3973_v22 }
 0x74a   : > { %v1621_v31 = vadd.f32 1e-05, %v1619_v30 }
 0x74c   : > { %3596 = vrsqrt.f32 %v1621_v31  ;;  %vm1629_vm7 = vweird.f32 %v1621_v31 }
 0x74f   : > { %v1618_v15 = vpop.xlane.xlu2 %1617 }
 0x750   : > { %v1620_v33 = vmul.f32 %v1618_v15, %v3973_v22 }
 0x752   : > { %v3597_v35 = vpop.eup %3596  ;;  %v1622_v36 = vadd.f32 1e-05, %v1620_v33 }
 0x753   : > { %v1624_v37 = vmul.f32 %v3597_v35, %v1621_v31  ;;  %vm1630_vm6 = vweird.f32 %v3597_v35 }
 0x754   : > { %3598 = vrsqrt.f32 %v1622_v36  ;;  %vm1631_vm8 = vmor %vm1629_vm7, %vm1630_vm6  ;;  %vm1639_vm10 = vweird.f32 %v1622_v36 }
 0x755   : > { %v1625_v39 = vmul.f32 %v3597_v35, %v1624_v37  ;;  %v1750_v37 = vpop.permute.xlu0 %1749 }
 0x757   : > { %v1626_v41 = vmul.f32 0.5, %v1625_v39  ;;  %v1658_v62 = vpop.permute.xlu2 %1657  ;;  %v1752_v39 = vmul.f32 %v1750_v37, %v4075_v40  ;;  %v3543_v37 = vld [vmem:[%s4563_s19] ss:$0 sm:$0xff] }
 0x759   : > { %v1627_v42 = vsub.f32 1.5, %v1626_v41  ;;  %v1753_v41 = vpack.c.bf16 %v1752_v39, %v1752_v39 }
 0x75a   : > { %v3599_v43 = vpop.eup %3598 }
 0x75b   : > { %v1628_v46 = vmul.f32 %v3597_v35, %v1627_v42  ;;  %v1634_v47 = vmul.f32 %v3599_v43, %v1622_v36  ;;  %vm1640_vm9 = vweird.f32 %v3599_v43 }
 0x75c   : > { %vm1641_vm12 = vmor %vm1639_vm10, %vm1640_vm9 }
 0x75d   : > { %v1635_v48 = vmul.f32 %v3599_v43, %v1634_v47  ;;  %v1632_v49 = vsel %vm1631_vm8, %v3597_v35, %v1628_v46 }
 0x75e   : > { %v1643_v52 = vmul.f32 %v1632_v49, %v1609_v19  ;;  %v4129_v19 = vld [vmem:[%s4620_s4] sm:$0xff] }
 0x75f   : > { %v1636_v50 = vmul.f32 0.5, %v1635_v48  ;;  %v1826_v33 = vpop.permute.xlu2 %1825 }
 0x760   : > { %v1653_v56 = vmul.f32 %v1648_v57, %v1643_v52  ;;  %v4138_v57 = vld [vmem:[%s4620_s4 + $0x8] sm:$0xff]  ;;  %v1828_v35 = vmul.f32 %v1826_v33, %v4075_v40 }
 0x761   : > { %v1637_v51 = vsub.f32 1.5, %v1636_v50 }
 0x762   : > { %v1661_v63 = vadd.f32 %v1656_v61, %v1653_v56  ;;  %v1829_v36 = vpack.c.bf16 %v1828_v35, %v1828_v35 }
 0x763   : > { %v1638_v53 = vmul.f32 %v3599_v43, %v1637_v51 }
 0x765   : > { %v1642_v54 = vsel %vm1641_vm12, %v3599_v43, %v1638_v53 }
 0x766   : > { %v1644_v55 = vmul.f32 %v1642_v54, %v1610_v26 }
 0x768   : > { %v1654_v60 = vmul.f32 %v1650_v58, %v1644_v55 }
 0x76a   : > { %v1662_v0 = vadd.f32 %v1658_v62, %v1654_v60 }
 0x76c   : > { %v1667_v1 = vpack.c.bf16 %v1662_v0, %v1661_v63 }
 0x76e   : > { %3254 = vmatmul.msk.bf16.vlgmr.msra.gmra.mxu1 %vm952_vm0, %v1667_v1 }
 0x7eb   : > { %v1692_v2 = vpop.f32.mrf.mxu1 }
 0x7ec   : > { %v1701_v7 = vmul.f32 %v3999_v44, %v1692_v2  ;;  %v1782_v10 = vmul.f32 %v3991_v38, %v1692_v2 }
 0x7f3   : > { %v1694_v3 = vpop.f32.mrf.mxu1 }
 0x7f4   : > { %v1702_v12 = vmul.f32 %v3999_v44, %v1694_v3  ;;  %v1783_v14 = vmul.f32 %v3991_v38, %v1694_v3 }
 0x7f6   : > { %v1703_v17 = vpack.c.bf16 %v1702_v12, %v1701_v7  ;;  %v1784_v11 = vpack.c.bf16 %v1783_v14, %v1782_v10 }
 0x7f8   : > { %3255 = vmatmul.msk.bf16.vlgmr.msrb.gmra.mxu2 %vm952_vm0, %v1703_v17  ;;  %3257 = vmatmul.msk.bf16.vlgmr.msra.gmra.mxu0 %vm952_vm0, %v1784_v11  ;;  %v3482_v17 = vld [vmem:[%s4562_s18 + $0x8] sm:$0xff] }
 0x7f9   : > { %1881 = vmatpush.bf16.msra.mxu2 %v3482_v17 }
 0x875   : > { %v1797_v18 = vpop.f32.mrf.mxu0 }
 0x876   : > { %v1802_v20 = vmul.f32 0.25, %v1797_v18  ;;  %v3481_v18 = vld [vmem:[%s4562_s18] sm:$0xff] }
 0x877   : > { %1882 = vmatpush.bf16.msra.mxu2 %v3481_v18  ;;  %v3272_v18 = vld [vmem:[%s4564_s20 + $0x8] sm:$0xf0] }
 0x878   : > { %v1804_v13 = vadd.f32 %v1802_v20, %v4129_v19 }
 0x87a   : > { %v1806_v44 = vsel %vm1729_vm13, %v1804_v13, -inf }
 0x87b   : > { %1807 = vmax.xlane.f32.xlu2 %v1806_v44  ;;  %v1720_v38 = vpop.f32.mrf.mxu2 }
 0x87c   : > { %v1725_v21 = vmul.f32 0.25, %v1720_v38 }
 0x87d   : > { %v1799_v25 = vpop.f32.mrf.mxu0 }
 0x87e   : > { %v1727_v26 = vadd.f32 %v1725_v21, %v4129_v19  ;;  %v1803_v27 = vmul.f32 0.25, %v1799_v25 }
 0x880   : > { %v1730_v9 = vsel %vm1729_vm13, %v1727_v26, -inf  ;;  %v1805_v30 = vadd.f32 %v1803_v27, %v4138_v57 }
 0x881   : > { %1731 = vmax.xlane.f32.xlu0 %v1730_v9 }
 0x882   : > { %v1809_v32 = vsel %vm1729_vm13, %v1805_v30, -inf }
 0x883   : > { %v1722_v28 = vpop.f32.mrf.mxu2 }
 0x884   : > { %v1726_v29 = vmul.f32 0.25, %v1722_v28 }
 0x886   : > { %v1728_v31 = vadd.f32 %v1726_v29, %v4138_v57 }
 0x888   : > { %v1733_v15 = vsel %vm1729_vm13, %v1728_v31, -inf }
 0x889   : > { %1810 = vmax.xlane.f32.xlu0 %v1809_v32  ;;  %1734 = vmax.xlane.f32.xlu1 %v1733_v15 }
 0x893   : > { %1831 = vrot.lane.b32.xlu2 %v1829_v36, %s4621_s7 }
 0x8a2   : > { %1755 = vrot.lane.b32.xlu1 %v1753_v41, %s4621_s7 }
 0x8ee   : > { %v1808_v42 = vpop.xlane.xlu2 %1807 }
 0x8ef   : > { %v1812_v50 = vsub.f32 %v1804_v13, %v1808_v42 }
 0x8f1   : > { %v1814_v51 = vmul.f32 1.442695, %v1812_v50  ;;  %v1140_v50 = vperm.slane %v3954_v6, 1 }
 0x8f4   : > { %v1732_v43 = vpop.xlane.xlu0 %1731 }
 0x8f5   : > { %v1736_v46 = vsub.f32 %v1727_v26, %v1732_v43 }
 0x8f6   : > { %v1832_v47 = vpop.permute.xlu2 %1831 }
 0x8f7   : > { %v1738_v48 = vmul.f32 1.442695, %v1736_v46  ;;  %v1837_v49 = vsel %vm1760_vm14, %v1832_v47, 0 }
 0x8f8   : > { %1846 = vmatpush.bf16.msrb.mxu1 %v1837_v49 }
 0x8f9   : > { %3600 = vpow2.f32 %v1738_v48 }
 0x8fa   : > { %3602 = vpow2.f32 %v1814_v51  ;;  %v4178_v51 = vadd.f32 %v4014_v5, %v1140_v50 }
 0x8fc   : > { %v1735_v52 = vpop.xlane.xlu1 %1734  ;;  %v1811_v53 = vpop.xlane.xlu0 %1810 }
 0x8fd   : > { %v1737_v54 = vsub.f32 %v1728_v31, %v1735_v52  ;;  %v1813_v55 = vsub.f32 %v1805_v30, %v1811_v53 }
 0x8ff   : > { %v3601_v56 = vpop.eup %3600  ;;  %v1740_v58 = vmul.f32 1.442695, %v1737_v54  ;;  %v1816_v60 = vmul.f32 1.442695, %v1813_v55 }
 0x900   : > { %v1742_v61 = vsel %vm1729_vm13, %v3601_v56, 0.0  ;;  %v3603_v62 = vpop.eup %3602 }
 0x901   : > { %3604 = vpow2.f32 %v1740_v58  ;;  %1743 = vadd.xlane.f32.xlu0 %v1742_v61  ;;  %v1818_v7 = vsel %vm1729_vm13, %v3603_v62, 0.0  ;;  %v3278_v61 = vld [vmem:[%s4564_s20 + $0x10] sm:$0xf] }
 0x902   : > { %3606 = vpow2.f32 %v1816_v60 }
 0x907   : > { %v3605_v63 = vpop.eup %3604 }
 0x908   : > { %v3607_v0 = vpop.eup %3606  ;;  %v1745_v1 = vsel %vm1729_vm13, %v3605_v63, 0.0  ;;  %v1748_v14 = vpack.c.bf16 %v3605_v63, %v3601_v56  ;;  %v3485_v63 = vld [vmem:[%s4564_s20 + $0x14] sm:$0xf] }
 0x909   : > { %v1824_v2 = vpack.c.bf16 %v3607_v0, %v3603_v62  ;;  %1746 = vadd.xlane.f32.xlu0 %v1745_v1  ;;  %v1821_v3 = vsel %vm1729_vm13, %v3607_v0, 0.0  ;;  %v3486_v62 = vld [vmem:[%s4564_s20 + $0x14] sm:$0xf0]  ;;  %v3280_v1 = vld [vmem:[%s4564_s20 + $0x18] sm:$0xf0] }
 0x90a   : > { %1822 = vadd.xlane.f32.xlu1 %v1821_v3  ;;  %v3279_v0 = vor.u32 %v3486_v62, %v3278_v61  ;;  %v3283_v3 = vor.u32 %v3485_v63, %v3280_v1  ;;  %v3487_v61 = vld [vmem:[%s4566_s22] sm:$0xff] }
 0x90b   : > { %3258 = vmatmul.msk.bf16.vlgmr.msrb.gmra.mxu1 %vm1729_vm13, %v1824_v2 }
 0x90c   : > { %2009 = vmatpush.bf16.msrb.mxu0 %v3283_v3 }
 0x911   : > { %1819 = vadd.xlane.f32.xlu0 %v1818_v7 }
 0x914   : > { %v1756_v10 = vpop.permute.xlu1 %1755 }
 0x915   : > { %v1762_v12 = vsel %vm1760_vm14, %v1756_v10, 0  ;;  %v3270_v10 = vld [vmem:[%s4564_s20] sm:$0xf] }
 0x916   : > { %1771 = vmatpush.bf16.msra.mxu3 %v1762_v12  ;;  %v3484_v12 = vld [vmem:[%s4564_s20 + $0x4] sm:$0xf0] }
 0x919   : > { %3256 = vmatmul.msk.bf16.vlgmr.msra.gmra.mxu3 %vm1729_vm13, %v1748_v14  ;;  %v3483_v14 = vld [vmem:[%s4564_s20 + $0x4] sm:$0xf] }
 0x91a   : > { %1995 = vmatpush.bf16.msrb.mxu3 %v3279_v0 }
 0x974   : > { %v1744_v11 = vpop.xlane.xlu0 %1743 }
 0x975   : > { %3608 = vrcp.f32 %v1744_v11  ;;  %v3271_v11 = vor.u32 %v3484_v12, %v3270_v10 }
 0x977   : > { %1996 = vmatpush.bf16.msrb.mxu3 %v3271_v11 }
 0x97b   : > { %v3609_v25 = vpop.eup %3608 }
 0x97c   : > { %v1747_v20 = vpop.xlane.xlu0 %1746 }
 0x97d   : > { %v1823_v38 = vpop.xlane.xlu1 %1822 }
 0x984   : > { %v1820_v44 = vpop.xlane.xlu0 %1819 }
 0x985   : > { %3610 = vrcp.f32 %v1820_v44 }
 0x986   : > { %3612 = vrcp.f32 %v1747_v20  ;;  %v3275_v20 = vor.u32 %v3483_v14, %v3272_v18 }
 0x987   : > { %3614 = vrcp.f32 %v1823_v38 }
 0x988   : > { %v1848_v13 = vpop.f32.mrf.mxu1  ;;  %2010 = vmatpush.bf16.msrb.mxu0 %v3275_v20 }
 0x98b   : > { %v3611_v26 = vpop.eup %3610 }
 0x98c   : > { %v3613_v9 = vpop.eup %3612  ;;  %v1855_v31 = vmul.f32 %v3611_v26, %v1848_v13 }
 0x98d   : > { %v3615_v29 = vpop.eup %3614 }
 0x990   : > { %v1850_v27 = vpop.f32.mrf.mxu1 }
 0x991   : > { %v1856_v32 = vmul.f32 %v3615_v29, %v1850_v27 }
 0x99c   : > { %v1773_v21 = vpop.f32.mrf.mxu3 }
 0x99d   : > { %v1780_v28 = vmul.f32 %v3609_v25, %v1773_v21 }
 0x99f   : > { %v1857_v33 = vadd.f32 %v1855_v31, %v1780_v28 }
 0x9a4   : > { %v1775_v30 = vpop.f32.mrf.mxu3 }
 0x9a5   : > { %v1781_v15 = vmul.f32 %v3613_v9, %v1775_v30 }
 0x9a7   : > { %v1858_v35 = vadd.f32 %v1856_v32, %v1781_v15 }
 0x9a9   : > { %v1859_v36 = vpack.c.bf16 %v1858_v35, %v1857_v33 }
 0x9ab   : > { %3267 = vmatmul.msk.bf16.vlgmr.msra.gmra.mxu2 %vm952_vm0, %v1859_v36 }
 0xa2e   : > { %v1884_v39 = vpop.f32.mrf.mxu2 }
 0xa2f   : > { %v1889_v41 = vadd.f32 %v1884_v39, %v4088_v8  ;;  %v1204_v8 = vadd.f32 %v4012_v4, %v1140_v50  ;;  %v4224_v39 = vadd.f32 1.0, %v4178_v51 }
 0xa31   : > { %v4167_v42 = vadd.f32 %v3543_v37, %v1889_v41  ;;  %v4183_v52 = vadd.f32 1.0, %v1204_v8 }
 0xa33   : > { %v1897_v43 = vsel %vm952_vm0, %v4167_v42, 0.0 }
 0xa34   : > { %1898 = vadd.xlane.f32.xlu2 %v1897_v43 }
 0xa36   : > { %v1886_v46 = vpop.f32.mrf.mxu2 }
 0xa37   : > { %v1890_v47 = vadd.f32 %v1886_v46, %v4093_v16 }
 0xa39   : > { %v4172_v48 = vadd.f32 %v3543_v37, %v1890_v47 }
 0xa3b   : > { %v1900_v49 = vsel %vm952_vm0, %v4172_v48, 0.0 }
 0xa3c   : > { %1901 = vadd.xlane.f32.xlu0 %v1900_v49 }
 0xa4c   : > { %1949 = vrot.lane.b32.xlu2 %v4178_v51, %s4621_s7 }
 0xa54   : > { %2170 = vrot.lane.b32.xlu2 %v4183_v52, %s4587_s3 }
 0xa5c   : > { %2178 = vrot.lane.b32.xlu2 %v1204_v8, %s4585_s8 }
 0xa64   : > { %2180 = vrot.lane.b32.xlu2 %v4178_v51, %s4585_s8  ;;  %v3493_v51 = vld [vmem:[%s4566_s22 + $0x30] sm:$0xff] }
 0xaa7   : > { %v1899_v16 = vpop.xlane.xlu2 %1898 }
 0xaa8   : > { %v1903_v6 = vmul.f32 %v1899_v16, %v3973_v22 }
 0xaaa   : > { %v1905_v5 = vsub.f32 %v4167_v42, %v1903_v6  ;;  %v3494_v6 = vld [vmem:[%s4566_s22 + $0x38] sm:$0xff] }
 0xaab   : > { %2102 = vmatpush.bf16.msra.mxu1 %v3494_v6 }
 0xaac   : > { %v1907_v53 = vmul.f32 %v1905_v5, %v1905_v5 }
 0xaae   : > { %v1909_v54 = vsel %vm952_vm0, %v1907_v53, 0.0  ;;  %v3490_v53 = vld [vmem:[%s4566_s22 + $0x18] sm:$0xff] }
 0xaaf   : > { %1910 = vadd.xlane.f32.xlu0 %v1909_v54  ;;  %v1902_v4 = vpop.xlane.xlu0 %1901  ;;  %v1950_v49 = vpop.permute.xlu2 %1949  ;;  %2103 = vmatpush.bf16.msra.mxu1 %v3493_v51  ;;  %v1960_v54 = vld [vmem:[%s4565_s21] sm:$0x3] }
 0xab0   : > { %v1904_v55 = vmul.f32 %v1902_v4, %v3973_v22  ;;  %v3489_v4 = vld [vmem:[%s4566_s22 + $0x10] sm:$0xff] }
 0xab2   : > { %v1906_v56 = vsub.f32 %v4172_v48, %v1904_v55  ;;  %v1963_v55 = vperm.slane %v1960_v54, 1 }
 0xab4   : > { %v1908_v58 = vmul.f32 %v1906_v56, %v1906_v56 }
 0xab6   : > { %v1912_v60 = vsel %vm952_vm0, %v1908_v58, 0.0 }
 0xab7   : > { %1913 = vadd.xlane.f32.xlu0 %v1912_v60 }
 0xacb   : > { %1947 = vrot.lane.b32.xlu0 %v1204_v8, %s4621_s7 }
 0xb22   : > { %v1911_v2 = vpop.xlane.xlu0 %1910 }
 0xb23   : > { %v1915_v7 = vmul.f32 %v1911_v2, %v3973_v22 }
 0xb25   : > { %v1917_v17 = vadd.f32 1e-05, %v1915_v7 }
 0xb27   : > { %3616 = vrsqrt.f32 %v1917_v17  ;;  %vm1925_vm1 = vweird.f32 %v1917_v17 }
 0xb2a   : > { %v1914_v13 = vpop.xlane.xlu0 %1913 }
 0xb2b   : > { %v1916_v44 = vmul.f32 %v1914_v13, %v3973_v22 }
 0xb2d   : > { %v3617_v38 = vpop.eup %3616  ;;  %v1918_v21 = vadd.f32 1e-05, %v1916_v44 }
 0xb2e   : > { %v1920_v25 = vmul.f32 %v3617_v38, %v1917_v17  ;;  %vm1926_vm15 = vweird.f32 %v3617_v38 }
 0xb2f   : > { %3618 = vrsqrt.f32 %v1918_v21  ;;  %vm1927_vm2 = vmor %vm1925_vm1, %vm1926_vm15  ;;  %vm1935_vm5 = vweird.f32 %v1918_v21 }
 0xb30   : > { %v1921_v26 = vmul.f32 %v3617_v38, %v1920_v25 }
 0xb32   : > { %v1922_v27 = vmul.f32 0.5, %v1921_v26 }
 0xb34   : > { %v1923_v9 = vsub.f32 1.5, %v1922_v27 }
 0xb35   : > { %v3619_v28 = vpop.eup %3618 }
 0xb36   : > { %v1930_v29 = vmul.f32 %v3619_v28, %v1918_v21  ;;  %v1924_v30 = vmul.f32 %v3617_v38, %v1923_v9  ;;  %vm1936_vm3 = vweird.f32 %v3619_v28  ;;  %v1962_v21 = vperm.slane %v1960_v54, 0  ;;  %v3496_v54 = vld [vmem:[%s4557_s13 + $0x18] sm:$0xff] }
 0xb37   : > { %vm1937_vm6 = vmor %vm1935_vm5, %vm1936_vm3  ;;  %2213 = vmatpush.bf16.msrb.mxu2 %v3496_v54 }
 0xb38   : > { %v1931_v31 = vmul.f32 %v3619_v28, %v1930_v29  ;;  %v1928_v15 = vsel %vm1927_vm2, %v3617_v38, %v1924_v30 }
 0xb39   : > { %v1939_v35 = vmul.f32 %v1928_v15, %v1905_v5  ;;  %v3491_v5 = vld [vmem:[%s4566_s22 + $0x20] sm:$0xff] }
 0xb3a   : > { %v1932_v32 = vmul.f32 0.5, %v1931_v31 }
 0xb3b   : > { %v1943_v43 = vmul.f32 %v4183_v52, %v1939_v35  ;;  %v3492_v52 = vld [vmem:[%s4566_s22 + $0x28] sm:$0xff] }
 0xb3c   : > { %v1933_v33 = vsub.f32 1.5, %v1932_v32  ;;  %2104 = vmatpush.bf16.msra.mxu1 %v3492_v52 }
 0xb3d   : > { %v1948_v46 = vpop.permute.xlu0 %1947 }
 0xb3e   : > { %v1934_v36 = vmul.f32 %v3619_v28, %v1933_v33  ;;  %v1953_v8 = vadd.f32 %v1948_v46, %v1943_v43  ;;  %v3544_v33 = vld [vmem:[%s4567_s23] ss:$0 sm:$0xff] }
 0xb40   : > { %v1938_v37 = vsel %vm1937_vm6, %v3619_v28, %v1934_v36  ;;  %2105 = vmatpush.bf16.msra.mxu1 %v3491_v5 }
 0xb41   : > { %v1940_v41 = vmul.f32 %v1938_v37, %v1906_v56  ;;  %v3488_v56 = vld [vmem:[%s4566_s22 + $0x8] sm:$0xff] }
 0xb43   : > { %v1944_v47 = vmul.f32 %v4224_v39, %v1940_v41 }
 0xb44   : > { %2106 = vmatpush.bf16.msra.mxu1 %v3490_v53 }
 0xb45   : > { %v1954_v50 = vadd.f32 %v1950_v49, %v1944_v47 }
 0xb47   : > { %v1959_v16 = vpack.c.bf16 %v1954_v50, %v1953_v8 }
 0xb48   : > { %2107 = vmatpush.bf16.msra.mxu1 %v3489_v4 }
 0xb49   : > { %3284 = vmatmul.msk.bf16.vlgmr.msrb.gmra.mxu3 %vm952_vm0, %v1959_v16  ;;  %3285 = vmatmul.msk.bf16.vlgmr.msrb.gmra.mxu0 %vm952_vm0, %v1959_v16 }
 0xb4c   : > { %2108 = vmatpush.bf16.msra.mxu1 %v3488_v56 }
 0xb50   : > { %2109 = vmatpush.bf16.msra.mxu1 %v3487_v61 }
 0xbc6   : > { %v2012_v58 = vpop.f32.mrf.mxu0 }
 0xbc7   : > { %v2013_v60 = vadd.f32 %v2012_v58, %v1963_v55  ;;  %v3495_v58 = vld [vmem:[%s4557_s13 + $0x10] sm:$0xff] }
 0xbc8   : > { %2214 = vmatpush.bf16.msrb.mxu2 %v3495_v58  ;;  %v3679_v58 = vld [vmem:[%s4617_s9 + $0x8] sm:$0xff] }
 0xbc9   : > { %v2017_v62 = vmul.f32 %v2013_v60, %v2013_v60 }
 0xbcb   : > { %v2019_v63 = vmul.f32 %v2017_v62, %v2013_v60 }
 0xbcc   : > { %v1998_v18 = vpop.f32.mrf.mxu3 }
 0xbcd   : > { %v2021_v0 = vmul.f32 0.044715, %v2019_v63  ;;  %v1999_v28 = vadd.f32 %v1998_v18, %v1962_v21 }
 0xbce   : > { %v2014_v1 = vpop.f32.mrf.mxu0 }
 0xbcf   : > { %v2023_v2 = vadd.f32 %v2021_v0, %v2013_v60  ;;  %v2015_v3 = vadd.f32 %v2014_v1, %v1963_v55  ;;  %v2171_v0 = vpop.permute.xlu2 %2170 }
 0xbd1   : > { %v2025_v7 = vmul.f32 0.7978846, %v2023_v2  ;;  %v2018_v10 = vmul.f32 %v2015_v3, %v2015_v3 }
 0xbd3   : > { %3620 = vtanh.f32 %v2025_v7  ;;  %v2020_v12 = vmul.f32 %v2018_v10, %v2015_v3 }
 0xbd4   : > { %v2000_v26 = vpop.f32.mrf.mxu3 }
 0xbd5   : > { %v2022_v14 = vmul.f32 0.044715, %v2020_v12  ;;  %v2001_v29 = vadd.f32 %v2000_v26, %v1962_v21 }
 0xbd7   : > { %v2024_v17 = vadd.f32 %v2022_v14, %v2015_v3 }
 0xbd9   : > { %v3621_v11 = vpop.eup %3620  ;;  %v2026_v20 = vmul.f32 0.7978846, %v2024_v17  ;;  %v2179_v17 = vpop.permute.xlu2 %2178 }
 0xbda   : > { %v2029_v13 = vadd.f32 1.0, %v3621_v11 }
 0xbdb   : > { %3622 = vtanh.f32 %v2026_v20 }
 0xbdc   : > { %v2031_v44 = vmul.f32 0.5, %v2029_v13 }
 0xbde   : > { %v2033_v27 = vmul.f32 %v2031_v44, %v2013_v60 }
 0xbe0   : > { %v2035_v31 = vmul.f32 %v2033_v27, %v1999_v28 }
 0xbe1   : > { %v3623_v38 = vpop.eup %3622 }
 0xbe2   : > { %v2030_v25 = vadd.f32 1.0, %v3623_v38 }
 0xbe4   : > { %v2032_v9 = vmul.f32 0.5, %v2030_v25 }
 0xbe6   : > { %v2034_v30 = vmul.f32 %v2032_v9, %v2015_v3  ;;  %v2181_v9 = vpop.permute.xlu2 %2180 }
 0xbe8   : > { %v2036_v32 = vmul.f32 %v2034_v30, %v2001_v29 }
 0xbea   : > { %v2053_v15 = vpack.c.bf16 %v2036_v32, %v2035_v31 }
 0xbec   : > { %2110 = vmatmul.bf16.vlgmr.msra.gmra.mxu1 %v2053_v15 }
 0xc69   : > { %v2111_v35 = vpop.f32.mrf.mxu1 }
 0xc6a   : > { %v2116_v36 = vadd.f32 %v2111_v35, %v4167_v42 }
 0xc6c   : > { %v4261_v37 = vadd.f32 %v3544_v33, %v2116_v36  ;;  %v4292_v36 = vld [vmem:[%s4571_s27] ss:$0 sm:$0xff] }
 0xc6e   : > { %v2124_v41 = vsel %vm952_vm0, %v4261_v37, 0.0 }
 0xc6f   : > { %2125 = vadd.xlane.f32.xlu1 %v2124_v41 }
 0xc71   : > { %v2113_v43 = vpop.f32.mrf.mxu1 }
 0xc72   : > { %v2117_v46 = vadd.f32 %v2113_v43, %v4172_v48  ;;  %v4298_v43 = vld [vmem:[%s4571_s27 + $0x1] ss:$0 sm:$0xff] }
 0xc74   : > { %v4266_v47 = vadd.f32 %v3544_v33, %v2117_v46 }
 0xc76   : > { %v2127_v49 = vsel %vm952_vm0, %v4266_v47, 0.0 }
 0xc77   : > { %2128 = vadd.xlane.f32.xlu0 %v2127_v49 }
 0xce2   : > { %v2126_v50 = vpop.xlane.xlu1 %2125 }
 0xce3   : > { %v2130_v8 = vmul.f32 %v2126_v50, %v3973_v22 }
 0xce5   : > { %v2132_v42 = vsub.f32 %v4261_v37, %v2130_v8 }
 0xce7   : > { %v2134_v16 = vmul.f32 %v2132_v42, %v2132_v42 }
 0xce9   : > { %v2136_v6 = vsel %vm952_vm0, %v2134_v16, 0.0 }
 0xcea   : > { %2137 = vadd.xlane.f32.xlu1 %v2136_v6  ;;  %v2129_v51 = vpop.xlane.xlu0 %2128 }
 0xceb   : > { %v2131_v52 = vmul.f32 %v2129_v51, %v3973_v22 }
 0xced   : > { %v2133_v48 = vsub.f32 %v4266_v47, %v2131_v52 }
 0xcef   : > { %v2135_v5 = vmul.f32 %v2133_v48, %v2133_v48 }
 0xcf1   : > { %v2139_v53 = vsel %vm952_vm0, %v2135_v5, 0.0 }
 0xcf2   : > { %2140 = vadd.xlane.f32.xlu1 %v2139_v53 }
 0xd0b   : > { %2172 = vrot.lane.b32.xlu1 %v4224_v39, %s4622_s6 }
 0xd5d   : > { %v2138_v4 = vpop.xlane.xlu1 %2137 }
 0xd5e   : > { %v2142_v55 = vmul.f32 %v2138_v4, %v3973_v22 }
 0xd60   : > { %v2144_v56 = vadd.f32 1e-05, %v2142_v55 }
 0xd62   : > { %3624 = vrsqrt.f32 %v2144_v56  ;;  %vm2152_vm8 = vweird.f32 %v2144_v56 }
 0xd65   : > { %v2141_v60 = vpop.xlane.xlu1 %2140 }
 0xd66   : > { %v2143_v61 = vmul.f32 %v2141_v60, %v3973_v22 }
 0xd68   : > { %v3625_v62 = vpop.eup %3624  ;;  %v2145_v39 = vadd.f32 1e-05, %v2143_v61 }
 0xd69   : > { %v2147_v63 = vmul.f32 %v3625_v62, %v2144_v56  ;;  %vm2153_vm7 = vweird.f32 %v3625_v62 }
 0xd6a   : > { %3626 = vrsqrt.f32 %v2145_v39  ;;  %vm2154_vm9 = vmor %vm2152_vm8, %vm2153_vm7  ;;  %vm2162_vm12 = vweird.f32 %v2145_v39 }
 0xd6b   : > { %v2148_v1 = vmul.f32 %v3625_v62, %v2147_v63 }
 0xd6d   : > { %v2149_v2 = vmul.f32 0.5, %v2148_v1 }
 0xd6f   : > { %v2150_v3 = vsub.f32 1.5, %v2149_v2 }
 0xd70   : > { %v3627_v7 = vpop.eup %3626 }
 0xd71   : > { %v2151_v10 = vmul.f32 %v3625_v62, %v2150_v3  ;;  %v2157_v12 = vmul.f32 %v3627_v7, %v2145_v39  ;;  %vm2163_vm10 = vweird.f32 %v3627_v7 }
 0xd72   : > { %vm2164_vm15 = vmor %vm2162_vm12, %vm2163_vm10 }
 0xd73   : > { %v2158_v14 = vmul.f32 %v3627_v7, %v2157_v12  ;;  %v2155_v11 = vsel %vm2154_vm9, %v3625_v62, %v2151_v10 }
 0xd74   : > { %v2166_v13 = vmul.f32 %v2155_v11, %v2132_v42 }
 0xd75   : > { %v2159_v18 = vmul.f32 0.5, %v2158_v14 }
 0xd76   : > { %v2176_v25 = vmul.f32 %v2171_v0, %v2166_v13 }
 0xd77   : > { %v2160_v20 = vsub.f32 1.5, %v2159_v18 }
 0xd78   : > { %v2184_v28 = vadd.f32 %v2179_v17, %v2176_v25 }
 0xd79   : > { %v2161_v44 = vmul.f32 %v3627_v7, %v2160_v20 }
 0xd7b   : > { %v2165_v38 = vsel %vm2164_vm15, %v3627_v7, %v2161_v44 }
 0xd7c   : > { %v2167_v21 = vmul.f32 %v2165_v38, %v2133_v48  ;;  %v3678_v48 = vld [vmem:[%s4617_s9] sm:$0xff] }
 0xd7d   : > { %v2173_v26 = vpop.permute.xlu1 %2172 }
 0xd7e   : > { %v2177_v27 = vmul.f32 %v2173_v26, %v2167_v21 }
 0xd80   : > { %v2185_v29 = vadd.f32 %v2181_v9, %v2177_v27 }
 0xd82   : > { %v2191_v30 = vpack.c.bf16 %v2185_v29, %v2184_v28 }
 0xd84   : > { %3330 = vmatmul.msk.bf16.vlgmr.msrb.gmra.mxu2 %vm952_vm0, %v2191_v30 }
 0xe07   : > { %v2216_v31 = vpop.f32.mrf.mxu2 }
 0xe08   : > { %v2226_v49 = vmul.f32 %v4292_v36, %v2216_v31  ;;  %v2304_v50 = vmul.f32 %v4298_v43, %v2216_v31  ;;  %v2347_v39 = vmul.f32 %v2216_v31, %v4033_v34  ;;  %v2276_v10 = vmul.f32 %v2216_v31, %v4039_v45 }
 0xe0f   : > { %v2218_v32 = vpop.f32.mrf.mxu2 }
 0xe10   : > { %v2229_v15 = vpack.c.bf16 %v2218_v32, %v2216_v31  ;;  %v2227_v41 = vmul.f32 %v4292_v36, %v2218_v32  ;;  %v2305_v46 = vmul.f32 %v4298_v43, %v2218_v32  ;;  %v2348_v62 = vmul.f32 %v2218_v32, %v4033_v34 }
 0xe11   : > { %v2277_v7 = vmul.f32 %v2218_v32, %v4039_v45 }
 0xe12   : > { %2231 = vrot.lane.b32.xlu2 %v2229_v15, %s4621_s7  ;;  %v2228_v8 = vpack.c.bf16 %v2227_v41, %v2226_v49  ;;  %v2306_v42 = vpack.c.bf16 %v2305_v46, %v2304_v50  ;;  %v2349_v63 = vpack.c.bf16 %v2348_v62, %v2347_v39  ;;  %v3498_v46 = vld [vmem:[%s4558_s14 + $0x18] sm:$0xff]  ;;  %v3497_v49 = vld [vmem:[%s4558_s14 + $0x10] sm:$0xff] }
 0xe13   : > { %v2278_v12 = vpack.c.bf16 %v2277_v7, %v2276_v10 }
 0xe6c   : > { %v2232_v33 = vpop.permute.xlu2 %2231 }
 0xe6d   : > { %v2237_v35 = vsel %vm952_vm0, %v2232_v33, 0 }
 0xe6e   : > { %2246 = vmatpush.bf16.xpose.msra.mxu3 %v2237_v35  ;;  %2317 = vmatpush.bf16.xpose.msra.mxu2 %v2237_v35 }
 0xe75   : > { %3335 = vmatmul.msk.bf16.vlgmr.msra.gmra.mxu3 %vm952_vm0, %v2228_v8  ;;  %3337 = vmatmul.msk.bf16.vlgmr.msra.gmra.mxu2 %vm952_vm0, %v2306_v42 }
 0xef8   : > { %v2248_v16 = vpop.f32.mrf.mxu3  ;;  %v2319_v6 = vpop.f32.mrf.mxu2 }
 0xef9   : > { %v2253_v51 = vmul.f32 0.25, %v2248_v16  ;;  %v2324_v52 = vmul.f32 0.25, %v2319_v6 }
 0xefb   : > { %v2326_v5 = vadd.f32 %v3678_v48, %v2324_v52  ;;  %v2255_v53 = vadd.f32 %v3678_v48, %v2253_v51 }
 0xefd   : > { %v2328_v54 = vsel %vm1433_vm4, %v2326_v5, -inf  ;;  %v2257_v4 = vsel %vm1433_vm4, %v2255_v53, -inf }
 0xefe   : > { %2329 = vmax.xlane.f32.xlu0 %v2328_v54  ;;  %2258 = vmax.xlane.f32.xlu2 %v2257_v4 }
 0xf00   : > { %v2321_v55 = vpop.f32.mrf.mxu2  ;;  %v2250_v0 = vpop.f32.mrf.mxu3 }
 0xf01   : > { %v2325_v56 = vmul.f32 0.25, %v2321_v55  ;;  %v2254_v1 = vmul.f32 0.25, %v2250_v0  ;;  %v3545_v0 = vld [vmem:[%s4559_s15 + $0x1] ss:$0 sm:$0xff] }
 0xf03   : > { %v2327_v60 = vadd.f32 %v3679_v58, %v2325_v56  ;;  %v2256_v2 = vadd.f32 %v3679_v58, %v2254_v1 }
 0xf05   : > { %v2331_v61 = vsel %vm1433_vm4, %v2327_v60, -inf  ;;  %v2260_v3 = vsel %vm1433_vm4, %v2256_v2, -inf }
 0xf06   : > { %2332 = vmax.xlane.f32.xlu1 %v2331_v61 }
 0xf12   : > { %2351 = vrot.lane.b32.xlu0 %v2349_v63, %s4622_s6 }
 0xf3c   : > { %2261 = vmax.xlane.f32.xlu0 %v2260_v3 }
 0xf50   : > { %2280 = vrot.lane.b32.xlu0 %v2278_v12, %s4622_s6 }
 0xf71   : > { %v2330_v14 = vpop.xlane.xlu0 %2329  ;;  %v2259_v17 = vpop.xlane.xlu2 %2258 }
 0xf72   : > { %v2334_v11 = vsub.f32 %v2326_v5, %v2330_v14  ;;  %v2263_v34 = vsub.f32 %v2255_v53, %v2259_v17 }
 0xf74   : > { %v2336_v18 = vmul.f32 1.442695, %v2334_v11  ;;  %v2265_v20 = vmul.f32 1.442695, %v2263_v34 }
 0xf76   : > { %3628 = vpow2.f32 %v2336_v18 }
 0xf77   : > { %3630 = vpow2.f32 %v2265_v20 }
 0xf79   : > { %v2333_v13 = vpop.xlane.xlu1 %2332 }
 0xf7a   : > { %v2335_v44 = vsub.f32 %v2327_v60, %v2333_v13 }
 0xf7c   : > { %v3629_v38 = vpop.eup %3628  ;;  %v2338_v21 = vmul.f32 1.442695, %v2335_v44 }
 0xf7d   : > { %v3631_v25 = vpop.eup %3630  ;;  %v2340_v26 = vsel %vm1433_vm4, %v3629_v38, 0.0 }
 0xf7e   : > { %3632 = vpow2.f32 %v2338_v21  ;;  %2341 = vadd.xlane.f32.xlu2 %v2340_v26  ;;  %v2269_v45 = vsel %vm1433_vm4, %v3631_v25, 0.0 }
 0xf7f   : > { %2270 = vadd.xlane.f32.xlu1 %v2269_v45 }
 0xf84   : > { %v3633_v27 = vpop.eup %3632  ;;  %v2352_v9 = vpop.permute.xlu0 %2351 }
 0xf85   : > { %v2346_v28 = vpack.c.bf16 %v3633_v27, %v3629_v38  ;;  %2364 = vmatpush.bf16.msrb.mxu3 %v2352_v9  ;;  %v2343_v29 = vsel %vm1433_vm4, %v3633_v27, 0.0 }
 0xf87   : > { %2344 = vadd.xlane.f32.xlu1 %v2343_v29 }
 0xf88   : > { %3338 = vmatmul.msk.bf16.vlgmr.msrb.gmra.mxu3 %vm1433_vm4, %v2346_v28 }
 0xfaf   : > { %v2262_v30 = vpop.xlane.xlu0 %2261 }
 0xfb0   : > { %v2264_v31 = vsub.f32 %v2256_v2, %v2262_v30 }
 0xfb2   : > { %v2267_v32 = vmul.f32 1.442695, %v2264_v31 }
 0xfb4   : > { %3634 = vpow2.f32 %v2267_v32 }
 0xfba   : > { %v3635_v15 = vpop.eup %3634 }
 0xfbb   : > { %v2272_v33 = vsel %vm1433_vm4, %v3635_v15, 0.0  ;;  %v2275_v41 = vpack.c.bf16 %v3635_v15, %v3631_v25  ;;  %v3680_v25 = vld [vmem:[%s4616_s10] sm:$0x7] }
 0xfbc   : > { %2273 = vadd.xlane.f32.xlu0 %v2272_v33  ;;  %v1141_v26 = vperm.slane %v3680_v25, 2 }
 0xfbe   : > { %v4360_v45 = vadd.f32 %v4024_v23, %v1141_v26  ;;  %v4365_v27 = vadd.f32 %v4026_v24, %v1141_v26  ;;  %v3500_v23 = vld [vmem:[%s4560_s16 + $0x18] sm:$0xff]  ;;  %v3499_v24 = vld [vmem:[%s4560_s16 + $0x10] sm:$0xff] }
 0xfbf   : > { %2501 = vmatpush.bf16.msrb.mxu1 %v3500_v23 }
 0xfc2   : > { %v2281_v35 = vpop.permute.xlu0 %2280 }
 0xfc3   : > { %2293 = vmatpush.bf16.msra.mxu0 %v2281_v35  ;;  %2502 = vmatpush.bf16.msrb.mxu1 %v3499_v24 }
 0xfc6   : > { %3336 = vmatmul.msk.bf16.vlgmr.msra.gmra.mxu0 %vm1433_vm4, %v2275_v41 }
 0xfc7   : > { %2399 = vmatpush.bf16.msrb.mxu0 %v3498_v46 }
 0xfcb   : > { %2400 = vmatpush.bf16.msrb.mxu0 %v3497_v49 }
 0xfd0   : > { %2518 = vrot.lane.b32.xlu0 %v4079_v59, %s4622_s6 }
 0xff1   : > { %v2342_v42 = vpop.xlane.xlu2 %2341 }
 0xff2   : > { %v2271_v50 = vpop.xlane.xlu1 %2270  ;;  %3636 = vrcp.f32 %v2342_v42 }
 0xff3   : > { %3638 = vrcp.f32 %v2271_v50 }
 0xff8   : > { %v3637_v48 = vpop.eup %3636 }
 0xff9   : > { %v3639_v5 = vpop.eup %3638 }
 0xffa   : > { %v2345_v6 = vpop.xlane.xlu1 %2344 }
 0xffb   : > { %3640 = vrcp.f32 %v2345_v6 }
0x1001   : > { %v3641_v54 = vpop.eup %3640 }
0x100b   : > { %v2366_v16 = vpop.f32.mrf.mxu3 }
0x100c   : > { %v2373_v58 = vmul.f32 %v3637_v48, %v2366_v16  ;;  %v4382_v48 = vadd.f32 1.0, %v4360_v45 }
0x1013   : > { %v2368_v53 = vpop.f32.mrf.mxu3 }
0x1014   : > { %v2374_v60 = vmul.f32 %v3641_v54, %v2368_v53 }
0x102f   : > { %v2274_v8 = vpop.xlane.xlu0 %2273 }
0x1030   : > { %3642 = vrcp.f32 %v2274_v8 }
0x1036   : > { %v3643_v55 = vpop.eup %3642 }
0x1042   : > { %v2519_v51 = vpop.permute.xlu0 %2518 }
0x1043   : > { %v2524_v59 = vsel %vm952_vm0, %v2519_v51, 0  ;;  %v2295_v52 = vpop.f32.mrf.mxu0 }
0x1044   : > { %2533 = vmatpush.bf16.xpose.msrb.mxu2 %v2524_v59  ;;  %2608 = vmatpush.bf16.xpose.msra.mxu0 %v2524_v59  ;;  %v2302_v4 = vmul.f32 %v3639_v5, %v2295_v52 }
0x1046   : > { %v2375_v62 = vadd.f32 %v2373_v58, %v2302_v4  ;;  %v4386_v4 = vadd.f32 1.0, %v4365_v27 }
0x104b   : > { %v2297_v56 = vpop.f32.mrf.mxu0 }
0x104c   : > { %v2303_v61 = vmul.f32 %v3643_v55, %v2297_v56 }
0x104e   : > { %v2376_v39 = vadd.f32 %v2374_v60, %v2303_v61 }
0x1050   : > { %v2377_v63 = vpack.c.bf16 %v2376_v39, %v2375_v62 }
0x1052   : > { %3347 = vmatmul.msk.bf16.vlgmr.msrb.gmra.mxu0 %vm952_vm0, %v2377_v63 }
0x10cf   : > { %v2402_v1 = vpop.f32.mrf.mxu0 }
0x10d0   : > { %v2407_v2 = vadd.f32 %v2402_v1, %v4261_v37 }
0x10d2   : > { %v4341_v3 = vadd.f32 %v3545_v0, %v2407_v2 }
0x10d4   : > { %v2416_v7 = vsel %vm952_vm0, %v4341_v3, 0.0 }
0x10d5   : > { %2417 = vadd.xlane.f32.xlu2 %v2416_v7 }
0x10d7   : > { %v2404_v10 = vpop.f32.mrf.mxu0 }
0x10d8   : > { %v2408_v12 = vadd.f32 %v2404_v10, %v4266_v47 }
0x10da   : > { %v4346_v14 = vadd.f32 %v3545_v0, %v2408_v12 }
0x10dc   : > { %v2419_v17 = vsel %vm952_vm0, %v4346_v14, 0.0 }
0x10dd   : > { %2420 = vadd.xlane.f32.xlu1 %v2419_v17 }
0x1148   : > { %v2418_v11 = vpop.xlane.xlu2 %2417 }
0x1149   : > { %v2422_v34 = vmul.f32 %v2418_v11, %v3973_v22 }
0x114b   : > { %v2424_v37 = vsub.f32 %v4341_v3, %v2422_v34 }
0x114d   : > { %v2426_v18 = vmul.f32 %v2424_v37, %v2424_v37 }
0x114f   : > { %v2428_v20 = vsel %vm952_vm0, %v2426_v18, 0.0 }
0x1150   : > { %2429 = vadd.xlane.f32.xlu2 %v2428_v20  ;;  %v2421_v13 = vpop.xlane.xlu1 %2420 }
0x1151   : > { %v2423_v44 = vmul.f32 %v2421_v13, %v3973_v22 }
0x1153   : > { %v2425_v47 = vsub.f32 %v4346_v14, %v2423_v44 }
0x1155   : > { %v2427_v38 = vmul.f32 %v2425_v47, %v2425_v47 }
0x1157   : > { %v2431_v21 = vsel %vm952_vm0, %v2427_v38, 0.0 }
0x1158   : > { %2432 = vadd.xlane.f32.xlu1 %v2431_v21 }
0x1168   : > { %2466 = vrot.lane.b32.xlu2 %v4360_v45, %s4621_s7 }
0x1170   : > { %2563 = vrot.lane.b32.xlu2 %v4292_v36, %s4621_s7 }
0x1171   : > { %2468 = vrot.lane.b32.xlu1 %v4365_v27, %s4621_s7 }
0x1179   : > { %2638 = vrot.lane.b32.xlu1 %v4298_v43, %s4621_s7  ;;  %s4623_s7 = smov 32  }
0x11c3   : > { %v2430_v9 = vpop.xlane.xlu2 %2429 }
0x11c4   : > { %v2434_v28 = vmul.f32 %v2430_v9, %v3973_v22 }
0x11c6   : > { %v2436_v29 = vadd.f32 1e-05, %v2434_v28 }
0x11c8   : > { %3644 = vrsqrt.f32 %v2436_v29  ;;  %vm2444_vm1 = vweird.f32 %v2436_v29 }
0x11cb   : > { %v2433_v30 = vpop.xlane.xlu1 %2432  ;;  %v2467_v56 = vpop.permute.xlu2 %2466 }
0x11cc   : > { %v2435_v31 = vmul.f32 %v2433_v30, %v3973_v22 }
0x11ce   : > { %v3645_v32 = vpop.eup %3644  ;;  %v2437_v15 = vadd.f32 1e-05, %v2435_v31 }
0x11cf   : > { %v2439_v33 = vmul.f32 %v3645_v32, %v2436_v29  ;;  %vm2445_vm4 = vweird.f32 %v3645_v32 }
0x11d0   : > { %3646 = vrsqrt.f32 %v2437_v15  ;;  %vm2446_vm2 = vmor %vm2444_vm1, %vm2445_vm4  ;;  %vm2454_vm5 = vweird.f32 %v2437_v15 }
0x11d1   : > { %v2440_v35 = vmul.f32 %v3645_v32, %v2439_v33 }
0x11d3   : > { %v2441_v41 = vmul.f32 0.5, %v2440_v35  ;;  %v2564_v29 = vpop.permute.xlu2 %2563 }
0x11d4   : > { %v2566_v24 = vmul.f32 %v2564_v29, %v4075_v40 }
0x11d5   : > { %v2442_v46 = vsub.f32 1.5, %v2441_v41 }
0x11d6   : > { %v3647_v49 = vpop.eup %3646  ;;  %v2567_v30 = vpack.c.bf16 %v2566_v24, %v2566_v24 }
0x11d7   : > { %v2443_v50 = vmul.f32 %v3645_v32, %v2442_v46  ;;  %v2449_v8 = vmul.f32 %v3647_v49, %v2437_v15  ;;  %vm2455_vm3 = vweird.f32 %v3647_v49 }
0x11d8   : > { %vm2456_vm6 = vmor %vm2454_vm5, %vm2455_vm3 }
0x11d9   : > { %v2450_v42 = vmul.f32 %v3647_v49, %v2449_v8  ;;  %v2447_v16 = vsel %vm2446_vm2, %v3645_v32, %v2443_v50 }
0x11da   : > { %v2458_v59 = vmul.f32 %v2447_v16, %v2424_v37 }
0x11db   : > { %v2451_v6 = vmul.f32 0.5, %v2450_v42 }
0x11dc   : > { %v2462_v53 = vmul.f32 %v4382_v48, %v2458_v59 }
0x11dd   : > { %v2452_v51 = vsub.f32 1.5, %v2451_v6 }
0x11de   : > { %v2472_v60 = vadd.f32 %v2467_v56, %v2462_v53 }
0x11df   : > { %v2453_v52 = vmul.f32 %v3647_v49, %v2452_v51 }
0x11e1   : > { %v2457_v5 = vsel %vm2456_vm6, %v3647_v49, %v2453_v52 }
0x11e2   : > { %v2459_v54 = vmul.f32 %v2457_v5, %v2425_v47 }
0x11e3   : > { %v2469_v58 = vpop.permute.xlu1 %2468 }
0x11e4   : > { %v2463_v55 = vmul.f32 %v4386_v4, %v2459_v54 }
0x11e6   : > { %v2473_v61 = vadd.f32 %v2469_v58, %v2463_v55 }
0x11e8   : > { %v2479_v62 = vpack.c.bf16 %v2473_v61, %v2472_v60 }
0x11ea   : > { %3361 = vmatmul.msk.bf16.vlgmr.msrb.gmra.mxu1 %vm952_vm0, %v2479_v62  ;;  %v3502_v62 = vld [vmem:[%s4562_s18 + $0x18] sm:$0xff] }
0x11eb   : > { %v2639_v9 = vpop.permute.xlu1 %2638  ;;  %2694 = vmatpush.bf16.msra.mxu2 %v3502_v62 }
0x11ec   : > { %v2641_v28 = vmul.f32 %v2639_v9, %v4075_v40 }
0x1267   : > { %v2504_v39 = vpop.f32.mrf.mxu1 }
0x1268   : > { %v2514_v0 = vmul.f32 %v4292_v36, %v2504_v39  ;;  %v2595_v1 = vmul.f32 %v4298_v43, %v2504_v39 }
0x126f   : > { %v2506_v63 = vpop.f32.mrf.mxu1 }
0x1270   : > { %v2515_v2 = vmul.f32 %v4292_v36, %v2506_v63  ;;  %v2596_v7 = vmul.f32 %v4298_v43, %v2506_v63 }
0x1272   : > { %v2516_v10 = vpack.c.bf16 %v2515_v2, %v2514_v0  ;;  %v2597_v12 = vpack.c.bf16 %v2596_v7, %v2595_v1 }
0x1274   : > { %3366 = vmatmul.msk.bf16.vlgmr.msrb.gmra.mxu2 %vm952_vm0, %v2516_v10  ;;  %3368 = vmatmul.msk.bf16.vlgmr.msra.gmra.mxu0 %vm952_vm0, %v2597_v12 }
0x12f1   : > { %v2610_v17 = vpop.f32.mrf.mxu0 }
0x12f2   : > { %v2615_v11 = vmul.f32 0.25, %v2610_v17 }
0x12f4   : > { %v2617_v34 = vadd.f32 %v2615_v11, %v4129_v19 }
0x12f6   : > { %v2619_v37 = vsel %vm1729_vm13, %v2617_v34, -inf }
0x12f7   : > { %2620 = vmax.xlane.f32.xlu1 %v2619_v37  ;;  %v2535_v18 = vpop.f32.mrf.mxu2 }
0x12f8   : > { %v2540_v20 = vmul.f32 0.25, %v2535_v18 }
0x12f9   : > { %v2612_v13 = vpop.f32.mrf.mxu0 }
0x12fa   : > { %v2542_v36 = vadd.f32 %v2540_v20, %v4129_v19  ;;  %v2616_v44 = vmul.f32 0.25, %v2612_v13  ;;  %v2642_v19 = vpack.c.bf16 %v2641_v28, %v2641_v28 }
0x12fc   : > { %v2544_v43 = vsel %vm1729_vm13, %v2542_v36, -inf  ;;  %v2618_v21 = vadd.f32 %v2616_v44, %v4138_v57 }
0x12fd   : > { %2545 = vmax.xlane.f32.xlu2 %v2544_v43 }
0x12fe   : > { %v2622_v26 = vsel %vm1729_vm13, %v2618_v21, -inf }
0x12ff   : > { %v2537_v47 = vpop.f32.mrf.mxu2 }
0x1300   : > { %v2541_v38 = vmul.f32 0.25, %v2537_v47 }
0x1302   : > { %v2543_v25 = vadd.f32 %v2541_v38, %v4138_v57  ;;  %v3546_v38 = vld [vmem:[%s4563_s19 + $0x1] ss:$0 sm:$0xff] }
0x1304   : > { %v2547_v23 = vsel %vm1729_vm13, %v2543_v25, -inf }
0x1305   : > { %2623 = vmax.xlane.f32.xlu2 %v2622_v26  ;;  %2548 = vmax.xlane.f32.xlu0 %v2547_v23 }
0x1310   : > { %2644 = vrot.lane.b32.xlu1 %v2642_v19, %s4623_s7 }
0x1319   : > { %2569 = vrot.lane.b32.xlu0 %v2567_v30, %s4623_s7 }
0x136a   : > { %v2621_v31 = vpop.xlane.xlu1 %2620 }
0x136b   : > { %v2625_v57 = vsub.f32 %v2617_v34, %v2621_v31 }
0x136d   : > { %v2627_v32 = vmul.f32 1.442695, %v2625_v57 }
0x136f   : > { %3648 = vpow2.f32 %v2627_v32 }
0x1370   : > { %v2546_v15 = vpop.xlane.xlu2 %2545 }
0x1371   : > { %v2550_v33 = vsub.f32 %v2542_v36, %v2546_v15 }
0x1373   : > { %v2552_v35 = vmul.f32 1.442695, %v2550_v33 }
0x1375   : > { %v3649_v41 = vpop.eup %3648  ;;  %3650 = vpow2.f32 %v2552_v35  ;;  %v3395_v35 = vld [vmem:[%s4564_s20 + $0x30] sm:$0xf] }
0x1376   : > { %v2631_v46 = vsel %vm1729_vm13, %v3649_v41, 0.0 }
0x1377   : > { %2632 = vadd.xlane.f32.xlu0 %v2631_v46  ;;  %v3505_v46 = vld [vmem:[%s4564_s20 + $0x34] sm:$0xf] }
0x1378   : > { %v2624_v49 = vpop.xlane.xlu2 %2623  ;;  %v2549_v50 = vpop.xlane.xlu0 %2548 }
0x1379   : > { %v2626_v8 = vsub.f32 %v2618_v21, %v2624_v49  ;;  %v2551_v42 = vsub.f32 %v2543_v25, %v2549_v50  ;;  %v3397_v50 = vld [vmem:[%s4564_s20 + $0x38] sm:$0xf0] }
0x137b   : > { %v3651_v40 = vpop.eup %3650  ;;  %v2629_v16 = vmul.f32 1.442695, %v2626_v8  ;;  %v2554_v6 = vmul.f32 1.442695, %v2551_v42 }
0x137c   : > { %v2556_v51 = vsel %vm1729_vm13, %v3651_v40, 0.0 }
0x137d   : > { %3652 = vpow2.f32 %v2629_v16  ;;  %2557 = vadd.xlane.f32.xlu2 %v2556_v51  ;;  %v3504_v16 = vld [vmem:[%s4564_s20 + $0x24] sm:$0xf0] }
0x137e   : > { %3654 = vpow2.f32 %v2554_v6  ;;  %v3503_v6 = vld [vmem:[%s4564_s20 + $0x24] sm:$0xf] }
0x1382   : > { %v2645_v59 = vpop.permute.xlu1 %2644 }
0x1383   : > { %v3653_v52 = vpop.eup %3652  ;;  %v2650_v5 = vsel %vm1760_vm14, %v2645_v59, 0 }
0x1384   : > { %v3655_v53 = vpop.eup %3654  ;;  %v2637_v54 = vpack.c.bf16 %v3653_v52, %v3649_v41  ;;  %2659 = vmatpush.bf16.msra.mxu1 %v2650_v5  ;;  %v2634_v60 = vsel %vm1729_vm13, %v3653_v52, 0.0  ;;  %v3506_v41 = vld [vmem:[%s4564_s20 + $0x34] sm:$0xf0]  ;;  %v3389_v52 = vld [vmem:[%s4564_s20 + $0x28] sm:$0xf0] }
0x1385   : > { %v2559_v55 = vsel %vm1729_vm13, %v3655_v53, 0.0  ;;  %v2562_v61 = vpack.c.bf16 %v3655_v53, %v3651_v40  ;;  %v3396_v49 = vor.u32 %v3506_v41, %v3395_v35  ;;  %v3387_v40 = vld [vmem:[%s4564_s20 + $0x20] sm:$0xf]  ;;  %v3392_v5 = vor.u32 %v3503_v6, %v3389_v52 }
0x1386   : > { %2560 = vadd.xlane.f32.xlu2 %v2559_v55  ;;  %v3388_v59 = vor.u32 %v3504_v16, %v3387_v40 }
0x1387   : > { %3369 = vmatmul.msk.bf16.vlgmr.msra.gmra.mxu1 %vm1729_vm13, %v2637_v54 }
0x138b   : > { %2759 = vrot.lane.b32.xlu0 %v4386_v4, %s4622_s6  ;;  %v2570_v56 = vpop.permute.xlu0 %2569  ;;  %v3501_v4 = vld [vmem:[%s4562_s18 + $0x10] sm:$0xff] }
0x138c   : > { %v2575_v58 = vsel %vm1760_vm14, %v2570_v56, 0  ;;  %2695 = vmatpush.bf16.msra.mxu2 %v3501_v4 }
0x138d   : > { %2584 = vmatpush.bf16.msra.mxu3 %v2575_v58 }
0x138e   : > { %2635 = vadd.xlane.f32.xlu2 %v2634_v60 }
0x1390   : > { %3367 = vmatmul.msk.bf16.vlgmr.msra.gmra.mxu3 %vm1729_vm13, %v2562_v61 }
0x1391   : > { %2815 = vmatpush.bf16.msrb.mxu3 %v3396_v49 }
0x1395   : > { %2816 = vmatpush.bf16.msrb.mxu3 %v3388_v59 }
0x13ea   : > { %v2633_v0 = vpop.xlane.xlu0 %2632 }
0x13eb   : > { %3656 = vrcp.f32 %v2633_v0 }
0x13f0   : > { %v2558_v39 = vpop.xlane.xlu2 %2557 }
0x13f1   : > { %3658 = vrcp.f32 %v2558_v39  ;;  %v3657_v10 = vpop.eup %3656 }
0x13f7   : > { %v3659_v12 = vpop.eup %3658 }
0x13f9   : > { %v2561_v63 = vpop.xlane.xlu2 %2560 }
0x13fa   : > { %3660 = vrcp.f32 %v2561_v63 }
0x1400   : > { %v3661_v11 = vpop.eup %3660 }
0x1401   : > { %v2636_v2 = vpop.xlane.xlu2 %2635 }
0x1402   : > { %3662 = vrcp.f32 %v2636_v2 }
0x1404   : > { %v2661_v1 = vpop.f32.mrf.mxu1 }
0x1405   : > { %v2668_v20 = vmul.f32 %v3657_v10, %v2661_v1 }
0x1408   : > { %v3663_v37 = vpop.eup %3662 }
0x140c   : > { %v2663_v17 = vpop.f32.mrf.mxu1 }
0x140d   : > { %v2669_v13 = vmul.f32 %v3663_v37, %v2663_v17  ;;  %v2760_v37 = vpop.permute.xlu0 %2759 }
0x1413   : > { %v2586_v7 = vpop.f32.mrf.mxu3 }
0x1414   : > { %v2593_v34 = vmul.f32 %v3659_v12, %v2586_v7 }
0x1416   : > { %v2670_v44 = vadd.f32 %v2668_v20, %v2593_v34 }
0x141b   : > { %v2588_v18 = vpop.f32.mrf.mxu3 }
0x141c   : > { %v2594_v36 = vmul.f32 %v3661_v11, %v2588_v18 }
0x141e   : > { %v2671_v43 = vadd.f32 %v2669_v13, %v2594_v36 }
0x1420   : > { %v2672_v47 = vpack.c.bf16 %v2671_v43, %v2670_v44 }
0x1422   : > { %3378 = vmatmul.msk.bf16.vlgmr.msra.gmra.mxu2 %vm952_vm0, %v2672_v47  ;;  %v3514_v47 = vld [vmem:[%s4566_s22 + $0x78] sm:$0xff] }
0x1423   : > { %2923 = vmatpush.bf16.msrb.mxu1 %v3514_v47  ;;  %v3515_v47 = vld [vmem:[%s4570_s26] sm:$0xff] }
0x14a5   : > { %v2697_v21 = vpop.f32.mrf.mxu2 }
0x14a6   : > { %v2702_v25 = vadd.f32 %v2697_v21, %v4341_v3  ;;  %v3512_v21 = vld [vmem:[%s4566_s22 + $0x68] sm:$0xff] }
0x14a8   : > { %v4429_v26 = vadd.f32 %v3546_v38, %v2702_v25  ;;  %v3511_v25 = vld [vmem:[%s4566_s22 + $0x60] sm:$0xff] }
0x14aa   : > { %v2711_v23 = vsel %vm952_vm0, %v4429_v26, 0.0 }
0x14ab   : > { %2712 = vadd.xlane.f32.xlu1 %v2711_v23  ;;  %v3510_v23 = vld [vmem:[%s4566_s22 + $0x58] sm:$0xff] }
0x14ad   : > { %v2699_v9 = vpop.f32.mrf.mxu2 }
0x14ae   : > { %v2703_v28 = vadd.f32 %v2699_v9, %v4346_v14  ;;  %v3384_v9 = vld [vmem:[%s4565_s21 + $0x2] sm:$0x3] }
0x14af   : > { %v2782_v6 = vperm.slane %v3384_v9, 0 }
0x14b0   : > { %v4434_v19 = vadd.f32 %v3546_v38, %v2703_v28  ;;  %v3513_v38 = vld [vmem:[%s4566_s22 + $0x70] sm:$0xff] }
0x14b1   : > { %2924 = vmatpush.bf16.msrb.mxu1 %v3513_v38  ;;  %v3509_v28 = vld [vmem:[%s4566_s22 + $0x50] sm:$0xff] }
0x14b2   : > { %v2714_v29 = vsel %vm952_vm0, %v4434_v19, 0.0 }
0x14b3   : > { %2715 = vadd.xlane.f32.xlu2 %v2714_v29  ;;  %v2783_v29 = vperm.slane %v3384_v9, 1  ;;  %v3681_v9 = vld [vmem:[%s3882_s1] sm:$0xff] }
0x14b5   : > { %2925 = vmatpush.bf16.msrb.mxu1 %v3512_v21  ;;  %v3698_v21 = vmov 2  }
0x14b6   : > { %3535 = vset.pattern.permute.xlu1 %v3698_v21 }
0x14b9   : > { %2926 = vmatpush.bf16.msrb.mxu1 %v3511_v25  ;;  %v3699_v25 = vmov 1  }
0x14ba   : > { %3534 = vset.pattern.permute.xlu0 %v3699_v25  ;;  %3533 = vset.pattern.permute.xlu2 %v3699_v25 }
0x14bd   : > { %2927 = vmatpush.bf16.msrb.mxu1 %v3510_v23 }
0x14c1   : > { %2928 = vmatpush.bf16.msrb.mxu1 %v3509_v28  ;;  %v3682_v28 = vld [vmem:[%s3882_s1 + $0x8] sm:$0xff] }
0x14c4   : > { %2765 = vrot.lane.b32.xlu1 %v4360_v45, %s4623_s7 }
0x14cb   : > { %2757 = vrot.lane.b32.xlu2 %v4382_v48, %s4622_s6 }
0x151e   : > { %v2713_v3 = vpop.xlane.xlu1 %2712 }
0x151f   : > { %v2717_v24 = vmul.f32 %v2713_v3, %v3973_v22  ;;  %v3508_v3 = vld [vmem:[%s4566_s22 + $0x48] sm:$0xff] }
0x1520   : > { %2929 = vmatpush.bf16.msrb.mxu1 %v3508_v3 }
0x1521   : > { %v2719_v30 = vsub.f32 %v4429_v26, %v2717_v24 }
0x1523   : > { %v2721_v31 = vmul.f32 %v2719_v30, %v2719_v30 }
0x1525   : > { %v2723_v14 = vsel %vm952_vm0, %v2721_v31, 0.0  ;;  %v3507_v31 = vld [vmem:[%s4566_s22 + $0x40] sm:$0xff] }
0x1526   : > { %2724 = vadd.xlane.f32.xlu2 %v2723_v14  ;;  %v2716_v57 = vpop.xlane.xlu2 %2715  ;;  %2930 = vmatpush.bf16.msrb.mxu1 %v3507_v31 }
0x1527   : > { %v2718_v32 = vmul.f32 %v2716_v57, %v3973_v22 }
0x1529   : > { %v2720_v15 = vsub.f32 %v4434_v19, %v2718_v32 }
0x152b   : > { %v2722_v33 = vmul.f32 %v2720_v15, %v2720_v15 }
0x152d   : > { %v2726_v45 = vsel %vm952_vm0, %v2722_v33, 0.0 }
0x152e   : > { %2727 = vadd.xlane.f32.xlu2 %v2726_v45  ;;  %v2758_v48 = vpop.permute.xlu2 %2757 }
0x1536   : > { %v2766_v20 = vpop.permute.xlu1 %2765 }
0x1546   : > { %2767 = vrot.lane.b32.xlu2 %v4365_v27, %s4623_s7  ;;  %v3400_v27 = vor.u32 %v3505_v46, %v3397_v50 }
0x1548   : > { %2829 = vmatpush.bf16.msrb.mxu0 %v3400_v27 }
0x154c   : > { %2830 = vmatpush.bf16.msrb.mxu0 %v3392_v5 }
0x1599   : > { %v2725_v8 = vpop.xlane.xlu2 %2724 }
0x159a   : > { %v2729_v42 = vmul.f32 %v2725_v8, %v3973_v22 }
0x159c   : > { %v2731_v51 = vadd.f32 1e-05, %v2729_v42 }
0x159e   : > { %3664 = vrsqrt.f32 %v2731_v51  ;;  %vm2739_vm14 = vweird.f32 %v2731_v51 }
0x15a1   : > { %v2728_v53 = vpop.xlane.xlu2 %2727 }
0x15a2   : > { %v2730_v54 = vmul.f32 %v2728_v53, %v3973_v22 }
0x15a4   : > { %v3665_v55 = vpop.eup %3664  ;;  %v2732_v56 = vadd.f32 1e-05, %v2730_v54 }
0x15a5   : > { %v2734_v58 = vmul.f32 %v3665_v55, %v2731_v51  ;;  %vm2740_vm13 = vweird.f32 %v3665_v55 }
0x15a6   : > { %3666 = vrsqrt.f32 %v2732_v56  ;;  %vm2741_vm7 = vmor %vm2739_vm14, %vm2740_vm13  ;;  %vm2749_vm9 = vweird.f32 %v2732_v56 }
0x15a7   : > { %v2735_v60 = vmul.f32 %v3665_v55, %v2734_v58 }
0x15a9   : > { %v2736_v61 = vmul.f32 0.5, %v2735_v60  ;;  %v2768_v13 = vpop.permute.xlu2 %2767 }
0x15ab   : > { %v2737_v62 = vsub.f32 1.5, %v2736_v61  ;;  %v3547_v61 = vld [vmem:[%s4567_s23 + $0x1] ss:$0 sm:$0xff] }
0x15ac   : > { %v3667_v39 = vpop.eup %3666 }
0x15ad   : > { %v2738_v4 = vmul.f32 %v3665_v55, %v2737_v62  ;;  %v2744_v63 = vmul.f32 %v3667_v39, %v2732_v56  ;;  %vm2750_vm8 = vweird.f32 %v3667_v39 }
0x15ae   : > { %vm2751_vm10 = vmor %vm2749_vm9, %vm2750_vm8 }
0x15af   : > { %v2745_v0 = vmul.f32 %v3667_v39, %v2744_v63  ;;  %v2742_v1 = vsel %vm2741_vm7, %v3665_v55, %v2738_v4 }
0x15b0   : > { %v2753_v10 = vmul.f32 %v2742_v1, %v2719_v30 }
0x15b1   : > { %v2746_v2 = vmul.f32 0.5, %v2745_v0 }
0x15b2   : > { %v2763_v34 = vmul.f32 %v2758_v48, %v2753_v10 }
0x15b3   : > { %v2747_v7 = vsub.f32 1.5, %v2746_v2 }
0x15b4   : > { %v2771_v36 = vadd.f32 %v2766_v20, %v2763_v34 }
0x15b5   : > { %v2748_v12 = vmul.f32 %v3667_v39, %v2747_v7 }
0x15b7   : > { %v2752_v17 = vsel %vm2751_vm10, %v3667_v39, %v2748_v12 }
0x15b8   : > { %v2754_v11 = vmul.f32 %v2752_v17, %v2720_v15 }
0x15ba   : > { %v2764_v18 = vmul.f32 %v2760_v37, %v2754_v11 }
0x15bc   : > { %v2772_v44 = vadd.f32 %v2768_v13, %v2764_v18 }
0x15be   : > { %v2778_v43 = vpack.c.bf16 %v2772_v44, %v2771_v36 }
0x15c0   : > { %3401 = vmatmul.msk.bf16.vlgmr.msrb.gmra.mxu3 %vm952_vm0, %v2778_v43  ;;  %3402 = vmatmul.msk.bf16.vlgmr.msrb.gmra.mxu0 %vm952_vm0, %v2778_v43 }
0x163d   : > { %v2832_v24 = vpop.f32.mrf.mxu0 }
0x163e   : > { %v2833_v30 = vadd.f32 %v2832_v24, %v2783_v29 }
0x1640   : > { %v2837_v14 = vmul.f32 %v2833_v30, %v2833_v30 }
0x1642   : > { %v2839_v57 = vmul.f32 %v2837_v14, %v2833_v30 }
0x1643   : > { %v2818_v8 = vpop.f32.mrf.mxu3 }
0x1644   : > { %v2841_v32 = vmul.f32 0.044715, %v2839_v57  ;;  %v2819_v53 = vadd.f32 %v2818_v8, %v2782_v6 }
0x1645   : > { %v2834_v15 = vpop.f32.mrf.mxu0 }
0x1646   : > { %v2843_v33 = vadd.f32 %v2841_v32, %v2833_v30  ;;  %v2835_v45 = vadd.f32 %v2834_v15, %v2783_v29 }
0x1648   : > { %v2845_v48 = vmul.f32 0.7978846, %v2843_v33  ;;  %v2838_v35 = vmul.f32 %v2835_v45, %v2835_v45 }
0x164a   : > { %3668 = vtanh.f32 %v2845_v48  ;;  %v2840_v41 = vmul.f32 %v2838_v35, %v2835_v45  ;;  %v3548_v35 = vld [vmem:[%s4568_s24] ss:$0 sm:$0xff] }
0x164b   : > { %v2820_v59 = vpop.f32.mrf.mxu3 }
0x164c   : > { %v2842_v46 = vmul.f32 0.044715, %v2840_v41  ;;  %v2821_v54 = vadd.f32 %v2820_v59, %v2782_v6 }
0x164e   : > { %v2844_v49 = vadd.f32 %v2842_v46, %v2835_v45 }
0x1650   : > { %v3669_v50 = vpop.eup %3668  ;;  %v2846_v27 = vmul.f32 0.7978846, %v2844_v49 }
0x1651   : > { %v2849_v42 = vadd.f32 1.0, %v3669_v50  ;;  %v3549_v50 = vld [vmem:[%s4569_s25] ss:$0 sm:$0xff] }
0x1652   : > { %3670 = vtanh.f32 %v2846_v27 }
0x1653   : > { %v2851_v40 = vmul.f32 0.5, %v2849_v42 }
0x1655   : > { %v2853_v52 = vmul.f32 %v2851_v40, %v2833_v30 }
0x1657   : > { %v2855_v56 = vmul.f32 %v2853_v52, %v2819_v53  ;;  %v3683_v52 = vld [vmem:[%s3946_s30] sm:$0xff] }
0x1658   : > { %v3671_v16 = vpop.eup %3670 }
0x1659   : > { %v2850_v51 = vadd.f32 1.0, %v3671_v16 }
0x165b   : > { %v2852_v5 = vmul.f32 0.5, %v2850_v51 }
0x165d   : > { %v2854_v55 = vmul.f32 %v2852_v5, %v2835_v45 }
0x165f   : > { %v2856_v58 = vmul.f32 %v2854_v55, %v2821_v54 }
0x1661   : > { %v2874_v60 = vpack.c.bf16 %v2856_v58, %v2855_v56 }
0x1663   : > { %2931 = vmatmul.bf16.vlgmr.msrb.gmra.mxu1 %v2874_v60  ;;  %v3684_v60 = vld [vmem:[%s3946_s30 + $0x8] sm:$0xff] }
0x16e0   : > { %v2932_v62 = vpop.f32.mrf.mxu1 }
0x16e1   : > { %v2937_v39 = vadd.f32 %v2932_v62, %v4429_v26 }
0x16e3   : > { %v2944_v4 = vadd.f32 %v3547_v61, %v2937_v39 }
0x16e5   : > { %v2946_v63 = vsel %vm952_vm0, %v2944_v4, 0.0 }
0x16e6   : > { %2947 = vadd.xlane.f32.xlu0 %v2946_v63 }
0x16e8   : > { %v2934_v0 = vpop.f32.mrf.mxu1 }
0x16e9   : > { %v2938_v1 = vadd.f32 %v2934_v0, %v4434_v19  ;;  %v3516_v19 = vld [vmem:[%s4570_s26 + $0x8] sm:$0xff] }
0x16ea   : > { %3028 = vmatpush.bf16.msrb.mxu2 %v3516_v19 }
0x16eb   : > { %v2945_v2 = vadd.f32 %v3547_v61, %v2938_v1 }
0x16ed   : > { %v2949_v7 = vsel %vm952_vm0, %v2945_v2, 0.0 }
0x16ee   : > { %2950 = vadd.xlane.f32.xlu2 %v2949_v7  ;;  %3029 = vmatpush.bf16.msrb.mxu2 %v3515_v47 }
0x1706   : > { %3037 = vperm.xlu2 %3533, %v3681_v9  }
0x170e   : > { %3536 = vset.pattern.permute.xlu2 %v3698_v21 }
0x170f   : > { %3051 = vperm.xlu2 %3536, %v3682_v28  }
0x1759   : > { %v2948_v10 = vpop.xlane.xlu0 %2947 }
0x175a   : > { %v2952_v12 = vmul.f32 %v2948_v10, %v3973_v22 }
0x175c   : > { %v2954_v17 = vsub.f32 %v2944_v4, %v2952_v12 }
0x175e   : > { %v2956_v11 = vmul.f32 %v2954_v17, %v2954_v17 }
0x1760   : > { %v2958_v34 = vsel %vm952_vm0, %v2956_v11, 0.0 }
0x1761   : > { %2959 = vadd.xlane.f32.xlu1 %v2958_v34  ;;  %v2951_v26 = vpop.xlane.xlu2 %2950 }
0x1762   : > { %v2953_v37 = vmul.f32 %v2951_v26, %v3973_v22 }
0x1764   : > { %v2955_v18 = vsub.f32 %v2945_v2, %v2953_v37 }
0x1766   : > { %v2957_v20 = vmul.f32 %v2955_v18, %v2955_v18 }
0x1768   : > { %v2961_v13 = vsel %vm952_vm0, %v2957_v20, 0.0 }
0x1769   : > { %2962 = vadd.xlane.f32.xlu0 %v2961_v13  ;;  %v3038_v51 = vpop.permute.xlu2 %3037 }
0x176a   : > { %v3044_v5 = vmul.f32 %v3683_v52, %v3038_v51 }
0x1771   : > { %v3052_v58 = vpop.permute.xlu2 %3051 }
0x177a   : > { %3047 = vperm.xlu1 %3535, %v3681_v9  }
0x177d   : > { %3041 = vperm.xlu0 %3534, %v3682_v28  }
0x1785   : > { %3537 = vset.pattern.permute.xlu0 %v3698_v21 }
0x17d4   : > { %v2960_v36 = vpop.xlane.xlu1 %2959 }
0x17d5   : > { %v2964_v44 = vmul.f32 %v2960_v36, %v3973_v22 }
0x17d7   : > { %v2966_v43 = vadd.f32 1e-05, %v2964_v44 }
0x17d9   : > { %3672 = vrsqrt.f32 %v2966_v43  ;;  %vm2974_vm15 = vweird.f32 %v2966_v43 }
0x17dc   : > { %v2963_v38 = vpop.xlane.xlu0 %2962 }
0x17dd   : > { %v2965_v23 = vmul.f32 %v2963_v38, %v3973_v22 }
0x17df   : > { %v3673_v29 = vpop.eup %3672  ;;  %v2967_v3 = vadd.f32 1e-05, %v2965_v23 }
0x17e0   : > { %v2969_v24 = vmul.f32 %v3673_v29, %v2966_v43  ;;  %vm2975_vm12 = vweird.f32 %v3673_v29 }
0x17e1   : > { %3674 = vrsqrt.f32 %v2967_v3  ;;  %vm2976_vm4 = vmor %vm2974_vm15, %vm2975_vm12  ;;  %vm2984_vm2 = vweird.f32 %v2967_v3 }
0x17e2   : > { %v2970_v30 = vmul.f32 %v3673_v29, %v2969_v24 }
0x17e4   : > { %v2971_v31 = vmul.f32 0.5, %v2970_v30 }
0x17e6   : > { %v2972_v14 = vsub.f32 1.5, %v2971_v31 }
0x17e7   : > { %v3675_v57 = vpop.eup %3674 }
0x17e8   : > { %v2973_v32 = vmul.f32 %v3673_v29, %v2972_v14  ;;  %v2979_v15 = vmul.f32 %v3675_v57, %v2967_v3  ;;  %vm2985_vm1 = vweird.f32 %v3675_v57 }
0x17e9   : > { %vm2986_vm3 = vmor %vm2984_vm2, %vm2985_vm1 }
0x17ea   : > { %v2980_v22 = vmul.f32 %v3675_v57, %v2979_v15  ;;  %v2977_v33 = vsel %vm2976_vm4, %v3673_v29, %v2973_v32 }
0x17eb   : > { %v2988_v41 = vmul.f32 %v2977_v33, %v2954_v17 }
0x17ec   : > { %v2981_v45 = vmul.f32 0.5, %v2980_v22  ;;  %v3048_v59 = vpop.permute.xlu1 %3047 }
0x17ed   : > { %v2994_v8 = vmul.f32 %v3548_v35, %v2988_v41 }
0x17ee   : > { %v2982_v48 = vsub.f32 1.5, %v2981_v45 }
0x17ef   : > { %v3000_v40 = vadd.f32 %v3549_v50, %v2994_v8  ;;  %v3042_v56 = vpop.permute.xlu0 %3041 }
0x17f0   : > { %v2983_v46 = vmul.f32 %v3675_v57, %v2982_v48  ;;  %v3045_v61 = vmul.f32 %v3684_v60, %v3042_v56 }
0x17f2   : > { %v2987_v49 = vsel %vm2986_vm3, %v3675_v57, %v2983_v46 }
0x17f3   : > { %v2989_v27 = vmul.f32 %v2987_v49, %v2955_v18 }
0x17f5   : > { %v2995_v42 = vmul.f32 %v3548_v35, %v2989_v27 }
0x17f7   : > { %v3001_v16 = vadd.f32 %v3549_v50, %v2995_v42 }
0x17f9   : > { %v3006_v6 = vpack.c.bf16 %v3001_v16, %v3000_v40 }
0x17fb   : > { %3460 = vmatmul.msk.bf16.vlgmr.msrb.gmra.mxu2 %vm952_vm0, %v3006_v6 }
0x187e   : > { %v3031_v53 = vpop.f32.mrf.mxu2 }
0x187f   : > { %v3054_v54 = vmul.f32 %v3048_v59, %v3031_v53 }
0x1881   : > { %v3056_v55 = vadd.f32 %v3054_v54, %v3044_v5 }
0x1883   : > { %3058 = vst.msk [vmem:[%s910_s5] sm:$0xff] %vm1274_vm11, %v3056_v55 }
0x1886   : > { %v3033_v62 = vpop.f32.mrf.mxu2 }
0x1887   : > { %v3055_v39 = vmul.f32 %v3052_v58, %v3033_v62 }
0x1889   : > { %v3057_v4 = vadd.f32 %v3055_v39, %v3045_v61 }
0x188b   : > { %3059 = vst.msk [vmem:[%s910_s5 + $0x8] sm:$0xff] %vm1274_vm11, %v3057_v4 }
0x188c PF: > { %s4624_s0 = sld [smem:[#allocation2_spill]] }
0x1892   : > { %s38_s8 = sadd.s32 1, %s4624_s0  }
0x1893   : > { %p35_p4 = scmp.ge.s32.totalorder %s38_s8, 4  }
0x1895   :  { %37 = sbr.rel (!%p35_p4) target bundleno = 15 (0xf), region = 181 }

</bundles_post_ra>
